<compile_context>
chip_gen: v6e
topology: v6e:2x2x1
jax: 0.10.0
libtpu: 0.0.40
codegen_flags: <defaults>
</compile_context>

<pallas_src>
import functools

import jax
import jax.numpy as jnp
from jax import lax
from jax.experimental import pallas as pl
from jax.experimental.pallas import tpu as pltpu

_EPS = 1e-5  # PyTorch InstanceNorm2d default eps


def _reflect_index(i, n):
    """ReflectionPad index map (PyTorch semantics), i in [-pad, n+pad)."""
    if i < 0:
        return -i
    if i >= n:
        return 2 * (n - 1) - i
    return i


def _write_reflect_pad_kstacked(kpad_ref, get_src_row, H, W, d, Wp, Hp, C):
    """Write a reflection-padded (Hp x Wp) image into a K-stacked VMEM scratch.

    kpad_ref has shape (3*C, Hp*Wp); channel-block dx holds the padded image
    shifted left (flat, row pitch Wp) by dx*d:
        kpad[dx*C + c, q] = pad[c, q + dx*d]
    so the matmul operand for row-tap dy is simply kpad[:, dy*Wp*d : dy*Wp*d+L].

    get_src_row(r) must return the (C, W) source row r, 0 <= r < H.
    """
    dtype = kpad_ref.dtype
    L_total = Hp * Wp
    # Tail lanes of the shifted blocks (dx >= 1) are never written below but are
    # read (and masked out) by the dy=2 operand; keep them finite (zeros).
    kpad_ref[:, L_total - 2 * d:] = jnp.zeros((3 * C, 2 * d), dtype)

    for rp in range(Hp):
        src = get_src_row(_reflect_index(rp - d, H))              # (C, W)
        # Padded row built in registers: [src[d], ..., src[1], src, src[W-2], ...]
        left = [src[:, d - j:d - j + 1] for j in range(d)]
        right = [src[:, W - 2 - k:W - 1 - k] for k in range(d)]
        row = jnp.concatenate(left + [src] + right, axis=1).astype(dtype)  # (C, Wp)
        base = rp * Wp
        for dx in range(3):
            start = base - dx * d
            if start >= 0:
                kpad_ref[dx * C:(dx + 1) * C, start:start + Wp] = row
            else:
                # rp == 0, dx > 0: only the suffix of the row lands in range.
                kpad_ref[dx * C:(dx + 1) * C, 0:Wp + start] = row[:, -start:]


def _conv3x3_kstacked(w_ref, kpad_ref, Wp, d, L):
    """3x3 conv as 3 MXU matmuls (dx taps folded into K) with f32 accumulation.

    w_ref  : (3, Cout, 3*Cin) ref, already in compute dtype.
    kpad_ref: K-stacked padded scratch (3*Cin, Hp*Wp).
    Returns a (Cout, L) f32 pitched slab, L = H*Wp (2d garbage cols per row).
    """
    acc = jnp.dot(w_ref[0], kpad_ref[:, 0:L],
                  preferred_element_type=jnp.float32)
    for dy in (1, 2):
        off = dy * Wp * d
        acc = acc + jnp.dot(w_ref[dy], kpad_ref[:, off:off + L],
                            preferred_element_type=jnp.float32)
    return acc


def _instance_norm_masked(v, valid, inv_n):
    """Non-affine InstanceNorm over the valid lanes of a pitched (C, L) slab."""
    mean = jnp.sum(jnp.where(valid, v, 0.0), axis=1, keepdims=True) * inv_n
    c = v - mean
    var = jnp.sum(jnp.where(valid, c * c, 0.0), axis=1, keepdims=True) * inv_n
    return c * lax.rsqrt(var + _EPS)


def _resnet_block_kernel(x_ref, w1_ref, w2_ref, o_ref, kp1_ref, kp2_ref,
                         *, H, W, dilation):
    C = x_ref.shape[0]
    d = dilation
    Hp1, Wp1 = H + 2 * d, W + 2 * d
    Hp2, Wp2 = H + 2, W + 2
    L1, L2 = H * Wp1, H * Wp2
    inv_n = 1.0 / float(H * W)
    cdt = kp1_ref.dtype

    def valid_mask(L, Wp):
        col = lax.broadcasted_iota(jnp.int32, (1, L), 1)
        return (col % Wp) < W

    # ---- stage 1: ReflectionPad(d) -> Conv3x3(dilation d) -> IN -> ReLU ----
    _write_reflect_pad_kstacked(kp1_ref, lambda r: x_ref[:, r * W:(r + 1) * W],
                                H, W, d, Wp1, Hp1, C)
    h = _conv3x3_kstacked(w1_ref, kp1_ref, Wp1, d, L1)
    h = jnp.maximum(_instance_norm_masked(h, valid_mask(L1, Wp1), inv_n), 0.0)
    # Reuse the stage-1 scratch (dead after the stage-1 matmuls) for h.
    kp1_ref[:C, :L1] = h.astype(cdt)

    # ---- stage 2: ReflectionPad(1) -> Conv3x3 -> IN ----
    _write_reflect_pad_kstacked(
        kp2_ref, lambda r: kp1_ref[:C, r * Wp1:r * Wp1 + W],
        H, W, 1, Wp2, Hp2, C)
    y = _conv3x3_kstacked(w2_ref, kp2_ref, Wp2, 1, L2)
    y = _instance_norm_masked(y, valid_mask(L2, Wp2), inv_n)

    # Single lane-dense store of the pitched slab; de-pitch + residual add is
    # done in the wrapper (the pitched width H*Wp2 is lane-dense at prod shapes).
    o_ref[...] = y


def resnet_block_forward(x, params, dilation=1, compute_dtype=jnp.bfloat16):
    """x: (B, C, H, W) f32. params = (w1, b1, w2, b2), w*: (C, C, 3, 3) OIHW.

    compute_dtype=jnp.bfloat16 (default) feeds the MXU and pad scratch in bf16;
    conv accumulation, InstanceNorm statistics and the residual stay in f32.
    """
    B, C, H, W = x.shape
    w1, b1, w2, b2 = params
    del b1, b2  # bias before a non-affine InstanceNorm is cancelled exactly
    d = int(dilation)
    assert 1 <= d < min(H, W), "ReflectionPad requires 1 <= dilation < min(H, W)"

    Hp1, Wp1 = H + 2 * d, W + 2 * d
    Hp2, Wp2 = H + 2, W + 2
    L1, L2 = H * Wp1, H * Wp2

    def kstack_weights(w):
        # (Cout, Cin, ky, kx) -> (ky, Cout, kx*Cin), pre-cast once on the host.
        return jnp.transpose(w, (2, 0, 3, 1)).reshape(3, C, 3 * C).astype(compute_dtype)

    w1k, w2k = kstack_weights(w1), kstack_weights(w2)
    xf = x.reshape(B, C, H * W)

    # Honest scoped-VMEM estimate: double-buffered I/O + weights + K-stacked
    # scratch + f32 temporaries (conv acc / IN intermediates) + headroom.
    cdt_bytes = jnp.dtype(compute_dtype).itemsize
    io = 2 * (C * H * W * 4) + 2 * (C * L2 * 4)
    wts = 2 * 2 * (3 * C * 3 * C) * cdt_bytes
    scratch = 3 * C * (Hp1 * Wp1 + Hp2 * Wp2) * cdt_bytes
    tmp = 5 * C * max(L1, L2) * 4
    vmem_limit = int(min(max(io + wts + scratch + tmp + (2 << 20), 16 << 20),
                         96 << 20))
    # TODO(synk): row-tile H (with halo) + second parallel axis for v7x.

    kernel = functools.partial(_resnet_block_kernel, H=H, W=W, dilation=d)

    y_pitched = pl.pallas_call(
        kernel,
        out_shape=jax.ShapeDtypeStruct((B, C, L2), jnp.float32),
        grid=(B,),
        in_specs=[
            pl.BlockSpec((None, C, H * W), lambda b: (b, 0, 0)),   # x, flat
            pl.BlockSpec((3, C, 3 * C), lambda b: (0, 0, 0)),      # conv1 weights
            pl.BlockSpec((3, C, 3 * C), lambda b: (0, 0, 0)),      # conv2 weights
        ],
        out_specs=pl.BlockSpec((None, C, L2), lambda b: (b, 0, 0)),
        scratch_shapes=[
            pltpu.VMEM((3 * C, Hp1 * Wp1), compute_dtype),  # K-stacked pad, stage 1
            pltpu.VMEM((3 * C, Hp2 * Wp2), compute_dtype),  # K-stacked pad, stage 2
        ],
        compiler_params=pltpu.CompilerParams(
            dimension_semantics=("parallel",),
            vmem_limit_bytes=vmem_limit,
        ),
    )(xf, w1k, w2k)

    # De-pitch the (C, H*Wp2) slab and apply the residual (cheap XLA epilogue).
    y = y_pitched.reshape(B, C, H, Wp2)[:, :, :, :W]
    return x + y


def resnet_block_reference(x, params, dilation=1):
    """Pure-JAX reference mirroring the PyTorch module exactly (incl. bias)."""
    w1, b1, w2, b2 = params

    def conv(inp, w, b, dil):
        xp = jnp.pad(inp, ((0, 0), (0, 0), (dil, dil), (dil, dil)), mode="reflect")
        y = lax.conv_general_dilated(
            xp, w, window_strides=(1, 1), padding="VALID",
            rhs_dilation=(dil, dil),
            dimension_numbers=("NCHW", "OIHW", "NCHW"))
        return y + b[None, :, None, None]

    def instnorm(y):
        mean = y.mean(axis=(2, 3), keepdims=True)
        var = ((y - mean) ** 2).mean(axis=(2, 3), keepdims=True)
        return (y - mean) * lax.rsqrt(var + _EPS)

    h = jnp.maximum(instnorm(conv(x, w1, b1, dilation)), 0.0)
    h = instnorm(conv(h, w2, b2, 1))
    return x + h


def init_params(key, dim):
    """Deterministic init matching Conv2d default bounds (1/sqrt(fan_in))."""
    k1, k2, k3, k4 = jax.random.split(key, 4)
    bound = 1.0 / jnp.sqrt(dim * 3 * 3)
    w1 = jax.random.uniform(k1, (dim, dim, 3, 3), jnp.float32, -bound, bound)
    b1 = jax.random.uniform(k2, (dim,), jnp.float32, -bound, bound)
    w2 = jax.random.uniform(k3, (dim, dim, 3, 3), jnp.float32, -bound, bound)
    b2 = jax.random.uniform(k4, (dim,), jnp.float32, -bound, bound)
    return w1, b1, w2, b2


if __name__ == "__main__":
    key = jax.random.PRNGKey(0)
    kx, kp = jax.random.split(key)

    B, C, H, W = 2, 4, 16, 16
    x = jax.random.normal(kx, (B, C, H, W), dtype=jnp.float32)
    params = init_params(kp, C)

    ref = jax.block_until_ready(resnet_block_reference(x, params, dilation=1))

    # f32 compute path: tight match against the f32 reference.
    out_f32 = jax.block_until_ready(
        resnet_block_forward(x, params, dilation=1, compute_dtype=jnp.float32))
    assert out_f32.shape == (B, C, H, W) and out_f32.dtype == jnp.float32
    err_f32 = float(jnp.max(jnp.abs(out_f32 - ref)))
    assert jnp.allclose(out_f32, ref, atol=1e-4, rtol=1e-4), f"f32 diff {err_f32:e}"

    # Dilation=2 path (exercises the dilated reflect pad / K-stacked layout).
    ref_d2 = jax.block_until_ready(resnet_block_reference(x, params, dilation=2))
    out_d2 = jax.block_until_ready(
        resnet_block_forward(x, params, dilation=2, compute_dtype=jnp.float32))
    err_d2 = float(jnp.max(jnp.abs(out_d2 - ref_d2)))
    assert jnp.allclose(out_d2, ref_d2, atol=1e-4, rtol=1e-4), f"d2 diff {err_d2:e}"

    # bf16 production path: looser tolerance (bf16 matmul inputs, f32 accum).
    out_bf16 = jax.block_until_ready(
        resnet_block_forward(x, params, dilation=1, compute_dtype=jnp.bfloat16))
    err_bf16 = float(jnp.max(jnp.abs(out_bf16 - ref)))
    assert jnp.allclose(out_bf16, ref, atol=2.5e-1, rtol=5e-2), f"bf16 diff {err_bf16:e}"

    print("KERNEL_OK")
</pallas_src>

<mosaic_0001>
module attributes {stable_mosaic.version = 11 : i64} {
  func.func @_resnet_block_kernel(%arg0: i32, %arg1: memref<1x4x256xf32, #tpu.memory_space<vmem>>, %arg2: memref<3x4x12xf32, #tpu.memory_space<vmem>>, %arg3: memref<3x4x12xf32, #tpu.memory_space<vmem>>, %arg4: memref<1x4x288xf32, #tpu.memory_space<vmem>>, %arg5: memref<12x324xf32, #tpu.memory_space<vmem>>, %arg6: memref<12x324xf32, #tpu.memory_space<vmem>>) attributes {dimension_semantics = [#tpu.dimension_semantics<parallel>], iteration_bounds = array<i64: 2>, scalar_prefetch = 0 : i64, scratch_operands = 2 : i64, tpu.core_type = #tpu.core_type<tc>, window_params = [{transform_indices = @transform_0, window_bounds = array<i64: 1, 4, 256>}, {pipeline_mode = #tpu.pipeline_mode<synchronous>, transform_indices = @transform_1, window_bounds = array<i64: 3, 4, 12>}, {pipeline_mode = #tpu.pipeline_mode<synchronous>, transform_indices = @transform_2, window_bounds = array<i64: 3, 4, 12>}, {transform_indices = @transform_3, window_bounds = array<i64: 1, 4, 288>}]} {
    %cst = arith.constant 0.000000e+00 : f32
    %0 = vector.broadcast %cst : f32 to vector<12x2xf32>
    %c0 = arith.constant 0 : index
    %c322 = arith.constant 322 : index
    %1 = vector.load %arg5[%c0, %c322] : memref<12x324xf32, #tpu.memory_space<vmem>>, vector<12x2xf32>
    tpu.vector_store %arg5[%c0, %c322], %0 {strides = array<i32>} : memref<12x324xf32, #tpu.memory_space<vmem>>, vector<12x2xf32>,
    %c0_0 = arith.constant 0 : index
    %c0_1 = arith.constant 0 : index
    %c16 = arith.constant 16 : index
    %2 = vector.load %arg1[%c0_0, %c0_1, %c16] : memref<1x4x256xf32, #tpu.memory_space<vmem>>, vector<1x4x16xf32>
    %3 = vector.shape_cast %2 : vector<1x4x16xf32> to vector<4x16xf32>
    %4 = vector.extract_strided_slice %3 {offsets = [0, 1], sizes = [4, 1], strides = [1, 1]} : vector<4x16xf32> to vector<4x1xf32>
    %5 = vector.extract_strided_slice %3 {offsets = [0, 14], sizes = [4, 1], strides = [1, 1]} : vector<4x16xf32> to vector<4x1xf32>
    %6 = tpu.concatenate %4, %3, %5 in 1 : vector<4x1xf32>, vector<4x16xf32>, vector<4x1xf32> -> vector<4x18xf32>
    %c0_2 = arith.constant 0 : index
    %c0_3 = arith.constant 0 : index
    %7 = vector.load %arg5[%c0_2, %c0_3] : memref<12x324xf32, #tpu.memory_space<vmem>>, vector<4x18xf32>
    tpu.vector_store %arg5[%c0_2, %c0_3], %6 {strides = array<i32>} : memref<12x324xf32, #tpu.memory_space<vmem>>, vector<4x18xf32>,
    %8 = vector.extract_strided_slice %6 {offsets = [0, 1], sizes = [4, 17], strides = [1, 1]} : vector<4x18xf32> to vector<4x17xf32>
    %c4 = arith.constant 4 : index
    %c0_4 = arith.constant 0 : index
    %9 = vector.load %arg5[%c4, %c0_4] : memref<12x324xf32, #tpu.memory_space<vmem>>, vector<4x17xf32>
    tpu.vector_store %arg5[%c4, %c0_4], %8 {strides = array<i32>} : memref<12x324xf32, #tpu.memory_space<vmem>>, vector<4x17xf32>,
    %10 = vector.extract_strided_slice %6 {offsets = [0, 2], sizes = [4, 16], strides = [1, 1]} : vector<4x18xf32> to vector<4x16xf32>
    %c8 = arith.constant 8 : index
    %c0_5 = arith.constant 0 : index
    %11 = vector.load %arg5[%c8, %c0_5] : memref<12x324xf32, #tpu.memory_space<vmem>>, vector<4x16xf32>
    tpu.vector_store %arg5[%c8, %c0_5], %10 {strides = array<i32>} : memref<12x324xf32, #tpu.memory_space<vmem>>, vector<4x16xf32>,
    %c0_6 = arith.constant 0 : index
    %c0_7 = arith.constant 0 : index
    %c0_8 = arith.constant 0 : index
    %12 = vector.load %arg1[%c0_6, %c0_7, %c0_8] : memref<1x4x256xf32, #tpu.memory_space<vmem>>, vector<1x4x16xf32>
    %13 = vector.shape_cast %12 : vector<1x4x16xf32> to vector<4x16xf32>
    %14 = vector.extract_strided_slice %13 {offsets = [0, 1], sizes = [4, 1], strides = [1, 1]} : vector<4x16xf32> to vector<4x1xf32>
    %15 = vector.extract_strided_slice %13 {offsets = [0, 14], sizes = [4, 1], strides = [1, 1]} : vector<4x16xf32> to vector<4x1xf32>
    %16 = tpu.concatenate %14, %13, %15 in 1 : vector<4x1xf32>, vector<4x16xf32>, vector<4x1xf32> -> vector<4x18xf32>
    %c0_9 = arith.constant 0 : index
    %c18 = arith.constant 18 : index
    %17 = vector.load %arg5[%c0_9, %c18] : memref<12x324xf32, #tpu.memory_space<vmem>>, vector<4x18xf32>
    tpu.vector_store %arg5[%c0_9, %c18], %16 {strides = array<i32>} : memref<12x324xf32, #tpu.memory_space<vmem>>, vector<4x18xf32>,
    %c4_10 = arith.constant 4 : index
    %c17 = arith.constant 17 : index
    %18 = vector.load %arg5[%c4_10, %c17] : memref<12x324xf32, #tpu.memory_space<vmem>>, vector<4x18xf32>
    tpu.vector_store %arg5[%c4_10, %c17], %16 {strides = array<i32>} : memref<12x324xf32, #tpu.memory_space<vmem>>, vector<4x18xf32>,
    %c8_11 = arith.constant 8 : index
    %c16_12 = arith.constant 16 : index
    %19 = vector.load %arg5[%c8_11, %c16_12] : memref<12x324xf32, #tpu.memory_space<vmem>>, vector<4x18xf32>
    tpu.vector_store %arg5[%c8_11, %c16_12], %16 {strides = array<i32>} : memref<12x324xf32, #tpu.memory_space<vmem>>, vector<4x18xf32>,
    %c0_13 = arith.constant 0 : index
    %c0_14 = arith.constant 0 : index
    %c16_15 = arith.constant 16 : index
    %20 = vector.load %arg1[%c0_13, %c0_14, %c16_15] : memref<1x4x256xf32, #tpu.memory_space<vmem>>, vector<1x4x16xf32>
    %21 = vector.shape_cast %20 : vector<1x4x16xf32> to vector<4x16xf32>
    %22 = vector.extract_strided_slice %21 {offsets = [0, 1], sizes = [4, 1], strides = [1, 1]} : vector<4x16xf32> to vector<4x1xf32>
    %23 = vector.extract_strided_slice %21 {offsets = [0, 14], sizes = [4, 1], strides = [1, 1]} : vector<4x16xf32> to vector<4x1xf32>
    %24 = tpu.concatenate %22, %21, %23 in 1 : vector<4x1xf32>, vector<4x16xf32>, vector<4x1xf32> -> vector<4x18xf32>
    %c0_16 = arith.constant 0 : index
    %c36 = arith.constant 36 : index
    %25 = vector.load %arg5[%c0_16, %c36] : memref<12x324xf32, #tpu.memory_space<vmem>>, vector<4x18xf32>
    tpu.vector_store %arg5[%c0_16, %c36], %24 {strides = array<i32>} : memref<12x324xf32, #tpu.memory_space<vmem>>, vector<4x18xf32>,
    %c4_17 = arith.constant 4 : index
    %c35 = arith.constant 35 : index
    %26 = vector.load %arg5[%c4_17, %c35] : memref<12x324xf32, #tpu.memory_space<vmem>>, vector<4x18xf32>
    tpu.vector_store %arg5[%c4_17, %c35], %24 {strides = array<i32>} : memref<12x324xf32, #tpu.memory_space<vmem>>, vector<4x18xf32>,
    %c8_18 = arith.constant 8 : index
    %c34 = arith.constant 34 : index
    %27 = vector.load %arg5[%c8_18, %c34] : memref<12x324xf32, #tpu.memory_space<vmem>>, vector<4x18xf32>
    tpu.vector_store %arg5[%c8_18, %c34], %24 {strides = array<i32>} : memref<12x324xf32, #tpu.memory_space<vmem>>, vector<4x18xf32>,
    %c0_19 = arith.constant 0 : index
    %c0_20 = arith.constant 0 : index
    %c32 = arith.constant 32 : index
    %28 = vector.load %arg1[%c0_19, %c0_20, %c32] : memref<1x4x256xf32, #tpu.memory_space<vmem>>, vector<1x4x16xf32>
    %29 = vector.shape_cast %28 : vector<1x4x16xf32> to vector<4x16xf32>
    %30 = vector.extract_strided_slice %29 {offsets = [0, 1], sizes = [4, 1], strides = [1, 1]} : vector<4x16xf32> to vector<4x1xf32>
    %31 = vector.extract_strided_slice %29 {offsets = [0, 14], sizes = [4, 1], strides = [1, 1]} : vector<4x16xf32> to vector<4x1xf32>
    %32 = tpu.concatenate %30, %29, %31 in 1 : vector<4x1xf32>, vector<4x16xf32>, vector<4x1xf32> -> vector<4x18xf32>
    %c0_21 = arith.constant 0 : index
    %c54 = arith.constant 54 : index
    %33 = vector.load %arg5[%c0_21, %c54] : memref<12x324xf32, #tpu.memory_space<vmem>>, vector<4x18xf32>
    tpu.vector_store %arg5[%c0_21, %c54], %32 {strides = array<i32>} : memref<12x324xf32, #tpu.memory_space<vmem>>, vector<4x18xf32>,
    %c4_22 = arith.constant 4 : index
    %c53 = arith.constant 53 : index
    %34 = vector.load %arg5[%c4_22, %c53] : memref<12x324xf32, #tpu.memory_space<vmem>>, vector<4x18xf32>
    tpu.vector_store %arg5[%c4_22, %c53], %32 {strides = array<i32>} : memref<12x324xf32, #tpu.memory_space<vmem>>, vector<4x18xf32>,
    %c8_23 = arith.constant 8 : index
    %c52 = arith.constant 52 : index
    %35 = vector.load %arg5[%c8_23, %c52] : memref<12x324xf32, #tpu.memory_space<vmem>>, vector<4x18xf32>
    tpu.vector_store %arg5[%c8_23, %c52], %32 {strides = array<i32>} : memref<12x324xf32, #tpu.memory_space<vmem>>, vector<4x18xf32>,
    %c0_24 = arith.constant 0 : index
    %c0_25 = arith.constant 0 : index
    %c48 = arith.constant 48 : index
    %36 = vector.load %arg1[%c0_24, %c0_25, %c48] : memref<1x4x256xf32, #tpu.memory_space<vmem>>, vector<1x4x16xf32>
    %37 = vector.shape_cast %36 : vector<1x4x16xf32> to vector<4x16xf32>
    %38 = vector.extract_strided_slice %37 {offsets = [0, 1], sizes = [4, 1], strides = [1, 1]} : vector<4x16xf32> to vector<4x1xf32>
    %39 = vector.extract_strided_slice %37 {offsets = [0, 14], sizes = [4, 1], strides = [1, 1]} : vector<4x16xf32> to vector<4x1xf32>
    %40 = tpu.concatenate %38, %37, %39 in 1 : vector<4x1xf32>, vector<4x16xf32>, vector<4x1xf32> -> vector<4x18xf32>
    %c0_26 = arith.constant 0 : index
    %c72 = arith.constant 72 : index
    %41 = vector.load %arg5[%c0_26, %c72] : memref<12x324xf32, #tpu.memory_space<vmem>>, vector<4x18xf32>
    tpu.vector_store %arg5[%c0_26, %c72], %40 {strides = array<i32>} : memref<12x324xf32, #tpu.memory_space<vmem>>, vector<4x18xf32>,
    %c4_27 = arith.constant 4 : index
    %c71 = arith.constant 71 : index
    %42 = vector.load %arg5[%c4_27, %c71] : memref<12x324xf32, #tpu.memory_space<vmem>>, vector<4x18xf32>
    tpu.vector_store %arg5[%c4_27, %c71], %40 {strides = array<i32>} : memref<12x324xf32, #tpu.memory_space<vmem>>, vector<4x18xf32>,
    %c8_28 = arith.constant 8 : index
    %c70 = arith.constant 70 : index
    %43 = vector.load %arg5[%c8_28, %c70] : memref<12x324xf32, #tpu.memory_space<vmem>>, vector<4x18xf32>
    tpu.vector_store %arg5[%c8_28, %c70], %40 {strides = array<i32>} : memref<12x324xf32, #tpu.memory_space<vmem>>, vector<4x18xf32>,
    %c0_29 = arith.constant 0 : index
    %c0_30 = arith.constant 0 : index
    %c64 = arith.constant 64 : index
    %44 = vector.load %arg1[%c0_29, %c0_30, %c64] : memref<1x4x256xf32, #tpu.memory_space<vmem>>, vector<1x4x16xf32>
    %45 = vector.shape_cast %44 : vector<1x4x16xf32> to vector<4x16xf32>
    %46 = vector.extract_strided_slice %45 {offsets = [0, 1], sizes = [4, 1], strides = [1, 1]} : vector<4x16xf32> to vector<4x1xf32>
    %47 = vector.extract_strided_slice %45 {offsets = [0, 14], sizes = [4, 1], strides = [1, 1]} : vector<4x16xf32> to vector<4x1xf32>
    %48 = tpu.concatenate %46, %45, %47 in 1 : vector<4x1xf32>, vector<4x16xf32>, vector<4x1xf32> -> vector<4x18xf32>
    %c0_31 = arith.constant 0 : index
    %c90 = arith.constant 90 : index
    %49 = vector.load %arg5[%c0_31, %c90] : memref<12x324xf32, #tpu.memory_space<vmem>>, vector<4x18xf32>
    tpu.vector_store %arg5[%c0_31, %c90], %48 {strides = array<i32>} : memref<12x324xf32, #tpu.memory_space<vmem>>, vector<4x18xf32>,
    %c4_32 = arith.constant 4 : index
    %c89 = arith.constant 89 : index
    %50 = vector.load %arg5[%c4_32, %c89] : memref<12x324xf32, #tpu.memory_space<vmem>>, vector<4x18xf32>
    tpu.vector_store %arg5[%c4_32, %c89], %48 {strides = array<i32>} : memref<12x324xf32, #tpu.memory_space<vmem>>, vector<4x18xf32>,
    %c8_33 = arith.constant 8 : index
    %c88 = arith.constant 88 : index
    %51 = vector.load %arg5[%c8_33, %c88] : memref<12x324xf32, #tpu.memory_space<vmem>>, vector<4x18xf32>
    tpu.vector_store %arg5[%c8_33, %c88], %48 {strides = array<i32>} : memref<12x324xf32, #tpu.memory_space<vmem>>, vector<4x18xf32>,
    %c0_34 = arith.constant 0 : index
    %c0_35 = arith.constant 0 : index
    %c80 = arith.constant 80 : index
    %52 = vector.load %arg1[%c0_34, %c0_35, %c80] : memref<1x4x256xf32, #tpu.memory_space<vmem>>, vector<1x4x16xf32>
    %53 = vector.shape_cast %52 : vector<1x4x16xf32> to vector<4x16xf32>
    %54 = vector.extract_strided_slice %53 {offsets = [0, 1], sizes = [4, 1], strides = [1, 1]} : vector<4x16xf32> to vector<4x1xf32>
    %55 = vector.extract_strided_slice %53 {offsets = [0, 14], sizes = [4, 1], strides = [1, 1]} : vector<4x16xf32> to vector<4x1xf32>
    %56 = tpu.concatenate %54, %53, %55 in 1 : vector<4x1xf32>, vector<4x16xf32>, vector<4x1xf32> -> vector<4x18xf32>
    %c0_36 = arith.constant 0 : index
    %c108 = arith.constant 108 : index
    %57 = vector.load %arg5[%c0_36, %c108] : memref<12x324xf32, #tpu.memory_space<vmem>>, vector<4x18xf32>
    tpu.vector_store %arg5[%c0_36, %c108], %56 {strides = array<i32>} : memref<12x324xf32, #tpu.memory_space<vmem>>, vector<4x18xf32>,
    %c4_37 = arith.constant 4 : index
    %c107 = arith.constant 107 : index
    %58 = vector.load %arg5[%c4_37, %c107] : memref<12x324xf32, #tpu.memory_space<vmem>>, vector<4x18xf32>
    tpu.vector_store %arg5[%c4_37, %c107], %56 {strides = array<i32>} : memref<12x324xf32, #tpu.memory_space<vmem>>, vector<4x18xf32>,
    %c8_38 = arith.constant 8 : index
    %c106 = arith.constant 106 : index
    %59 = vector.load %arg5[%c8_38, %c106] : memref<12x324xf32, #tpu.memory_space<vmem>>, vector<4x18xf32>
    tpu.vector_store %arg5[%c8_38, %c106], %56 {strides = array<i32>} : memref<12x324xf32, #tpu.memory_space<vmem>>, vector<4x18xf32>,
    %c0_39 = arith.constant 0 : index
    %c0_40 = arith.constant 0 : index
    %c96 = arith.constant 96 : index
    %60 = vector.load %arg1[%c0_39, %c0_40, %c96] : memref<1x4x256xf32, #tpu.memory_space<vmem>>, vector<1x4x16xf32>
    %61 = vector.shape_cast %60 : vector<1x4x16xf32> to vector<4x16xf32>
    %62 = vector.extract_strided_slice %61 {offsets = [0, 1], sizes = [4, 1], strides = [1, 1]} : vector<4x16xf32> to vector<4x1xf32>
    %63 = vector.extract_strided_slice %61 {offsets = [0, 14], sizes = [4, 1], strides = [1, 1]} : vector<4x16xf32> to vector<4x1xf32>
    %64 = tpu.concatenate %62, %61, %63 in 1 : vector<4x1xf32>, vector<4x16xf32>, vector<4x1xf32> -> vector<4x18xf32>
    %c0_41 = arith.constant 0 : index
    %c126 = arith.constant 126 : index
    %65 = vector.load %arg5[%c0_41, %c126] : memref<12x324xf32, #tpu.memory_space<vmem>>, vector<4x18xf32>
    tpu.vector_store %arg5[%c0_41, %c126], %64 {strides = array<i32>} : memref<12x324xf32, #tpu.memory_space<vmem>>, vector<4x18xf32>,
    %c4_42 = arith.constant 4 : index
    %c125 = arith.constant 125 : index
    %66 = vector.load %arg5[%c4_42, %c125] : memref<12x324xf32, #tpu.memory_space<vmem>>, vector<4x18xf32>
    tpu.vector_store %arg5[%c4_42, %c125], %64 {strides = array<i32>} : memref<12x324xf32, #tpu.memory_space<vmem>>, vector<4x18xf32>,
    %c8_43 = arith.constant 8 : index
    %c124 = arith.constant 124 : index
    %67 = vector.load %arg5[%c8_43, %c124] : memref<12x324xf32, #tpu.memory_space<vmem>>, vector<4x18xf32>
    tpu.vector_store %arg5[%c8_43, %c124], %64 {strides = array<i32>} : memref<12x324xf32, #tpu.memory_space<vmem>>, vector<4x18xf32>,
    %c0_44 = arith.constant 0 : index
    %c0_45 = arith.constant 0 : index
    %c112 = arith.constant 112 : index
    %68 = vector.load %arg1[%c0_44, %c0_45, %c112] : memref<1x4x256xf32, #tpu.memory_space<vmem>>, vector<1x4x16xf32>
    %69 = vector.shape_cast %68 : vector<1x4x16xf32> to vector<4x16xf32>
    %70 = vector.extract_strided_slice %69 {offsets = [0, 1], sizes = [4, 1], strides = [1, 1]} : vector<4x16xf32> to vector<4x1xf32>
    %71 = vector.extract_strided_slice %69 {offsets = [0, 14], sizes = [4, 1], strides = [1, 1]} : vector<4x16xf32> to vector<4x1xf32>
    %72 = tpu.concatenate %70, %69, %71 in 1 : vector<4x1xf32>, vector<4x16xf32>, vector<4x1xf32> -> vector<4x18xf32>
    %c0_46 = arith.constant 0 : index
    %c144 = arith.constant 144 : index
    %73 = vector.load %arg5[%c0_46, %c144] : memref<12x324xf32, #tpu.memory_space<vmem>>, vector<4x18xf32>
    tpu.vector_store %arg5[%c0_46, %c144], %72 {strides = array<i32>} : memref<12x324xf32, #tpu.memory_space<vmem>>, vector<4x18xf32>,
    %c4_47 = arith.constant 4 : index
    %c143 = arith.constant 143 : index
    %74 = vector.load %arg5[%c4_47, %c143] : memref<12x324xf32, #tpu.memory_space<vmem>>, vector<4x18xf32>
    tpu.vector_store %arg5[%c4_47, %c143], %72 {strides = array<i32>} : memref<12x324xf32, #tpu.memory_space<vmem>>, vector<4x18xf32>,
    %c8_48 = arith.constant 8 : index
    %c142 = arith.constant 142 : index
    %75 = vector.load %arg5[%c8_48, %c142] : memref<12x324xf32, #tpu.memory_space<vmem>>, vector<4x18xf32>
    tpu.vector_store %arg5[%c8_48, %c142], %72 {strides = array<i32>} : memref<12x324xf32, #tpu.memory_space<vmem>>, vector<4x18xf32>,
    %c0_49 = arith.constant 0 : index
    %c0_50 = arith.constant 0 : index
    %c128 = arith.constant 128 : index
    %76 = vector.load %arg1[%c0_49, %c0_50, %c128] : memref<1x4x256xf32, #tpu.memory_space<vmem>>, vector<1x4x16xf32>
    %77 = vector.shape_cast %76 : vector<1x4x16xf32> to vector<4x16xf32>
    %78 = vector.extract_strided_slice %77 {offsets = [0, 1], sizes = [4, 1], strides = [1, 1]} : vector<4x16xf32> to vector<4x1xf32>
    %79 = vector.extract_strided_slice %77 {offsets = [0, 14], sizes = [4, 1], strides = [1, 1]} : vector<4x16xf32> to vector<4x1xf32>
    %80 = tpu.concatenate %78, %77, %79 in 1 : vector<4x1xf32>, vector<4x16xf32>, vector<4x1xf32> -> vector<4x18xf32>
    %c0_51 = arith.constant 0 : index
    %c162 = arith.constant 162 : index
    %81 = vector.load %arg5[%c0_51, %c162] : memref<12x324xf32, #tpu.memory_space<vmem>>, vector<4x18xf32>
    tpu.vector_store %arg5[%c0_51, %c162], %80 {strides = array<i32>} : memref<12x324xf32, #tpu.memory_space<vmem>>, vector<4x18xf32>,
    %c4_52 = arith.constant 4 : index
    %c161 = arith.constant 161 : index
    %82 = vector.load %arg5[%c4_52, %c161] : memref<12x324xf32, #tpu.memory_space<vmem>>, vector<4x18xf32>
    tpu.vector_store %arg5[%c4_52, %c161], %80 {strides = array<i32>} : memref<12x324xf32, #tpu.memory_space<vmem>>, vector<4x18xf32>,
    %c8_53 = arith.constant 8 : index
    %c160 = arith.constant 160 : index
    %83 = vector.load %arg5[%c8_53, %c160] : memref<12x324xf32, #tpu.memory_space<vmem>>, vector<4x18xf32>
    tpu.vector_store %arg5[%c8_53, %c160], %80 {strides = array<i32>} : memref<12x324xf32, #tpu.memory_space<vmem>>, vector<4x18xf32>,
    %c0_54 = arith.constant 0 : index
    %c0_55 = arith.constant 0 : index
    %c144_56 = arith.constant 144 : index
    %84 = vector.load %arg1[%c0_54, %c0_55, %c144_56] : memref<1x4x256xf32, #tpu.memory_space<vmem>>, vector<1x4x16xf32>
    %85 = vector.shape_cast %84 : vector<1x4x16xf32> to vector<4x16xf32>
    %86 = vector.extract_strided_slice %85 {offsets = [0, 1], sizes = [4, 1], strides = [1, 1]} : vector<4x16xf32> to vector<4x1xf32>
    %87 = vector.extract_strided_slice %85 {offsets = [0, 14], sizes = [4, 1], strides = [1, 1]} : vector<4x16xf32> to vector<4x1xf32>
    %88 = tpu.concatenate %86, %85, %87 in 1 : vector<4x1xf32>, vector<4x16xf32>, vector<4x1xf32> -> vector<4x18xf32>
    %c0_57 = arith.constant 0 : index
    %c180 = arith.constant 180 : index
    %89 = vector.load %arg5[%c0_57, %c180] : memref<12x324xf32, #tpu.memory_space<vmem>>, vector<4x18xf32>
    tpu.vector_store %arg5[%c0_57, %c180], %88 {strides = array<i32>} : memref<12x324xf32, #tpu.memory_space<vmem>>, vector<4x18xf32>,
    %c4_58 = arith.constant 4 : index
    %c179 = arith.constant 179 : index
    %90 = vector.load %arg5[%c4_58, %c179] : memref<12x324xf32, #tpu.memory_space<vmem>>, vector<4x18xf32>
    tpu.vector_store %arg5[%c4_58, %c179], %88 {strides = array<i32>} : memref<12x324xf32, #tpu.memory_space<vmem>>, vector<4x18xf32>,
    %c8_59 = arith.constant 8 : index
    %c178 = arith.constant 178 : index
    %91 = vector.load %arg5[%c8_59, %c178] : memref<12x324xf32, #tpu.memory_space<vmem>>, vector<4x18xf32>
    tpu.vector_store %arg5[%c8_59, %c178], %88 {strides = array<i32>} : memref<12x324xf32, #tpu.memory_space<vmem>>, vector<4x18xf32>,
    %c0_60 = arith.constant 0 : index
    %c0_61 = arith.constant 0 : index
    %c160_62 = arith.constant 160 : index
    %92 = vector.load %arg1[%c0_60, %c0_61, %c160_62] : memref<1x4x256xf32, #tpu.memory_space<vmem>>, vector<1x4x16xf32>
    %93 = vector.shape_cast %92 : vector<1x4x16xf32> to vector<4x16xf32>
    %94 = vector.extract_strided_slice %93 {offsets = [0, 1], sizes = [4, 1], strides = [1, 1]} : vector<4x16xf32> to vector<4x1xf32>
    %95 = vector.extract_strided_slice %93 {offsets = [0, 14], sizes = [4, 1], strides = [1, 1]} : vector<4x16xf32> to vector<4x1xf32>
    %96 = tpu.concatenate %94, %93, %95 in 1 : vector<4x1xf32>, vector<4x16xf32>, vector<4x1xf32> -> vector<4x18xf32>
    %c0_63 = arith.constant 0 : index
    %c198 = arith.constant 198 : index
    %97 = vector.load %arg5[%c0_63, %c198] : memref<12x324xf32, #tpu.memory_space<vmem>>, vector<4x18xf32>
    tpu.vector_store %arg5[%c0_63, %c198], %96 {strides = array<i32>} : memref<12x324xf32, #tpu.memory_space<vmem>>, vector<4x18xf32>,
    %c4_64 = arith.constant 4 : index
    %c197 = arith.constant 197 : index
    %98 = vector.load %arg5[%c4_64, %c197] : memref<12x324xf32, #tpu.memory_space<vmem>>, vector<4x18xf32>
    tpu.vector_store %arg5[%c4_64, %c197], %96 {strides = array<i32>} : memref<12x324xf32, #tpu.memory_space<vmem>>, vector<4x18xf32>,
    %c8_65 = arith.constant 8 : index
    %c196 = arith.constant 196 : index
    %99 = vector.load %arg5[%c8_65, %c196] : memref<12x324xf32, #tpu.memory_space<vmem>>, vector<4x18xf32>
    tpu.vector_store %arg5[%c8_65, %c196], %96 {strides = array<i32>} : memref<12x324xf32, #tpu.memory_space<vmem>>, vector<4x18xf32>,
    %c0_66 = arith.constant 0 : index
    %c0_67 = arith.constant 0 : index
    %c176 = arith.constant 176 : index
    %100 = vector.load %arg1[%c0_66, %c0_67, %c176] : memref<1x4x256xf32, #tpu.memory_space<vmem>>, vector<1x4x16xf32>
    %101 = vector.shape_cast %100 : vector<1x4x16xf32> to vector<4x16xf32>
    %102 = vector.extract_strided_slice %101 {offsets = [0, 1], sizes = [4, 1], strides = [1, 1]} : vector<4x16xf32> to vector<4x1xf32>
    %103 = vector.extract_strided_slice %101 {offsets = [0, 14], sizes = [4, 1], strides = [1, 1]} : vector<4x16xf32> to vector<4x1xf32>
    %104 = tpu.concatenate %102, %101, %103 in 1 : vector<4x1xf32>, vector<4x16xf32>, vector<4x1xf32> -> vector<4x18xf32>
    %c0_68 = arith.constant 0 : index
    %c216 = arith.constant 216 : index
    %105 = vector.load %arg5[%c0_68, %c216] : memref<12x324xf32, #tpu.memory_space<vmem>>, vector<4x18xf32>
    tpu.vector_store %arg5[%c0_68, %c216], %104 {strides = array<i32>} : memref<12x324xf32, #tpu.memory_space<vmem>>, vector<4x18xf32>,
    %c4_69 = arith.constant 4 : index
    %c215 = arith.constant 215 : index
    %106 = vector.load %arg5[%c4_69, %c215] : memref<12x324xf32, #tpu.memory_space<vmem>>, vector<4x18xf32>
    tpu.vector_store %arg5[%c4_69, %c215], %104 {strides = array<i32>} : memref<12x324xf32, #tpu.memory_space<vmem>>, vector<4x18xf32>,
    %c8_70 = arith.constant 8 : index
    %c214 = arith.constant 214 : index
    %107 = vector.load %arg5[%c8_70, %c214] : memref<12x324xf32, #tpu.memory_space<vmem>>, vector<4x18xf32>
    tpu.vector_store %arg5[%c8_70, %c214], %104 {strides = array<i32>} : memref<12x324xf32, #tpu.memory_space<vmem>>, vector<4x18xf32>,
    %c0_71 = arith.constant 0 : index
    %c0_72 = arith.constant 0 : index
    %c192 = arith.constant 192 : index
    %108 = vector.load %arg1[%c0_71, %c0_72, %c192] : memref<1x4x256xf32, #tpu.memory_space<vmem>>, vector<1x4x16xf32>
    %109 = vector.shape_cast %108 : vector<1x4x16xf32> to vector<4x16xf32>
    %110 = vector.extract_strided_slice %109 {offsets = [0, 1], sizes = [4, 1], strides = [1, 1]} : vector<4x16xf32> to vector<4x1xf32>
    %111 = vector.extract_strided_slice %109 {offsets = [0, 14], sizes = [4, 1], strides = [1, 1]} : vector<4x16xf32> to vector<4x1xf32>
    %112 = tpu.concatenate %110, %109, %111 in 1 : vector<4x1xf32>, vector<4x16xf32>, vector<4x1xf32> -> vector<4x18xf32>
    %c0_73 = arith.constant 0 : index
    %c234 = arith.constant 234 : index
    %113 = vector.load %arg5[%c0_73, %c234] : memref<12x324xf32, #tpu.memory_space<vmem>>, vector<4x18xf32>
    tpu.vector_store %arg5[%c0_73, %c234], %112 {strides = array<i32>} : memref<12x324xf32, #tpu.memory_space<vmem>>, vector<4x18xf32>,
    %c4_74 = arith.constant 4 : index
    %c233 = arith.constant 233 : index
    %114 = vector.load %arg5[%c4_74, %c233] : memref<12x324xf32, #tpu.memory_space<vmem>>, vector<4x18xf32>
    tpu.vector_store %arg5[%c4_74, %c233], %112 {strides = array<i32>} : memref<12x324xf32, #tpu.memory_space<vmem>>, vector<4x18xf32>,
    %c8_75 = arith.constant 8 : index
    %c232 = arith.constant 232 : index
    %115 = vector.load %arg5[%c8_75, %c232] : memref<12x324xf32, #tpu.memory_space<vmem>>, vector<4x18xf32>
    tpu.vector_store %arg5[%c8_75, %c232], %112 {strides = array<i32>} : memref<12x324xf32, #tpu.memory_space<vmem>>, vector<4x18xf32>,
    %c0_76 = arith.constant 0 : index
    %c0_77 = arith.constant 0 : index
    %c208 = arith.constant 208 : index
    %116 = vector.load %arg1[%c0_76, %c0_77, %c208] : memref<1x4x256xf32, #tpu.memory_space<vmem>>, vector<1x4x16xf32>
    %117 = vector.shape_cast %116 : vector<1x4x16xf32> to vector<4x16xf32>
    %118 = vector.extract_strided_slice %117 {offsets = [0, 1], sizes = [4, 1], strides = [1, 1]} : vector<4x16xf32> to vector<4x1xf32>
    %119 = vector.extract_strided_slice %117 {offsets = [0, 14], sizes = [4, 1], strides = [1, 1]} : vector<4x16xf32> to vector<4x1xf32>
    %120 = tpu.concatenate %118, %117, %119 in 1 : vector<4x1xf32>, vector<4x16xf32>, vector<4x1xf32> -> vector<4x18xf32>
    %c0_78 = arith.constant 0 : index
    %c252 = arith.constant 252 : index
    %121 = vector.load %arg5[%c0_78, %c252] : memref<12x324xf32, #tpu.memory_space<vmem>>, vector<4x18xf32>
    tpu.vector_store %arg5[%c0_78, %c252], %120 {strides = array<i32>} : memref<12x324xf32, #tpu.memory_space<vmem>>, vector<4x18xf32>,
    %c4_79 = arith.constant 4 : index
    %c251 = arith.constant 251 : index
    %122 = vector.load %arg5[%c4_79, %c251] : memref<12x324xf32, #tpu.memory_space<vmem>>, vector<4x18xf32>
    tpu.vector_store %arg5[%c4_79, %c251], %120 {strides = array<i32>} : memref<12x324xf32, #tpu.memory_space<vmem>>, vector<4x18xf32>,
    %c8_80 = arith.constant 8 : index
    %c250 = arith.constant 250 : index
    %123 = vector.load %arg5[%c8_80, %c250] : memref<12x324xf32, #tpu.memory_space<vmem>>, vector<4x18xf32>
    tpu.vector_store %arg5[%c8_80, %c250], %120 {strides = array<i32>} : memref<12x324xf32, #tpu.memory_space<vmem>>, vector<4x18xf32>,
    %c0_81 = arith.constant 0 : index
    %c0_82 = arith.constant 0 : index
    %c224 = arith.constant 224 : index
    %124 = vector.load %arg1[%c0_81, %c0_82, %c224] : memref<1x4x256xf32, #tpu.memory_space<vmem>>, vector<1x4x16xf32>
    %125 = vector.shape_cast %124 : vector<1x4x16xf32> to vector<4x16xf32>
    %126 = vector.extract_strided_slice %125 {offsets = [0, 1], sizes = [4, 1], strides = [1, 1]} : vector<4x16xf32> to vector<4x1xf32>
    %127 = vector.extract_strided_slice %125 {offsets = [0, 14], sizes = [4, 1], strides = [1, 1]} : vector<4x16xf32> to vector<4x1xf32>
    %128 = tpu.concatenate %126, %125, %127 in 1 : vector<4x1xf32>, vector<4x16xf32>, vector<4x1xf32> -> vector<4x18xf32>
    %c0_83 = arith.constant 0 : index
    %c270 = arith.constant 270 : index
    %129 = vector.load %arg5[%c0_83, %c270] : memref<12x324xf32, #tpu.memory_space<vmem>>, vector<4x18xf32>
    tpu.vector_store %arg5[%c0_83, %c270], %128 {strides = array<i32>} : memref<12x324xf32, #tpu.memory_space<vmem>>, vector<4x18xf32>,
    %c4_84 = arith.constant 4 : index
    %c269 = arith.constant 269 : index
    %130 = vector.load %arg5[%c4_84, %c269] : memref<12x324xf32, #tpu.memory_space<vmem>>, vector<4x18xf32>
    tpu.vector_store %arg5[%c4_84, %c269], %128 {strides = array<i32>} : memref<12x324xf32, #tpu.memory_space<vmem>>, vector<4x18xf32>,
    %c8_85 = arith.constant 8 : index
    %c268 = arith.constant 268 : index
    %131 = vector.load %arg5[%c8_85, %c268] : memref<12x324xf32, #tpu.memory_space<vmem>>, vector<4x18xf32>
    tpu.vector_store %arg5[%c8_85, %c268], %128 {strides = array<i32>} : memref<12x324xf32, #tpu.memory_space<vmem>>, vector<4x18xf32>,
    %c0_86 = arith.constant 0 : index
    %c0_87 = arith.constant 0 : index
    %c240 = arith.constant 240 : index
    %132 = vector.load %arg1[%c0_86, %c0_87, %c240] : memref<1x4x256xf32, #tpu.memory_space<vmem>>, vector<1x4x16xf32>
    %133 = vector.shape_cast %132 : vector<1x4x16xf32> to vector<4x16xf32>
    %134 = vector.extract_strided_slice %133 {offsets = [0, 1], sizes = [4, 1], strides = [1, 1]} : vector<4x16xf32> to vector<4x1xf32>
    %135 = vector.extract_strided_slice %133 {offsets = [0, 14], sizes = [4, 1], strides = [1, 1]} : vector<4x16xf32> to vector<4x1xf32>
    %136 = tpu.concatenate %134, %133, %135 in 1 : vector<4x1xf32>, vector<4x16xf32>, vector<4x1xf32> -> vector<4x18xf32>
    %c0_88 = arith.constant 0 : index
    %c288 = arith.constant 288 : index
    %137 = vector.load %arg5[%c0_88, %c288] : memref<12x324xf32, #tpu.memory_space<vmem>>, vector<4x18xf32>
    tpu.vector_store %arg5[%c0_88, %c288], %136 {strides = array<i32>} : memref<12x324xf32, #tpu.memory_space<vmem>>, vector<4x18xf32>,
    %c4_89 = arith.constant 4 : index
    %c287 = arith.constant 287 : index
    %138 = vector.load %arg5[%c4_89, %c287] : memref<12x324xf32, #tpu.memory_space<vmem>>, vector<4x18xf32>
    tpu.vector_store %arg5[%c4_89, %c287], %136 {strides = array<i32>} : memref<12x324xf32, #tpu.memory_space<vmem>>, vector<4x18xf32>,
    %c8_90 = arith.constant 8 : index
    %c286 = arith.constant 286 : index
    %139 = vector.load %arg5[%c8_90, %c286] : memref<12x324xf32, #tpu.memory_space<vmem>>, vector<4x18xf32>
    tpu.vector_store %arg5[%c8_90, %c286], %136 {strides = array<i32>} : memref<12x324xf32, #tpu.memory_space<vmem>>, vector<4x18xf32>,
    %c0_91 = arith.constant 0 : index
    %c0_92 = arith.constant 0 : index
    %c224_93 = arith.constant 224 : index
    %140 = vector.load %arg1[%c0_91, %c0_92, %c224_93] : memref<1x4x256xf32, #tpu.memory_space<vmem>>, vector<1x4x16xf32>
    %141 = vector.shape_cast %140 : vector<1x4x16xf32> to vector<4x16xf32>
    %142 = vector.extract_strided_slice %141 {offsets = [0, 1], sizes = [4, 1], strides = [1, 1]} : vector<4x16xf32> to vector<4x1xf32>
    %143 = vector.extract_strided_slice %141 {offsets = [0, 14], sizes = [4, 1], strides = [1, 1]} : vector<4x16xf32> to vector<4x1xf32>
    %144 = tpu.concatenate %142, %141, %143 in 1 : vector<4x1xf32>, vector<4x16xf32>, vector<4x1xf32> -> vector<4x18xf32>
    %c0_94 = arith.constant 0 : index
    %c306 = arith.constant 306 : index
    %145 = vector.load %arg5[%c0_94, %c306] : memref<12x324xf32, #tpu.memory_space<vmem>>, vector<4x18xf32>
    tpu.vector_store %arg5[%c0_94, %c306], %144 {strides = array<i32>} : memref<12x324xf32, #tpu.memory_space<vmem>>, vector<4x18xf32>,
    %c4_95 = arith.constant 4 : index
    %c305 = arith.constant 305 : index
    %146 = vector.load %arg5[%c4_95, %c305] : memref<12x324xf32, #tpu.memory_space<vmem>>, vector<4x18xf32>
    tpu.vector_store %arg5[%c4_95, %c305], %144 {strides = array<i32>} : memref<12x324xf32, #tpu.memory_space<vmem>>, vector<4x18xf32>,
    %c8_96 = arith.constant 8 : index
    %c304 = arith.constant 304 : index
    %147 = vector.load %arg5[%c8_96, %c304] : memref<12x324xf32, #tpu.memory_space<vmem>>, vector<4x18xf32>
    tpu.vector_store %arg5[%c8_96, %c304], %144 {strides = array<i32>} : memref<12x324xf32, #tpu.memory_space<vmem>>, vector<4x18xf32>,
    %c0_97 = arith.constant 0 : index
    %c0_98 = arith.constant 0 : index
    %c0_99 = arith.constant 0 : index
    %148 = vector.load %arg2[%c0_97, %c0_98, %c0_99] : memref<3x4x12xf32, #tpu.memory_space<vmem>>, vector<1x4x12xf32>
    %149 = vector.shape_cast %148 : vector<1x4x12xf32> to vector<4x12xf32>
    %c0_100 = arith.constant 0 : index
    %c0_101 = arith.constant 0 : index
    %150 = vector.load %arg5[%c0_100, %c0_101] : memref<12x324xf32, #tpu.memory_space<vmem>>, vector<12x288xf32>
    %cst_102 = arith.constant dense<0.000000e+00> : vector<4x288xf32>
    %151 = tpu.matmul %149, %150, %cst_102 {dimension_numbers = #tpu.dot_dimension_numbers<[1], [0], [0], [1], [0, 0, 1, 1], [], []>} : vector<4x12xf32>, vector<12x288xf32>, vector<4x288xf32> -> vector<4x288xf32>
    %c1 = arith.constant 1 : index
    %c0_103 = arith.constant 0 : index
    %c0_104 = arith.constant 0 : index
    %152 = vector.load %arg2[%c1, %c0_103, %c0_104] : memref<3x4x12xf32, #tpu.memory_space<vmem>>, vector<1x4x12xf32>
    %153 = vector.shape_cast %152 : vector<1x4x12xf32> to vector<4x12xf32>
    %c0_105 = arith.constant 0 : index
    %c18_106 = arith.constant 18 : index
    %154 = vector.load %arg5[%c0_105, %c18_106] : memref<12x324xf32, #tpu.memory_space<vmem>>, vector<12x288xf32>
    %cst_107 = arith.constant dense<0.000000e+00> : vector<4x288xf32>
    %155 = tpu.matmul %153, %154, %cst_107 {dimension_numbers = #tpu.dot_dimension_numbers<[1], [0], [0], [1], [0, 0, 1, 1], [], []>} : vector<4x12xf32>, vector<12x288xf32>, vector<4x288xf32> -> vector<4x288xf32>
    %156 = arith.addf %151, %155 : vector<4x288xf32>
    %c2 = arith.constant 2 : index
    %c0_108 = arith.constant 0 : index
    %c0_109 = arith.constant 0 : index
    %157 = vector.load %arg2[%c2, %c0_108, %c0_109] : memref<3x4x12xf32, #tpu.memory_space<vmem>>, vector<1x4x12xf32>
    %158 = vector.shape_cast %157 : vector<1x4x12xf32> to vector<4x12xf32>
    %c0_110 = arith.constant 0 : index
    %c36_111 = arith.constant 36 : index
    %159 = vector.load %arg5[%c0_110, %c36_111] : memref<12x324xf32, #tpu.memory_space<vmem>>, vector<12x288xf32>
    %cst_112 = arith.constant dense<0.000000e+00> : vector<4x288xf32>
    %160 = tpu.matmul %158, %159, %cst_112 {dimension_numbers = #tpu.dot_dimension_numbers<[1], [0], [0], [1], [0, 0, 1, 1], [], []>} : vector<4x12xf32>, vector<12x288xf32>, vector<4x288xf32> -> vector<4x288xf32>
    %161 = arith.addf %156, %160 : vector<4x288xf32>
    %162 = tpu.iota {dimensions = array<i32: 1>} : vector<1x288xi32>
    %c18_i32 = arith.constant 18 : i32
    %c0_i32 = arith.constant 0 : i32
    %163 = arith.cmpi eq, %c18_i32, %c0_i32 : i32
    %c1_i32 = arith.constant 1 : i32
    %164 = arith.select %163, %c1_i32, %c18_i32 : i32
    %165 = vector.broadcast %164 : i32 to vector<1x288xi32>
    %166 = arith.remsi %162, %165 : vector<1x288xi32>
    %c0_i32_113 = arith.constant 0 : i32
    %167 = vector.broadcast %c0_i32_113 : i32 to vector<1x288xi32>
    %168 = arith.cmpi ne, %166, %167 : vector<1x288xi32>
    %c0_i32_114 = arith.constant 0 : i32
    %169 = vector.broadcast %c0_i32_114 : i32 to vector<1x288xi32>
    %170 = arith.cmpi slt, %166, %169 : vector<1x288xi32>
    %c0_i32_115 = arith.constant 0 : i32
    %171 = arith.cmpi slt, %164, %c0_i32_115 : i32
    %172 = vector.broadcast %171 : i1 to vector<1x288xi1>
    %173 = vector.broadcast %172 : vector<1x288xi1> to vector<1x288xi1>
    %174 = arith.xori %170, %173 : vector<1x288xi1>
    %175 = arith.andi %174, %168 : vector<1x288xi1>
    %176 = vector.broadcast %164 : i32 to vector<1x288xi32>
    %177 = arith.addi %166, %176 : vector<1x288xi32>
    %178 = arith.select %175, %177, %166 : vector<1x288xi1>, vector<1x288xi32>
    %c16_i32 = arith.constant 16 : i32
    %179 = vector.broadcast %c16_i32 : i32 to vector<1x288xi32>
    %180 = arith.cmpi slt, %178, %179 : vector<1x288xi32>
    %cst_116 = arith.constant 0.000000e+00 : f32
    %181 = vector.shape_cast %180 : vector<1x288xi1> to vector<1x288xi1>
    %182 = vector.broadcast %181 : vector<1x288xi1> to vector<4x288xi1>
    %183 = vector.broadcast %cst_116 : f32 to vector<4x288xf32>
    %184 = arith.select %182, %161, %183 : vector<4x288xi1>, vector<4x288xf32>
    %cst_117 = arith.constant dense<0.000000e+00> : vector<4xf32>
    %185 = vector.multi_reduction <add>, %184, %cst_117 [1] : vector<4x288xf32> to vector<4xf32>
    %186 = vector.shape_cast %185 : vector<4xf32> to vector<4x1xf32>
    %cst_118 = arith.constant 3.906250e-03 : f32
    %187 = vector.broadcast %cst_118 : f32 to vector<4x1xf32>
    %188 = arith.mulf %186, %187 : vector<4x1xf32>
    %189 = vector.broadcast %188 : vector<4x1xf32> to vector<4x288xf32>
    %190 = arith.subf %161, %189 : vector<4x288xf32>
    %191 = arith.mulf %190, %190 : vector<4x288xf32>
    %cst_119 = arith.constant 0.000000e+00 : f32
    %192 = vector.shape_cast %180 : vector<1x288xi1> to vector<1x288xi1>
    %193 = vector.broadcast %192 : vector<1x288xi1> to vector<4x288xi1>
    %194 = vector.broadcast %cst_119 : f32 to vector<4x288xf32>
    %195 = arith.select %193, %191, %194 : vector<4x288xi1>, vector<4x288xf32>
    %cst_120 = arith.constant dense<0.000000e+00> : vector<4xf32>
    %196 = vector.multi_reduction <add>, %195, %cst_120 [1] : vector<4x288xf32> to vector<4xf32>
    %197 = vector.shape_cast %196 : vector<4xf32> to vector<4x1xf32>
    %cst_121 = arith.constant 3.906250e-03 : f32
    %198 = vector.broadcast %cst_121 : f32 to vector<4x1xf32>
    %199 = arith.mulf %197, %198 : vector<4x1xf32>
    %cst_122 = arith.constant 9.99999974E-6 : f32
    %200 = vector.broadcast %cst_122 : f32 to vector<4x1xf32>
    %201 = arith.addf %199, %200 : vector<4x1xf32>
    %202 = math.rsqrt %201 : vector<4x1xf32>
    %203 = vector.broadcast %202 : vector<4x1xf32> to vector<4x288xf32>
    %204 = arith.mulf %190, %203 : vector<4x288xf32>
    %cst_123 = arith.constant 0.000000e+00 : f32
    %205 = vector.broadcast %cst_123 : f32 to vector<4x288xf32>
    %206 = arith.maximumf %204, %205 : vector<4x288xf32>
    %c0_124 = arith.constant 0 : index
    %c0_125 = arith.constant 0 : index
    %207 = vector.load %arg5[%c0_124, %c0_125] : memref<12x324xf32, #tpu.memory_space<vmem>>, vector<4x288xf32>
    tpu.vector_store %arg5[%c0_124, %c0_125], %206 {strides = array<i32>} : memref<12x324xf32, #tpu.memory_space<vmem>>, vector<4x288xf32>,
    %cst_126 = arith.constant 0.000000e+00 : f32
    %208 = vector.broadcast %cst_126 : f32 to vector<12x2xf32>
    %c0_127 = arith.constant 0 : index
    %c322_128 = arith.constant 322 : index
    %209 = vector.load %arg6[%c0_127, %c322_128] : memref<12x324xf32, #tpu.memory_space<vmem>>, vector<12x2xf32>
    tpu.vector_store %arg6[%c0_127, %c322_128], %208 {strides = array<i32>} : memref<12x324xf32, #tpu.memory_space<vmem>>, vector<12x2xf32>,
    %c0_129 = arith.constant 0 : index
    %c18_130 = arith.constant 18 : index
    %210 = vector.load %arg5[%c0_129, %c18_130] : memref<12x324xf32, #tpu.memory_space<vmem>>, vector<4x16xf32>
    %211 = vector.extract_strided_slice %210 {offsets = [0, 1], sizes = [4, 1], strides = [1, 1]} : vector<4x16xf32> to vector<4x1xf32>
    %212 = vector.extract_strided_slice %210 {offsets = [0, 14], sizes = [4, 1], strides = [1, 1]} : vector<4x16xf32> to vector<4x1xf32>
    %213 = tpu.concatenate %211, %210, %212 in 1 : vector<4x1xf32>, vector<4x16xf32>, vector<4x1xf32> -> vector<4x18xf32>
    %c0_131 = arith.constant 0 : index
    %c0_132 = arith.constant 0 : index
    %214 = vector.load %arg6[%c0_131, %c0_132] : memref<12x324xf32, #tpu.memory_space<vmem>>, vector<4x18xf32>
    tpu.vector_store %arg6[%c0_131, %c0_132], %213 {strides = array<i32>} : memref<12x324xf32, #tpu.memory_space<vmem>>, vector<4x18xf32>,
    %215 = vector.extract_strided_slice %213 {offsets = [0, 1], sizes = [4, 17], strides = [1, 1]} : vector<4x18xf32> to vector<4x17xf32>
    %c4_133 = arith.constant 4 : index
    %c0_134 = arith.constant 0 : index
    %216 = vector.load %arg6[%c4_133, %c0_134] : memref<12x324xf32, #tpu.memory_space<vmem>>, vector<4x17xf32>
    tpu.vector_store %arg6[%c4_133, %c0_134], %215 {strides = array<i32>} : memref<12x324xf32, #tpu.memory_space<vmem>>, vector<4x17xf32>,
    %217 = vector.extract_strided_slice %213 {offsets = [0, 2], sizes = [4, 16], strides = [1, 1]} : vector<4x18xf32> to vector<4x16xf32>
    %c8_135 = arith.constant 8 : index
    %c0_136 = arith.constant 0 : index
    %218 = vector.load %arg6[%c8_135, %c0_136] : memref<12x324xf32, #tpu.memory_space<vmem>>, vector<4x16xf32>
    tpu.vector_store %arg6[%c8_135, %c0_136], %217 {strides = array<i32>} : memref<12x324xf32, #tpu.memory_space<vmem>>, vector<4x16xf32>,
    %c0_137 = arith.constant 0 : index
    %c0_138 = arith.constant 0 : index
    %219 = vector.load %arg5[%c0_137, %c0_138] : memref<12x324xf32, #tpu.memory_space<vmem>>, vector<4x16xf32>
    %220 = vector.extract_strided_slice %219 {offsets = [0, 1], sizes = [4, 1], strides = [1, 1]} : vector<4x16xf32> to vector<4x1xf32>
    %221 = vector.extract_strided_slice %219 {offsets = [0, 14], sizes = [4, 1], strides = [1, 1]} : vector<4x16xf32> to vector<4x1xf32>
    %222 = tpu.concatenate %220, %219, %221 in 1 : vector<4x1xf32>, vector<4x16xf32>, vector<4x1xf32> -> vector<4x18xf32>
    %c0_139 = arith.constant 0 : index
    %c18_140 = arith.constant 18 : index
    %223 = vector.load %arg6[%c0_139, %c18_140] : memref<12x324xf32, #tpu.memory_space<vmem>>, vector<4x18xf32>
    tpu.vector_store %arg6[%c0_139, %c18_140], %222 {strides = array<i32>} : memref<12x324xf32, #tpu.memory_space<vmem>>, vector<4x18xf32>,
    %c4_141 = arith.constant 4 : index
    %c17_142 = arith.constant 17 : index
    %224 = vector.load %arg6[%c4_141, %c17_142] : memref<12x324xf32, #tpu.memory_space<vmem>>, vector<4x18xf32>
    tpu.vector_store %arg6[%c4_141, %c17_142], %222 {strides = array<i32>} : memref<12x324xf32, #tpu.memory_space<vmem>>, vector<4x18xf32>,
    %c8_143 = arith.constant 8 : index
    %c16_144 = arith.constant 16 : index
    %225 = vector.load %arg6[%c8_143, %c16_144] : memref<12x324xf32, #tpu.memory_space<vmem>>, vector<4x18xf32>
    tpu.vector_store %arg6[%c8_143, %c16_144], %222 {strides = array<i32>} : memref<12x324xf32, #tpu.memory_space<vmem>>, vector<4x18xf32>,
    %c0_145 = arith.constant 0 : index
    %c18_146 = arith.constant 18 : index
    %226 = vector.load %arg5[%c0_145, %c18_146] : memref<12x324xf32, #tpu.memory_space<vmem>>, vector<4x16xf32>
    %227 = vector.extract_strided_slice %226 {offsets = [0, 1], sizes = [4, 1], strides = [1, 1]} : vector<4x16xf32> to vector<4x1xf32>
    %228 = vector.extract_strided_slice %226 {offsets = [0, 14], sizes = [4, 1], strides = [1, 1]} : vector<4x16xf32> to vector<4x1xf32>
    %229 = tpu.concatenate %227, %226, %228 in 1 : vector<4x1xf32>, vector<4x16xf32>, vector<4x1xf32> -> vector<4x18xf32>
    %c0_147 = arith.constant 0 : index
    %c36_148 = arith.constant 36 : index
    %230 = vector.load %arg6[%c0_147, %c36_148] : memref<12x324xf32, #tpu.memory_space<vmem>>, vector<4x18xf32>
    tpu.vector_store %arg6[%c0_147, %c36_148], %229 {strides = array<i32>} : memref<12x324xf32, #tpu.memory_space<vmem>>, vector<4x18xf32>,
    %c4_149 = arith.constant 4 : index
    %c35_150 = arith.constant 35 : index
    %231 = vector.load %arg6[%c4_149, %c35_150] : memref<12x324xf32, #tpu.memory_space<vmem>>, vector<4x18xf32>
    tpu.vector_store %arg6[%c4_149, %c35_150], %229 {strides = array<i32>} : memref<12x324xf32, #tpu.memory_space<vmem>>, vector<4x18xf32>,
    %c8_151 = arith.constant 8 : index
    %c34_152 = arith.constant 34 : index
    %232 = vector.load %arg6[%c8_151, %c34_152] : memref<12x324xf32, #tpu.memory_space<vmem>>, vector<4x18xf32>
    tpu.vector_store %arg6[%c8_151, %c34_152], %229 {strides = array<i32>} : memref<12x324xf32, #tpu.memory_space<vmem>>, vector<4x18xf32>,
    %c0_153 = arith.constant 0 : index
    %c36_154 = arith.constant 36 : index
    %233 = vector.load %arg5[%c0_153, %c36_154] : memref<12x324xf32, #tpu.memory_space<vmem>>, vector<4x16xf32>
    %234 = vector.extract_strided_slice %233 {offsets = [0, 1], sizes = [4, 1], strides = [1, 1]} : vector<4x16xf32> to vector<4x1xf32>
    %235 = vector.extract_strided_slice %233 {offsets = [0, 14], sizes = [4, 1], strides = [1, 1]} : vector<4x16xf32> to vector<4x1xf32>
    %236 = tpu.concatenate %234, %233, %235 in 1 : vector<4x1xf32>, vector<4x16xf32>, vector<4x1xf32> -> vector<4x18xf32>
    %c0_155 = arith.constant 0 : index
    %c54_156 = arith.constant 54 : index
    %237 = vector.load %arg6[%c0_155, %c54_156] : memref<12x324xf32, #tpu.memory_space<vmem>>, vector<4x18xf32>
    tpu.vector_store %arg6[%c0_155, %c54_156], %236 {strides = array<i32>} : memref<12x324xf32, #tpu.memory_space<vmem>>, vector<4x18xf32>,
    %c4_157 = arith.constant 4 : index
    %c53_158 = arith.constant 53 : index
    %238 = vector.load %arg6[%c4_157, %c53_158] : memref<12x324xf32, #tpu.memory_space<vmem>>, vector<4x18xf32>
    tpu.vector_store %arg6[%c4_157, %c53_158], %236 {strides = array<i32>} : memref<12x324xf32, #tpu.memory_space<vmem>>, vector<4x18xf32>,
    %c8_159 = arith.constant 8 : index
    %c52_160 = arith.constant 52 : index
    %239 = vector.load %arg6[%c8_159, %c52_160] : memref<12x324xf32, #tpu.memory_space<vmem>>, vector<4x18xf32>
    tpu.vector_store %arg6[%c8_159, %c52_160], %236 {strides = array<i32>} : memref<12x324xf32, #tpu.memory_space<vmem>>, vector<4x18xf32>,
    %c0_161 = arith.constant 0 : index
    %c54_162 = arith.constant 54 : index
    %240 = vector.load %arg5[%c0_161, %c54_162] : memref<12x324xf32, #tpu.memory_space<vmem>>, vector<4x16xf32>
    %241 = vector.extract_strided_slice %240 {offsets = [0, 1], sizes = [4, 1], strides = [1, 1]} : vector<4x16xf32> to vector<4x1xf32>
    %242 = vector.extract_strided_slice %240 {offsets = [0, 14], sizes = [4, 1], strides = [1, 1]} : vector<4x16xf32> to vector<4x1xf32>
    %243 = tpu.concatenate %241, %240, %242 in 1 : vector<4x1xf32>, vector<4x16xf32>, vector<4x1xf32> -> vector<4x18xf32>
    %c0_163 = arith.constant 0 : index
    %c72_164 = arith.constant 72 : index
    %244 = vector.load %arg6[%c0_163, %c72_164] : memref<12x324xf32, #tpu.memory_space<vmem>>, vector<4x18xf32>
    tpu.vector_store %arg6[%c0_163, %c72_164], %243 {strides = array<i32>} : memref<12x324xf32, #tpu.memory_space<vmem>>, vector<4x18xf32>,
    %c4_165 = arith.constant 4 : index
    %c71_166 = arith.constant 71 : index
    %245 = vector.load %arg6[%c4_165, %c71_166] : memref<12x324xf32, #tpu.memory_space<vmem>>, vector<4x18xf32>
    tpu.vector_store %arg6[%c4_165, %c71_166], %243 {strides = array<i32>} : memref<12x324xf32, #tpu.memory_space<vmem>>, vector<4x18xf32>,
    %c8_167 = arith.constant 8 : index
    %c70_168 = arith.constant 70 : index
    %246 = vector.load %arg6[%c8_167, %c70_168] : memref<12x324xf32, #tpu.memory_space<vmem>>, vector<4x18xf32>
    tpu.vector_store %arg6[%c8_167, %c70_168], %243 {strides = array<i32>} : memref<12x324xf32, #tpu.memory_space<vmem>>, vector<4x18xf32>,
    %c0_169 = arith.constant 0 : index
    %c72_170 = arith.constant 72 : index
    %247 = vector.load %arg5[%c0_169, %c72_170] : memref<12x324xf32, #tpu.memory_space<vmem>>, vector<4x16xf32>
    %248 = vector.extract_strided_slice %247 {offsets = [0, 1], sizes = [4, 1], strides = [1, 1]} : vector<4x16xf32> to vector<4x1xf32>
    %249 = vector.extract_strided_slice %247 {offsets = [0, 14], sizes = [4, 1], strides = [1, 1]} : vector<4x16xf32> to vector<4x1xf32>
    %250 = tpu.concatenate %248, %247, %249 in 1 : vector<4x1xf32>, vector<4x16xf32>, vector<4x1xf32> -> vector<4x18xf32>
    %c0_171 = arith.constant 0 : index
    %c90_172 = arith.constant 90 : index
    %251 = vector.load %arg6[%c0_171, %c90_172] : memref<12x324xf32, #tpu.memory_space<vmem>>, vector<4x18xf32>
    tpu.vector_store %arg6[%c0_171, %c90_172], %250 {strides = array<i32>} : memref<12x324xf32, #tpu.memory_space<vmem>>, vector<4x18xf32>,
    %c4_173 = arith.constant 4 : index
    %c89_174 = arith.constant 89 : index
    %252 = vector.load %arg6[%c4_173, %c89_174] : memref<12x324xf32, #tpu.memory_space<vmem>>, vector<4x18xf32>
    tpu.vector_store %arg6[%c4_173, %c89_174], %250 {strides = array<i32>} : memref<12x324xf32, #tpu.memory_space<vmem>>, vector<4x18xf32>,
    %c8_175 = arith.constant 8 : index
    %c88_176 = arith.constant 88 : index
    %253 = vector.load %arg6[%c8_175, %c88_176] : memref<12x324xf32, #tpu.memory_space<vmem>>, vector<4x18xf32>
    tpu.vector_store %arg6[%c8_175, %c88_176], %250 {strides = array<i32>} : memref<12x324xf32, #tpu.memory_space<vmem>>, vector<4x18xf32>,
    %c0_177 = arith.constant 0 : index
    %c90_178 = arith.constant 90 : index
    %254 = vector.load %arg5[%c0_177, %c90_178] : memref<12x324xf32, #tpu.memory_space<vmem>>, vector<4x16xf32>
    %255 = vector.extract_strided_slice %254 {offsets = [0, 1], sizes = [4, 1], strides = [1, 1]} : vector<4x16xf32> to vector<4x1xf32>
    %256 = vector.extract_strided_slice %254 {offsets = [0, 14], sizes = [4, 1], strides = [1, 1]} : vector<4x16xf32> to vector<4x1xf32>
    %257 = tpu.concatenate %255, %254, %256 in 1 : vector<4x1xf32>, vector<4x16xf32>, vector<4x1xf32> -> vector<4x18xf32>
    %c0_179 = arith.constant 0 : index
    %c108_180 = arith.constant 108 : index
    %258 = vector.load %arg6[%c0_179, %c108_180] : memref<12x324xf32, #tpu.memory_space<vmem>>, vector<4x18xf32>
    tpu.vector_store %arg6[%c0_179, %c108_180], %257 {strides = array<i32>} : memref<12x324xf32, #tpu.memory_space<vmem>>, vector<4x18xf32>,
    %c4_181 = arith.constant 4 : index
    %c107_182 = arith.constant 107 : index
    %259 = vector.load %arg6[%c4_181, %c107_182] : memref<12x324xf32, #tpu.memory_space<vmem>>, vector<4x18xf32>
    tpu.vector_store %arg6[%c4_181, %c107_182], %257 {strides = array<i32>} : memref<12x324xf32, #tpu.memory_space<vmem>>, vector<4x18xf32>,
    %c8_183 = arith.constant 8 : index
    %c106_184 = arith.constant 106 : index
    %260 = vector.load %arg6[%c8_183, %c106_184] : memref<12x324xf32, #tpu.memory_space<vmem>>, vector<4x18xf32>
    tpu.vector_store %arg6[%c8_183, %c106_184], %257 {strides = array<i32>} : memref<12x324xf32, #tpu.memory_space<vmem>>, vector<4x18xf32>,
    %c0_185 = arith.constant 0 : index
    %c108_186 = arith.constant 108 : index
    %261 = vector.load %arg5[%c0_185, %c108_186] : memref<12x324xf32, #tpu.memory_space<vmem>>, vector<4x16xf32>
    %262 = vector.extract_strided_slice %261 {offsets = [0, 1], sizes = [4, 1], strides = [1, 1]} : vector<4x16xf32> to vector<4x1xf32>
    %263 = vector.extract_strided_slice %261 {offsets = [0, 14], sizes = [4, 1], strides = [1, 1]} : vector<4x16xf32> to vector<4x1xf32>
    %264 = tpu.concatenate %262, %261, %263 in 1 : vector<4x1xf32>, vector<4x16xf32>, vector<4x1xf32> -> vector<4x18xf32>
    %c0_187 = arith.constant 0 : index
    %c126_188 = arith.constant 126 : index
    %265 = vector.load %arg6[%c0_187, %c126_188] : memref<12x324xf32, #tpu.memory_space<vmem>>, vector<4x18xf32>
    tpu.vector_store %arg6[%c0_187, %c126_188], %264 {strides = array<i32>} : memref<12x324xf32, #tpu.memory_space<vmem>>, vector<4x18xf32>,
    %c4_189 = arith.constant 4 : index
    %c125_190 = arith.constant 125 : index
    %266 = vector.load %arg6[%c4_189, %c125_190] : memref<12x324xf32, #tpu.memory_space<vmem>>, vector<4x18xf32>
    tpu.vector_store %arg6[%c4_189, %c125_190], %264 {strides = array<i32>} : memref<12x324xf32, #tpu.memory_space<vmem>>, vector<4x18xf32>,
    %c8_191 = arith.constant 8 : index
    %c124_192 = arith.constant 124 : index
    %267 = vector.load %arg6[%c8_191, %c124_192] : memref<12x324xf32, #tpu.memory_space<vmem>>, vector<4x18xf32>
    tpu.vector_store %arg6[%c8_191, %c124_192], %264 {strides = array<i32>} : memref<12x324xf32, #tpu.memory_space<vmem>>, vector<4x18xf32>,
    %c0_193 = arith.constant 0 : index
    %c126_194 = arith.constant 126 : index
    %268 = vector.load %arg5[%c0_193, %c126_194] : memref<12x324xf32, #tpu.memory_space<vmem>>, vector<4x16xf32>
    %269 = vector.extract_strided_slice %268 {offsets = [0, 1], sizes = [4, 1], strides = [1, 1]} : vector<4x16xf32> to vector<4x1xf32>
    %270 = vector.extract_strided_slice %268 {offsets = [0, 14], sizes = [4, 1], strides = [1, 1]} : vector<4x16xf32> to vector<4x1xf32>
    %271 = tpu.concatenate %269, %268, %270 in 1 : vector<4x1xf32>, vector<4x16xf32>, vector<4x1xf32> -> vector<4x18xf32>
    %c0_195 = arith.constant 0 : index
    %c144_196 = arith.constant 144 : index
    %272 = vector.load %arg6[%c0_195, %c144_196] : memref<12x324xf32, #tpu.memory_space<vmem>>, vector<4x18xf32>
    tpu.vector_store %arg6[%c0_195, %c144_196], %271 {strides = array<i32>} : memref<12x324xf32, #tpu.memory_space<vmem>>, vector<4x18xf32>,
    %c4_197 = arith.constant 4 : index
    %c143_198 = arith.constant 143 : index
    %273 = vector.load %arg6[%c4_197, %c143_198] : memref<12x324xf32, #tpu.memory_space<vmem>>, vector<4x18xf32>
    tpu.vector_store %arg6[%c4_197, %c143_198], %271 {strides = array<i32>} : memref<12x324xf32, #tpu.memory_space<vmem>>, vector<4x18xf32>,
    %c8_199 = arith.constant 8 : index
    %c142_200 = arith.constant 142 : index
    %274 = vector.load %arg6[%c8_199, %c142_200] : memref<12x324xf32, #tpu.memory_space<vmem>>, vector<4x18xf32>
    tpu.vector_store %arg6[%c8_199, %c142_200], %271 {strides = array<i32>} : memref<12x324xf32, #tpu.memory_space<vmem>>, vector<4x18xf32>,
    %c0_201 = arith.constant 0 : index
    %c144_202 = arith.constant 144 : index
    %275 = vector.load %arg5[%c0_201, %c144_202] : memref<12x324xf32, #tpu.memory_space<vmem>>, vector<4x16xf32>
    %276 = vector.extract_strided_slice %275 {offsets = [0, 1], sizes = [4, 1], strides = [1, 1]} : vector<4x16xf32> to vector<4x1xf32>
    %277 = vector.extract_strided_slice %275 {offsets = [0, 14], sizes = [4, 1], strides = [1, 1]} : vector<4x16xf32> to vector<4x1xf32>
    %278 = tpu.concatenate %276, %275, %277 in 1 : vector<4x1xf32>, vector<4x16xf32>, vector<4x1xf32> -> vector<4x18xf32>
    %c0_203 = arith.constant 0 : index
    %c162_204 = arith.constant 162 : index
    %279 = vector.load %arg6[%c0_203, %c162_204] : memref<12x324xf32, #tpu.memory_space<vmem>>, vector<4x18xf32>
    tpu.vector_store %arg6[%c0_203, %c162_204], %278 {strides = array<i32>} : memref<12x324xf32, #tpu.memory_space<vmem>>, vector<4x18xf32>,
    %c4_205 = arith.constant 4 : index
    %c161_206 = arith.constant 161 : index
    %280 = vector.load %arg6[%c4_205, %c161_206] : memref<12x324xf32, #tpu.memory_space<vmem>>, vector<4x18xf32>
    tpu.vector_store %arg6[%c4_205, %c161_206], %278 {strides = array<i32>} : memref<12x324xf32, #tpu.memory_space<vmem>>, vector<4x18xf32>,
    %c8_207 = arith.constant 8 : index
    %c160_208 = arith.constant 160 : index
    %281 = vector.load %arg6[%c8_207, %c160_208] : memref<12x324xf32, #tpu.memory_space<vmem>>, vector<4x18xf32>
    tpu.vector_store %arg6[%c8_207, %c160_208], %278 {strides = array<i32>} : memref<12x324xf32, #tpu.memory_space<vmem>>, vector<4x18xf32>,
    %c0_209 = arith.constant 0 : index
    %c162_210 = arith.constant 162 : index
    %282 = vector.load %arg5[%c0_209, %c162_210] : memref<12x324xf32, #tpu.memory_space<vmem>>, vector<4x16xf32>
    %283 = vector.extract_strided_slice %282 {offsets = [0, 1], sizes = [4, 1], strides = [1, 1]} : vector<4x16xf32> to vector<4x1xf32>
    %284 = vector.extract_strided_slice %282 {offsets = [0, 14], sizes = [4, 1], strides = [1, 1]} : vector<4x16xf32> to vector<4x1xf32>
    %285 = tpu.concatenate %283, %282, %284 in 1 : vector<4x1xf32>, vector<4x16xf32>, vector<4x1xf32> -> vector<4x18xf32>
    %c0_211 = arith.constant 0 : index
    %c180_212 = arith.constant 180 : index
    %286 = vector.load %arg6[%c0_211, %c180_212] : memref<12x324xf32, #tpu.memory_space<vmem>>, vector<4x18xf32>
    tpu.vector_store %arg6[%c0_211, %c180_212], %285 {strides = array<i32>} : memref<12x324xf32, #tpu.memory_space<vmem>>, vector<4x18xf32>,
    %c4_213 = arith.constant 4 : index
    %c179_214 = arith.constant 179 : index
    %287 = vector.load %arg6[%c4_213, %c179_214] : memref<12x324xf32, #tpu.memory_space<vmem>>, vector<4x18xf32>
    tpu.vector_store %arg6[%c4_213, %c179_214], %285 {strides = array<i32>} : memref<12x324xf32, #tpu.memory_space<vmem>>, vector<4x18xf32>,
    %c8_215 = arith.constant 8 : index
    %c178_216 = arith.constant 178 : index
    %288 = vector.load %arg6[%c8_215, %c178_216] : memref<12x324xf32, #tpu.memory_space<vmem>>, vector<4x18xf32>
    tpu.vector_store %arg6[%c8_215, %c178_216], %285 {strides = array<i32>} : memref<12x324xf32, #tpu.memory_space<vmem>>, vector<4x18xf32>,
    %c0_217 = arith.constant 0 : index
    %c180_218 = arith.constant 180 : index
    %289 = vector.load %arg5[%c0_217, %c180_218] : memref<12x324xf32, #tpu.memory_space<vmem>>, vector<4x16xf32>
    %290 = vector.extract_strided_slice %289 {offsets = [0, 1], sizes = [4, 1], strides = [1, 1]} : vector<4x16xf32> to vector<4x1xf32>
    %291 = vector.extract_strided_slice %289 {offsets = [0, 14], sizes = [4, 1], strides = [1, 1]} : vector<4x16xf32> to vector<4x1xf32>
    %292 = tpu.concatenate %290, %289, %291 in 1 : vector<4x1xf32>, vector<4x16xf32>, vector<4x1xf32> -> vector<4x18xf32>
    %c0_219 = arith.constant 0 : index
    %c198_220 = arith.constant 198 : index
    %293 = vector.load %arg6[%c0_219, %c198_220] : memref<12x324xf32, #tpu.memory_space<vmem>>, vector<4x18xf32>
    tpu.vector_store %arg6[%c0_219, %c198_220], %292 {strides = array<i32>} : memref<12x324xf32, #tpu.memory_space<vmem>>, vector<4x18xf32>,
    %c4_221 = arith.constant 4 : index
    %c197_222 = arith.constant 197 : index
    %294 = vector.load %arg6[%c4_221, %c197_222] : memref<12x324xf32, #tpu.memory_space<vmem>>, vector<4x18xf32>
    tpu.vector_store %arg6[%c4_221, %c197_222], %292 {strides = array<i32>} : memref<12x324xf32, #tpu.memory_space<vmem>>, vector<4x18xf32>,
    %c8_223 = arith.constant 8 : index
    %c196_224 = arith.constant 196 : index
    %295 = vector.load %arg6[%c8_223, %c196_224] : memref<12x324xf32, #tpu.memory_space<vmem>>, vector<4x18xf32>
    tpu.vector_store %arg6[%c8_223, %c196_224], %292 {strides = array<i32>} : memref<12x324xf32, #tpu.memory_space<vmem>>, vector<4x18xf32>,
    %c0_225 = arith.constant 0 : index
    %c198_226 = arith.constant 198 : index
    %296 = vector.load %arg5[%c0_225, %c198_226] : memref<12x324xf32, #tpu.memory_space<vmem>>, vector<4x16xf32>
    %297 = vector.extract_strided_slice %296 {offsets = [0, 1], sizes = [4, 1], strides = [1, 1]} : vector<4x16xf32> to vector<4x1xf32>
    %298 = vector.extract_strided_slice %296 {offsets = [0, 14], sizes = [4, 1], strides = [1, 1]} : vector<4x16xf32> to vector<4x1xf32>
    %299 = tpu.concatenate %297, %296, %298 in 1 : vector<4x1xf32>, vector<4x16xf32>, vector<4x1xf32> -> vector<4x18xf32>
    %c0_227 = arith.constant 0 : index
    %c216_228 = arith.constant 216 : index
    %300 = vector.load %arg6[%c0_227, %c216_228] : memref<12x324xf32, #tpu.memory_space<vmem>>, vector<4x18xf32>
    tpu.vector_store %arg6[%c0_227, %c216_228], %299 {strides = array<i32>} : memref<12x324xf32, #tpu.memory_space<vmem>>, vector<4x18xf32>,
    %c4_229 = arith.constant 4 : index
    %c215_230 = arith.constant 215 : index
    %301 = vector.load %arg6[%c4_229, %c215_230] : memref<12x324xf32, #tpu.memory_space<vmem>>, vector<4x18xf32>
    tpu.vector_store %arg6[%c4_229, %c215_230], %299 {strides = array<i32>} : memref<12x324xf32, #tpu.memory_space<vmem>>, vector<4x18xf32>,
    %c8_231 = arith.constant 8 : index
    %c214_232 = arith.constant 214 : index
    %302 = vector.load %arg6[%c8_231, %c214_232] : memref<12x324xf32, #tpu.memory_space<vmem>>, vector<4x18xf32>
    tpu.vector_store %arg6[%c8_231, %c214_232], %299 {strides = array<i32>} : memref<12x324xf32, #tpu.memory_space<vmem>>, vector<4x18xf32>,
    %c0_233 = arith.constant 0 : index
    %c216_234 = arith.constant 216 : index
    %303 = vector.load %arg5[%c0_233, %c216_234] : memref<12x324xf32, #tpu.memory_space<vmem>>, vector<4x16xf32>
    %304 = vector.extract_strided_slice %303 {offsets = [0, 1], sizes = [4, 1], strides = [1, 1]} : vector<4x16xf32> to vector<4x1xf32>
    %305 = vector.extract_strided_slice %303 {offsets = [0, 14], sizes = [4, 1], strides = [1, 1]} : vector<4x16xf32> to vector<4x1xf32>
    %306 = tpu.concatenate %304, %303, %305 in 1 : vector<4x1xf32>, vector<4x16xf32>, vector<4x1xf32> -> vector<4x18xf32>
    %c0_235 = arith.constant 0 : index
    %c234_236 = arith.constant 234 : index
    %307 = vector.load %arg6[%c0_235, %c234_236] : memref<12x324xf32, #tpu.memory_space<vmem>>, vector<4x18xf32>
    tpu.vector_store %arg6[%c0_235, %c234_236], %306 {strides = array<i32>} : memref<12x324xf32, #tpu.memory_space<vmem>>, vector<4x18xf32>,
    %c4_237 = arith.constant 4 : index
    %c233_238 = arith.constant 233 : index
    %308 = vector.load %arg6[%c4_237, %c233_238] : memref<12x324xf32, #tpu.memory_space<vmem>>, vector<4x18xf32>
    tpu.vector_store %arg6[%c4_237, %c233_238], %306 {strides = array<i32>} : memref<12x324xf32, #tpu.memory_space<vmem>>, vector<4x18xf32>,
    %c8_239 = arith.constant 8 : index
    %c232_240 = arith.constant 232 : index
    %309 = vector.load %arg6[%c8_239, %c232_240] : memref<12x324xf32, #tpu.memory_space<vmem>>, vector<4x18xf32>
    tpu.vector_store %arg6[%c8_239, %c232_240], %306 {strides = array<i32>} : memref<12x324xf32, #tpu.memory_space<vmem>>, vector<4x18xf32>,
    %c0_241 = arith.constant 0 : index
    %c234_242 = arith.constant 234 : index
    %310 = vector.load %arg5[%c0_241, %c234_242] : memref<12x324xf32, #tpu.memory_space<vmem>>, vector<4x16xf32>
    %311 = vector.extract_strided_slice %310 {offsets = [0, 1], sizes = [4, 1], strides = [1, 1]} : vector<4x16xf32> to vector<4x1xf32>
    %312 = vector.extract_strided_slice %310 {offsets = [0, 14], sizes = [4, 1], strides = [1, 1]} : vector<4x16xf32> to vector<4x1xf32>
    %313 = tpu.concatenate %311, %310, %312 in 1 : vector<4x1xf32>, vector<4x16xf32>, vector<4x1xf32> -> vector<4x18xf32>
    %c0_243 = arith.constant 0 : index
    %c252_244 = arith.constant 252 : index
    %314 = vector.load %arg6[%c0_243, %c252_244] : memref<12x324xf32, #tpu.memory_space<vmem>>, vector<4x18xf32>
    tpu.vector_store %arg6[%c0_243, %c252_244], %313 {strides = array<i32>} : memref<12x324xf32, #tpu.memory_space<vmem>>, vector<4x18xf32>,
    %c4_245 = arith.constant 4 : index
    %c251_246 = arith.constant 251 : index
    %315 = vector.load %arg6[%c4_245, %c251_246] : memref<12x324xf32, #tpu.memory_space<vmem>>, vector<4x18xf32>
    tpu.vector_store %arg6[%c4_245, %c251_246], %313 {strides = array<i32>} : memref<12x324xf32, #tpu.memory_space<vmem>>, vector<4x18xf32>,
    %c8_247 = arith.constant 8 : index
    %c250_248 = arith.constant 250 : index
    %316 = vector.load %arg6[%c8_247, %c250_248] : memref<12x324xf32, #tpu.memory_space<vmem>>, vector<4x18xf32>
    tpu.vector_store %arg6[%c8_247, %c250_248], %313 {strides = array<i32>} : memref<12x324xf32, #tpu.memory_space<vmem>>, vector<4x18xf32>,
    %c0_249 = arith.constant 0 : index
    %c252_250 = arith.constant 252 : index
    %317 = vector.load %arg5[%c0_249, %c252_250] : memref<12x324xf32, #tpu.memory_space<vmem>>, vector<4x16xf32>
    %318 = vector.extract_strided_slice %317 {offsets = [0, 1], sizes = [4, 1], strides = [1, 1]} : vector<4x16xf32> to vector<4x1xf32>
    %319 = vector.extract_strided_slice %317 {offsets = [0, 14], sizes = [4, 1], strides = [1, 1]} : vector<4x16xf32> to vector<4x1xf32>
    %320 = tpu.concatenate %318, %317, %319 in 1 : vector<4x1xf32>, vector<4x16xf32>, vector<4x1xf32> -> vector<4x18xf32>
    %c0_251 = arith.constant 0 : index
    %c270_252 = arith.constant 270 : index
    %321 = vector.load %arg6[%c0_251, %c270_252] : memref<12x324xf32, #tpu.memory_space<vmem>>, vector<4x18xf32>
    tpu.vector_store %arg6[%c0_251, %c270_252], %320 {strides = array<i32>} : memref<12x324xf32, #tpu.memory_space<vmem>>, vector<4x18xf32>,
    %c4_253 = arith.constant 4 : index
    %c269_254 = arith.constant 269 : index
    %322 = vector.load %arg6[%c4_253, %c269_254] : memref<12x324xf32, #tpu.memory_space<vmem>>, vector<4x18xf32>
    tpu.vector_store %arg6[%c4_253, %c269_254], %320 {strides = array<i32>} : memref<12x324xf32, #tpu.memory_space<vmem>>, vector<4x18xf32>,
    %c8_255 = arith.constant 8 : index
    %c268_256 = arith.constant 268 : index
    %323 = vector.load %arg6[%c8_255, %c268_256] : memref<12x324xf32, #tpu.memory_space<vmem>>, vector<4x18xf32>
    tpu.vector_store %arg6[%c8_255, %c268_256], %320 {strides = array<i32>} : memref<12x324xf32, #tpu.memory_space<vmem>>, vector<4x18xf32>,
    %c0_257 = arith.constant 0 : index
    %c270_258 = arith.constant 270 : index
    %324 = vector.load %arg5[%c0_257, %c270_258] : memref<12x324xf32, #tpu.memory_space<vmem>>, vector<4x16xf32>
    %325 = vector.extract_strided_slice %324 {offsets = [0, 1], sizes = [4, 1], strides = [1, 1]} : vector<4x16xf32> to vector<4x1xf32>
    %326 = vector.extract_strided_slice %324 {offsets = [0, 14], sizes = [4, 1], strides = [1, 1]} : vector<4x16xf32> to vector<4x1xf32>
    %327 = tpu.concatenate %325, %324, %326 in 1 : vector<4x1xf32>, vector<4x16xf32>, vector<4x1xf32> -> vector<4x18xf32>
    %c0_259 = arith.constant 0 : index
    %c288_260 = arith.constant 288 : index
    %328 = vector.load %arg6[%c0_259, %c288_260] : memref<12x324xf32, #tpu.memory_space<vmem>>, vector<4x18xf32>
    tpu.vector_store %arg6[%c0_259, %c288_260], %327 {strides = array<i32>} : memref<12x324xf32, #tpu.memory_space<vmem>>, vector<4x18xf32>,
    %c4_261 = arith.constant 4 : index
    %c287_262 = arith.constant 287 : index
    %329 = vector.load %arg6[%c4_261, %c287_262] : memref<12x324xf32, #tpu.memory_space<vmem>>, vector<4x18xf32>
    tpu.vector_store %arg6[%c4_261, %c287_262], %327 {strides = array<i32>} : memref<12x324xf32, #tpu.memory_space<vmem>>, vector<4x18xf32>,
    %c8_263 = arith.constant 8 : index
    %c286_264 = arith.constant 286 : index
    %330 = vector.load %arg6[%c8_263, %c286_264] : memref<12x324xf32, #tpu.memory_space<vmem>>, vector<4x18xf32>
    tpu.vector_store %arg6[%c8_263, %c286_264], %327 {strides = array<i32>} : memref<12x324xf32, #tpu.memory_space<vmem>>, vector<4x18xf32>,
    %c0_265 = arith.constant 0 : index
    %c252_266 = arith.constant 252 : index
    %331 = vector.load %arg5[%c0_265, %c252_266] : memref<12x324xf32, #tpu.memory_space<vmem>>, vector<4x16xf32>
    %332 = vector.extract_strided_slice %331 {offsets = [0, 1], sizes = [4, 1], strides = [1, 1]} : vector<4x16xf32> to vector<4x1xf32>
    %333 = vector.extract_strided_slice %331 {offsets = [0, 14], sizes = [4, 1], strides = [1, 1]} : vector<4x16xf32> to vector<4x1xf32>
    %334 = tpu.concatenate %332, %331, %333 in 1 : vector<4x1xf32>, vector<4x16xf32>, vector<4x1xf32> -> vector<4x18xf32>
    %c0_267 = arith.constant 0 : index
    %c306_268 = arith.constant 306 : index
    %335 = vector.load %arg6[%c0_267, %c306_268] : memref<12x324xf32, #tpu.memory_space<vmem>>, vector<4x18xf32>
    tpu.vector_store %arg6[%c0_267, %c306_268], %334 {strides = array<i32>} : memref<12x324xf32, #tpu.memory_space<vmem>>, vector<4x18xf32>,
    %c4_269 = arith.constant 4 : index
    %c305_270 = arith.constant 305 : index
    %336 = vector.load %arg6[%c4_269, %c305_270] : memref<12x324xf32, #tpu.memory_space<vmem>>, vector<4x18xf32>
    tpu.vector_store %arg6[%c4_269, %c305_270], %334 {strides = array<i32>} : memref<12x324xf32, #tpu.memory_space<vmem>>, vector<4x18xf32>,
    %c8_271 = arith.constant 8 : index
    %c304_272 = arith.constant 304 : index
    %337 = vector.load %arg6[%c8_271, %c304_272] : memref<12x324xf32, #tpu.memory_space<vmem>>, vector<4x18xf32>
    tpu.vector_store %arg6[%c8_271, %c304_272], %334 {strides = array<i32>} : memref<12x324xf32, #tpu.memory_space<vmem>>, vector<4x18xf32>,
    %c0_273 = arith.constant 0 : index
    %c0_274 = arith.constant 0 : index
    %c0_275 = arith.constant 0 : index
    %338 = vector.load %arg3[%c0_273, %c0_274, %c0_275] : memref<3x4x12xf32, #tpu.memory_space<vmem>>, vector<1x4x12xf32>
    %339 = vector.shape_cast %338 : vector<1x4x12xf32> to vector<4x12xf32>
    %c0_276 = arith.constant 0 : index
    %c0_277 = arith.constant 0 : index
    %340 = vector.load %arg6[%c0_276, %c0_277] : memref<12x324xf32, #tpu.memory_space<vmem>>, vector<12x288xf32>
    %cst_278 = arith.constant dense<0.000000e+00> : vector<4x288xf32>
    %341 = tpu.matmul %339, %340, %cst_278 {dimension_numbers = #tpu.dot_dimension_numbers<[1], [0], [0], [1], [0, 0, 1, 1], [], []>} : vector<4x12xf32>, vector<12x288xf32>, vector<4x288xf32> -> vector<4x288xf32>
    %c1_279 = arith.constant 1 : index
    %c0_280 = arith.constant 0 : index
    %c0_281 = arith.constant 0 : index
    %342 = vector.load %arg3[%c1_279, %c0_280, %c0_281] : memref<3x4x12xf32, #tpu.memory_space<vmem>>, vector<1x4x12xf32>
    %343 = vector.shape_cast %342 : vector<1x4x12xf32> to vector<4x12xf32>
    %c0_282 = arith.constant 0 : index
    %c18_283 = arith.constant 18 : index
    %344 = vector.load %arg6[%c0_282, %c18_283] : memref<12x324xf32, #tpu.memory_space<vmem>>, vector<12x288xf32>
    %cst_284 = arith.constant dense<0.000000e+00> : vector<4x288xf32>
    %345 = tpu.matmul %343, %344, %cst_284 {dimension_numbers = #tpu.dot_dimension_numbers<[1], [0], [0], [1], [0, 0, 1, 1], [], []>} : vector<4x12xf32>, vector<12x288xf32>, vector<4x288xf32> -> vector<4x288xf32>
    %346 = arith.addf %341, %345 : vector<4x288xf32>
    %c2_285 = arith.constant 2 : index
    %c0_286 = arith.constant 0 : index
    %c0_287 = arith.constant 0 : index
    %347 = vector.load %arg3[%c2_285, %c0_286, %c0_287] : memref<3x4x12xf32, #tpu.memory_space<vmem>>, vector<1x4x12xf32>
    %348 = vector.shape_cast %347 : vector<1x4x12xf32> to vector<4x12xf32>
    %c0_288 = arith.constant 0 : index
    %c36_289 = arith.constant 36 : index
    %349 = vector.load %arg6[%c0_288, %c36_289] : memref<12x324xf32, #tpu.memory_space<vmem>>, vector<12x288xf32>
    %cst_290 = arith.constant dense<0.000000e+00> : vector<4x288xf32>
    %350 = tpu.matmul %348, %349, %cst_290 {dimension_numbers = #tpu.dot_dimension_numbers<[1], [0], [0], [1], [0, 0, 1, 1], [], []>} : vector<4x12xf32>, vector<12x288xf32>, vector<4x288xf32> -> vector<4x288xf32>
    %351 = arith.addf %346, %350 : vector<4x288xf32>
    %352 = tpu.iota {dimensions = array<i32: 1>} : vector<1x288xi32>
    %c18_i32_291 = arith.constant 18 : i32
    %c0_i32_292 = arith.constant 0 : i32
    %353 = arith.cmpi eq, %c18_i32_291, %c0_i32_292 : i32
    %c1_i32_293 = arith.constant 1 : i32
    %354 = arith.select %353, %c1_i32_293, %c18_i32_291 : i32
    %355 = vector.broadcast %354 : i32 to vector<1x288xi32>
    %356 = arith.remsi %352, %355 : vector<1x288xi32>
    %c0_i32_294 = arith.constant 0 : i32
    %357 = vector.broadcast %c0_i32_294 : i32 to vector<1x288xi32>
    %358 = arith.cmpi ne, %356, %357 : vector<1x288xi32>
    %c0_i32_295 = arith.constant 0 : i32
    %359 = vector.broadcast %c0_i32_295 : i32 to vector<1x288xi32>
    %360 = arith.cmpi slt, %356, %359 : vector<1x288xi32>
    %c0_i32_296 = arith.constant 0 : i32
    %361 = arith.cmpi slt, %354, %c0_i32_296 : i32
    %362 = vector.broadcast %361 : i1 to vector<1x288xi1>
    %363 = vector.broadcast %362 : vector<1x288xi1> to vector<1x288xi1>
    %364 = arith.xori %360, %363 : vector<1x288xi1>
    %365 = arith.andi %364, %358 : vector<1x288xi1>
    %366 = vector.broadcast %354 : i32 to vector<1x288xi32>
    %367 = arith.addi %356, %366 : vector<1x288xi32>
    %368 = arith.select %365, %367, %356 : vector<1x288xi1>, vector<1x288xi32>
    %c16_i32_297 = arith.constant 16 : i32
    %369 = vector.broadcast %c16_i32_297 : i32 to vector<1x288xi32>
    %370 = arith.cmpi slt, %368, %369 : vector<1x288xi32>
    %cst_298 = arith.constant 0.000000e+00 : f32
    %371 = vector.shape_cast %370 : vector<1x288xi1> to vector<1x288xi1>
    %372 = vector.broadcast %371 : vector<1x288xi1> to vector<4x288xi1>
    %373 = vector.broadcast %cst_298 : f32 to vector<4x288xf32>
    %374 = arith.select %372, %351, %373 : vector<4x288xi1>, vector<4x288xf32>
    %cst_299 = arith.constant dense<0.000000e+00> : vector<4xf32>
    %375 = vector.multi_reduction <add>, %374, %cst_299 [1] : vector<4x288xf32> to vector<4xf32>
    %376 = vector.shape_cast %375 : vector<4xf32> to vector<4x1xf32>
    %cst_300 = arith.constant 3.906250e-03 : f32
    %377 = vector.broadcast %cst_300 : f32 to vector<4x1xf32>
    %378 = arith.mulf %376, %377 : vector<4x1xf32>
    %379 = vector.broadcast %378 : vector<4x1xf32> to vector<4x288xf32>
    %380 = arith.subf %351, %379 : vector<4x288xf32>
    %381 = arith.mulf %380, %380 : vector<4x288xf32>
    %cst_301 = arith.constant 0.000000e+00 : f32
    %382 = vector.shape_cast %370 : vector<1x288xi1> to vector<1x288xi1>
    %383 = vector.broadcast %382 : vector<1x288xi1> to vector<4x288xi1>
    %384 = vector.broadcast %cst_301 : f32 to vector<4x288xf32>
    %385 = arith.select %383, %381, %384 : vector<4x288xi1>, vector<4x288xf32>
    %cst_302 = arith.constant dense<0.000000e+00> : vector<4xf32>
    %386 = vector.multi_reduction <add>, %385, %cst_302 [1] : vector<4x288xf32> to vector<4xf32>
    %387 = vector.shape_cast %386 : vector<4xf32> to vector<4x1xf32>
    %cst_303 = arith.constant 3.906250e-03 : f32
    %388 = vector.broadcast %cst_303 : f32 to vector<4x1xf32>
    %389 = arith.mulf %387, %388 : vector<4x1xf32>
    %cst_304 = arith.constant 9.99999974E-6 : f32
    %390 = vector.broadcast %cst_304 : f32 to vector<4x1xf32>
    %391 = arith.addf %389, %390 : vector<4x1xf32>
    %392 = math.rsqrt %391 : vector<4x1xf32>
    %393 = vector.broadcast %392 : vector<4x1xf32> to vector<4x288xf32>
    %394 = arith.mulf %380, %393 : vector<4x288xf32>
    %c0_305 = arith.constant 0 : index
    %c0_306 = arith.constant 0 : index
    %c0_307 = arith.constant 0 : index
    %395 = vector.load %arg4[%c0_305, %c0_306, %c0_307] : memref<1x4x288xf32, #tpu.memory_space<vmem>>, vector<1x4x288xf32>
    %396 = vector.shape_cast %395 : vector<1x4x288xf32> to vector<4x288xf32>
    %397 = vector.shape_cast %394 : vector<4x288xf32> to vector<1x4x288xf32>
    tpu.vector_store %arg4[%c0_305, %c0_306, %c0_307], %397 {strides = array<i32>} : memref<1x4x288xf32, #tpu.memory_space<vmem>>, vector<1x4x288xf32>,
    return
  }
  func.func @transform_0(%arg0: i32) -> (i32, i32, i32) {
    %c0_i32 = arith.constant 0 : i32
    %c0_i32_0 = arith.constant 0 : i32
    %c0_i32_1 = arith.constant 0 : i32
    return %arg0, %c0_i32, %c0_i32_0 : i32, i32, i32
  }
  func.func @transform_1(%arg0: i32) -> (i32, i32, i32) {
    %c0_i32 = arith.constant 0 : i32
    %c0_i32_0 = arith.constant 0 : i32
    %c0_i32_1 = arith.constant 0 : i32
    %c0_i32_2 = arith.constant 0 : i32
    return %c0_i32, %c0_i32_0, %c0_i32_1 : i32, i32, i32
  }
  func.func @transform_2(%arg0: i32) -> (i32, i32, i32) {
    %c0_i32 = arith.constant 0 : i32
    %c0_i32_0 = arith.constant 0 : i32
    %c0_i32_1 = arith.constant 0 : i32
    %c0_i32_2 = arith.constant 0 : i32
    return %c0_i32, %c0_i32_0, %c0_i32_1 : i32, i32, i32
  }
  func.func @transform_3(%arg0: i32) -> (i32, i32, i32) {
    %c0_i32 = arith.constant 0 : i32
    %c0_i32_0 = arith.constant 0 : i32
    %c0_i32_1 = arith.constant 0 : i32
    return %arg0, %c0_i32, %c0_i32_0 : i32, i32, i32
  }
}

</mosaic_0001>

<bundles_post_ra>
// kernel: tpu_custom_call.1
= control target key start
LH: loop header
LB: loop body
LE: loop exit
PB: predicated region body
PF: predicated region fallthrough
CT: control target
= control target key end

     0   :  { %8 = vsyncpa [#allocation5], 0  ;;  %s3901_s0 = inlined_call_operand.hbm [shape: f32[2,4,256], index: 0, kind: input, shape index: {}]   ;;  %s3902_s1 = inlined_call_operand.hbm [shape: f32[3,4,12], index: 1, kind: input, shape index: {}]   ;;  %s3903_s2 = inlined_call_operand.hbm [shape: f32[3,4,12], index: 2, kind: input, shape index: {}]   ;;  %s3904_s3 = inlined_call_operand.hbm [shape: f32[2,4,288], index: 3, kind: output, shape index: {}]  }
   0x1   :  { %10 = vsyncpa [#allocation5 + $0x1], 0 }
   0x2   :  { %11 = vsyncpa [#allocation8], 0 }
   0x3   :  { %12 = vsyncpa [#allocation6], 0 }
   0x4   :  { %14 = vsyncpa [#allocation6 + $0x1], 0  ;;  %s3058_s12 = smov 0   ;;  %s3060_s13 = smov 0  }
   0x5   :  { %s3062_s14 = smov 0   ;;  %s3064_s15 = smov 0  }
   0x6 LB: > { %s3079_s16 = sadd.s32 4294967295, %s2948_s15   ;;  %s2531_s17 = sadd.s32 4294967294, %s2948_s15   ;;  %s2948_s15 = sphi %s3064_s15, %s4162_s15   ;;  %s2944_s14 = sphi %s3062_s14, %s4161_s14   ;;  %s2940_s13 = sphi %s3060_s13, %s4160_s13   ;;  %s2936_s12 = sphi %s3058_s12, %s4159_s12  }
   0x7   : > { %p40_p0 = scmp.ne.s32.totalorder %s2940_s13, %s2936_s12  ;;  %p3905_p1 = scmp.eq.s32.totalorder %s3079_s16, 0 }
   0x8   : > { %p112_p3 = scmp.eq.s32.totalorder %s2531_s17, 1  ;;  %p2532_p5 = scmp.ge.s32.totalorder %s2948_s15, 1 }
   0x9   : > { %p3088_p4 = por %p3905_p1, %p40_p0  ;;  %p119_p7 = scmp.lt.s32.totalorder %s2948_s15, 3 }
   0xa   : > { %p3093_p6 = por %p112_p3, %p40_p0  ;;  %s2950_s21 = smov [#allocation7]  }
   0xb   : > { %s4020_s18 = scalar_select %p3088_p4, 1, 0 }
   0xc   : > { %s4021_s19 = scalar_select %p3093_p6, 1, 0 }
   0xd   : > { %p3098_p8 = pnand %p2532_p5, %p119_p7  ;;  %s131_s22 = sshll.u32 %s2950_s21, 4  ;;  %s132_s22 = int_to_ptr.vmem [resolvable:$true] %s131_s22 }
   0xe   : > { %s2951_s24 = smov [#allocation9]   ;;  %s2811_s26 = scalar_lea.vmem %s132_s22, 192 }
   0xf   : > { %s4022_s20 = scalar_select %p3098_p8, 1, 0 }
  0x10   : > { %p2657_p9 = pneg %p3098_p8  ;;  %s144_s25 = sshll.u32 %s2951_s24, 4  ;;  %s145_s25 = int_to_ptr.vmem [resolvable:$true] %s144_s25 }
  0x11   : > { %p2812_p13 = scmp.ne.s32.totalorder %s132_s22, %s2811_s26  ;;  %p2819_p5 = scmp.lt.s32.totalorder %s132_s22, %s132_s22 }
  0x12   : > { %p3107_p11 = pnand %p2657_p9, %p3905_p1  ;;  %p2820_p7 = scmp.lt.s32.totalorder %s2811_s26, %s2811_s26 }
  0x14   : > { %p2802_p12 = pneg %p3107_p11  ;;  %p2821_p10 = por %p2820_p7, %p2819_p5 }
  0x16   : > { %p2814_p0 = pnand %p2812_p13, %p2802_p12 }
  0x18   : > { %p2815_p3 = pneg %p2814_p0 }
  0x1a   : > { %p2822_p9 = pnand %p2821_p10, %p2815_p3 }
  0x1c   : > { %2825 = shalt.err (!%p2822_p9)
}
  0x1d   : > { %s2952_s27 = smov 64   ;;  %s2953_s28 = smov 4  }
  0x1e   : > { %2660 = dma.hbm_to_vmem [thread:$0]  (!%p3107_p11), %s3902_s1, 192, %s132_s22, [#allocation8], %s2952_s27, %s2952_s27, %s2953_s28  }
  0x1f   : > { %s2837_s4 = scalar_lea.vmem %s145_s25, 192  ;;  %p2845_p2 = scmp.lt.s32.totalorder %s145_s25, %s145_s25 }
  0x20   : > { %p2838_p1 = scmp.ne.s32.totalorder %s145_s25, %s2837_s4  ;;  %p2846_p6 = scmp.lt.s32.totalorder %s2837_s4, %s2837_s4 }
  0x22   : > { %p2840_p13 = pnand %p2838_p1, %p2802_p12  ;;  %p2847_p5 = por %p2846_p6, %p2845_p2 }
  0x24   : > { %p2841_p0 = pneg %p2840_p13 }
  0x26   : > { %p2848_p10 = pnand %p2847_p5, %p2841_p0 }
  0x28   : > { %2851 = shalt.err (!%p2848_p10)
}
  0x29   : > { %2663 = dma.hbm_to_vmem [thread:$0]  (!%p3107_p11), %s3903_s2, 192, %s145_s25, [#allocation8], %s2952_s27, %s2952_s27, %s2953_s28  }
  0x2a   : > { %s3130_s7 = sadd.s32 1, %s2948_s15   ;;  %s27_s8 = sadd.s32 1, %s2944_s14 }
  0x2b   : > { %s24_s9 = ssub.s32 %s2948_s15, %s3130_s7  ;;  %p34_p1 = scmp.ne.s32.totalorder %s2944_s14, %s2940_s13 }
  0x2c   : > { %p25_p2 = scmp.eq.s32.totalorder %s24_s9, 0  ;;  %p35_p6 = scmp.eq.s32.totalorder %s2948_s15, 0 }
  0x2d   : > { %p4024_p12 = scmp.eq.s32.totalorder %s3079_s16, 1  ;;  %p2674_p7 = scmp.lt.s32.totalorder %s2948_s15, 2 }
  0x2e   : > { %s3146_s11 = scalar_select %p25_p2, %s2944_s14, %s27_s8  }
  0x2f   : > { %p3140_p3 = por %p4024_p12, %p34_p1  ;;  %p36_p9 = por %p35_p6, %p34_p1 }
  0x30   : > { %s158_s17 = sand.u32 1, %s2944_s14   ;;  %s2576_s22 = sshll.u32 %s2948_s15, 7 }
  0x31   : > { %s4025_s10 = scalar_select %p3140_p3, 1, 0 }
  0x32   : > { %s2536_s21 = sshll.u32 %s158_s17, 3  ;;  %s3153_s25 = scalar_lea.hbm %s3901_s0, %s2576_s22 }
  0x33   : > { %s162_s26 = scalar_lea.vmem [#allocation4], %s2536_s21  ;;  %p3155_p11 = pnand %p2674_p7, %p36_p9 }
  0x34   : > { %s170_s27 = sshll.u32 %s162_s26, 4  ;;  %s159_s29 = scalar_lea.sflag [#allocation5], %s158_s17  ;;  %s171_s27 = int_to_ptr.vmem [resolvable:$true] %s170_s27 }
  0x35   : > { %s2852_s30 = scalar_lea.hbm %s3153_s25, 128  ;;  %p2854_p0 = pneg %p3155_p11 }
  0x36   : > { %p2853_p13 = scmp.ne.s32.totalorder %s3153_s25, %s2852_s30  ;;  %s2857_s6 = scalar_lea.hbm %s3901_s0, 256 }
  0x37   : > { %p2858_p1 = scmp.lt.s32.totalorder %s3153_s25, %s3901_s0  ;;  %p2859_p2 = scmp.lt.s32.totalorder %s2857_s6, %s2852_s30 }
  0x38   : > { %p2855_p5 = pnand %p2854_p0, %p2853_p13 }
  0x39   : > { %p2860_p6 = por %p2859_p2, %p2858_p1 }
  0x3a   : > { %p2856_p10 = pneg %p2855_p5 }
  0x3c   : > { %p2861_p12 = pnand %p2860_p6, %p2856_p10 }
  0x3e   : > { %2864 = shalt.err (!%p2861_p12)
}
  0x3f   : > { %s2865_s21 = scalar_lea.vmem %s171_s27, 128  ;;  %s2954_s17 = smov [#allocation4]  }
  0x40   : > { %p2866_p7 = scmp.ne.s32.totalorder %s171_s27, %s2865_s21  ;;  %s2870_s22 = sshll.u32 %s2954_s17, 4  ;;  %s2871_s22 = int_to_ptr.vmem [resolvable:$false] %s2870_s22 }
  0x41   : > { %s2872_s23 = scalar_lea.vmem %s2871_s22, 256  ;;  %p2873_p13 = scmp.lt.s32.totalorder %s171_s27, %s2871_s22 }
  0x42   : > { %p2868_p9 = pnand %p2866_p7, %p2854_p0  ;;  %p2874_p5 = scmp.lt.s32.totalorder %s2872_s23, %s2865_s21 }
  0x44   : > { %p2869_p3 = pneg %p2868_p9  ;;  %p2875_p4 = por %p2874_p5, %p2873_p13 }
  0x46   : > { %p2876_p8 = pnand %p2875_p4, %p2869_p3 }
  0x48   : > { %2879 = shalt.err (!%p2876_p8)
}
  0x49   : > { %2667 = dma.hbm_to_vmem [thread:$0]  (!%p3155_p11), %s3153_s25, 128, %s171_s27, %s159_s29  }
  0x4a   : > { %p4027_p10 = scmp.ne.s32.totalorder %s4022_s20, 0 }
  0x4b   : > { %s3176_s24 = sand.u32 (!%p4027_p10), 1, %s2940_s13   ;;  %p4028_p0 = scmp.ne.s32.totalorder (!%p4027_p10), %s4020_s18, 0 }
  0x4c   : > { %179 = sbr.rel (%p4027_p10) target bundleno = 2196 (0x894), region = 32  ;;  %s2540_s26 = sshll.u32 (!%p4027_p10), %s3176_s24, 3 }
  0x4d   : > { %s182_s30 = scalar_lea.sflag (!%p4027_p10), [#allocation5], %s3176_s24  ;;  %s3180_s4 = scalar_lea.vmem (!%p4027_p10), [#allocation4], %s2540_s26 }
  0x51   : > { %2923 = dma.done.wait (%p4028_p0), %s182_s30, 128  }
  0x52   : > { %2925 = vsyncadd (%p4028_p0), %s182_s30, 4294967168  ;;  %p4029_p4 = scmp.eq.s32.totalorder %s3079_s16, 0 }
  0x54   : > { %2927 = dma.done.wait (%p4029_p4), [#allocation8], 384   ;;  %p4030_p8 = pmov %p4029_p4 }
  0x55   : > { %v429_v0 = vld [vmem:[%s3180_s4] sm:$0xf]  ;;  %s4008_s20 = smov 31   ;;  %s3918_s25 = smov 111   ;;  %v493_v4 = vld [vmem:[%s3180_s4 + $0x4] sm:$0xf] }
  0x56   : > { %2929 = vsyncadd (%p4030_p8), [#allocation8], 4294966912  ;;  %v220_v1 = vld [vmem:[%s3180_s4] sm:$0xf]  ;;  %431 = vrot.lane.b32.xlu0 %v429_v0, %s4008_s20  ;;  %s3928_s18 = smov 33   ;;  %s3909_s27 = smov 113  }
  0x57   : > { %222 = vrot.lane.b32.xlu1 %v220_v1, %s3918_s25  ;;  %v464_v2 = vld [vmem:[%s3180_s4] sm:$0xf]  ;;  %s3930_s28 = smov 35   ;;  %s3925_s29 = smov 15   ;;  %v522_v6 = vld [vmem:[%s3180_s4 + $0x4] sm:$0xf] }
  0x58   : > { %s3926_s5 = smov 17   ;;  %s3913_s6 = smov 115   ;;  %v249_v3 = vld [vmem:[%s3180_s4] sm:$0xf]  ;;  %v551_v8 = vld [vmem:[%s3180_s4 + $0x4] sm:$0xf] }
  0x59   : > { %s4013_s8 = smov 127   ;;  %s3911_s9 = smov 1   ;;  %v279_v5 = vld [vmem:[%s3180_s4] sm:$0xf]  ;;  %v638_v9 = vld [vmem:[%s3180_s4 + $0x4] sm:$0xf] }
  0x5a   : > { %434 = vrot.lane.b32.xlu0 %v429_v0, %s3928_s18  ;;  %s2965_s21 = smov 19   ;;  %s2966_s17 = smov 3   ;;  %v309_v7 = vld [vmem:[%s3180_s4] sm:$0xf]  ;;  %v580_v11 = vld [vmem:[%s3180_s4 + $0x4] sm:$0xf] }
  0x5b   : > { %225 = vrot.lane.b32.xlu1 %v220_v1, %s3909_s27  ;;  %s3916_s22 = smov 95   ;;  %s3915_s23 = smov 97   ;;  %v339_v10 = vld [vmem:[%s3180_s4] sm:$0xf]  ;;  %v672_v12 = vld [vmem:[%s3180_s4 + $0x4] sm:$0xf] }
  0x5c   : > { %s2969_s26 = smov 47   ;;  %s3981_s30 = smov 49   ;;  %v369_v13 = vld [vmem:[%s3180_s4] sm:$0xf]  ;;  %v609_v14 = vld [vmem:[%s3180_s4 + $0x4] sm:$0xf] }
  0x5d   : > { %v701_v15 = vld [vmem:[%s3180_s4 + $0x4] sm:$0xf]  ;;  %v399_v16 = vld [vmem:[%s3180_s4] sm:$0xf]  ;;  %vm231_vm0 = vcmask 7168   ;;  %vm233_vm1 = vcmask 138240  }
  0x5e   : > { %437 = vrot.lane.b32.xlu0 %v429_v0, %s3930_s28  ;;  %v730_v17 = vld [vmem:[%s3180_s4 + $0x4] sm:$0xf]  ;;  %s2979_s4 = smov 124   ;;  %vm235_vm2 = vcmask 142336   ;;  %vm218_vm3 = vcmask 552464   ;;  %v2988_v62 = vmov 0.0  }
  0x5f   : > { %466 = vrot.lane.b32.xlu1 %v464_v2, %s3925_s29  ;;  %219 = vst.msk [vmem:[#allocation2 + $0x28] sm:$0xf] %vm218_vm3, %v2988_v62  ;;  %1373 = vst.msk [vmem:[#allocation3 + $0x28] sm:$0xf] %vm218_vm3, %v2988_v62  ;;  %2595 = vmatprep.subr.mxu1 %v2988_v62  ;;  %vm216_vm4 = vcmask 556560   ;;  %vm462_vm5 = vcmask 109568  }
  0x60   : > { %869 = vmatprep.mubr.f32.mxu0 %v2988_v62  ;;  %217 = vst.msk [vmem:[#allocation2 + $0x10] sm:$0xff] %vm216_vm4, %v2988_v62  ;;  %1372 = vst.msk [vmem:[#allocation3 + $0x10] sm:$0xff] %vm216_vm4, %v2988_v62  ;;  %vm247_vm6 = vcmask 125952   ;;  %vm3980_vm7 = vcmask 257136   ;;  %vm3965_vm8 = vcmask 273536   ;;  %vm4003_vm9 = vcmask 404736  }
  0x61   : > { %vm3955_vm10 = vcmask 121860   ;;  %vm3958_vm11 = vcmask 421136   ;;  %vm3954_vm12 = vcmask 138244   ;;  %vm3953_vm13 = vcmask 269436   ;;  %p4156_p11 = scmp.ne.s32.totalorder %s4025_s10, 0 }
  0x62   : > { %469 = vrot.lane.b32.xlu0 %v464_v2, %s3926_s5  ;;  %vm3956_vm14 = vcmask 289936   ;;  %vm4001_vm15 = vcmask 552336   ;;  %vm3957_vm3 = vcmask 285836   ;;  %vm3964_vm4 = vcmask 568736  }
  0x63   : > { %228 = vrot.lane.b32.xlu1 %v220_v1, %s3913_s6 }
  0x66   : > { %251 = vrot.lane.b32.xlu0 %v249_v3, %s4013_s8 }
  0x67   : > { %254 = vrot.lane.b32.xlu1 %v249_v3, %s3911_s9 }
  0x6a   : > { %472 = vrot.lane.b32.xlu0 %v464_v2, %s2965_s21 }
  0x6b   : > { %495 = vrot.lane.b32.xlu1 %v493_v4, %s4013_s8 }
  0x6e   : > { %498 = vrot.lane.b32.xlu0 %v493_v4, %s3911_s9  ;;  %s2972_s9 = smov 79  }
  0x6f   : > { %257 = vrot.lane.b32.xlu1 %v249_v3, %s2966_s17 }
  0x72   : > { %281 = vrot.lane.b32.xlu0 %v279_v5, %s3918_s25 }
  0x73   : > { %284 = vrot.lane.b32.xlu1 %v279_v5, %s3909_s27 }
  0x76   : > { %501 = vrot.lane.b32.xlu0 %v493_v4, %s2966_s17 }
  0x77   : > { %524 = vrot.lane.b32.xlu1 %v522_v6, %s3918_s25  ;;  %s2976_s25 = smov 63  }
  0x7a   : > { %527 = vrot.lane.b32.xlu0 %v522_v6, %s3909_s27  ;;  %s2971_s27 = smov 99  }
  0x7b   : > { %287 = vrot.lane.b32.xlu1 %v279_v5, %s3913_s6 }
  0x7e   : > { %311 = vrot.lane.b32.xlu0 %v309_v7, %s3916_s22 }
  0x7f   : > { %314 = vrot.lane.b32.xlu1 %v309_v7, %s3915_s23 }
  0x82   : > { %530 = vrot.lane.b32.xlu0 %v522_v6, %s3913_s6  ;;  %s2973_s6 = smov 81  }
  0x83   : > { %553 = vrot.lane.b32.xlu1 %v551_v8, %s3916_s22  ;;  %s2975_s22 = smov 83  }
  0x86   : > { %556 = vrot.lane.b32.xlu0 %v551_v8, %s3915_s23  ;;  %s3932_s23 = smov 51  }
  0x87   : > { %640 = vrot.lane.b32.xlu1 %v638_v9, %s2969_s26 }
  0x8a   : > { %643 = vrot.lane.b32.xlu0 %v638_v9, %s3981_s30 }
  0x8b   : > { %317 = vrot.lane.b32.xlu1 %v309_v7, %s2971_s27 }
  0x8e   : > { %341 = vrot.lane.b32.xlu0 %v339_v10, %s2972_s9 }
  0x8f   : > { %344 = vrot.lane.b32.xlu1 %v339_v10, %s2973_s6 }
  0x92   : > { %559 = vrot.lane.b32.xlu0 %v551_v8, %s2971_s27  ;;  %s2977_s27 = smov 65  }
  0x93   : > { %582 = vrot.lane.b32.xlu1 %v580_v11, %s2972_s9 }
  0x96   : > { %585 = vrot.lane.b32.xlu0 %v580_v11, %s2973_s6  ;;  %s2978_s6 = smov 67  }
  0x97   : > { %646 = vrot.lane.b32.xlu1 %v638_v9, %s3932_s23 }
  0x9a   : > { %674 = vrot.lane.b32.xlu0 %v672_v12, %s4008_s20 }
  0x9b   : > { %677 = vrot.lane.b32.xlu1 %v672_v12, %s3928_s18 }
  0x9e   : > { %347 = vrot.lane.b32.xlu0 %v339_v10, %s2975_s22 }
  0x9f   : > { %371 = vrot.lane.b32.xlu1 %v369_v13, %s2976_s25 }
  0xa2   : > { %374 = vrot.lane.b32.xlu0 %v369_v13, %s2977_s27 }
  0xa3   : > { %588 = vrot.lane.b32.xlu1 %v580_v11, %s2975_s22  ;;  %s4016_s22 = smov 14  }
  0xa6   : > { %611 = vrot.lane.b32.xlu0 %v609_v14, %s2976_s25  ;;  %s3923_s25 = smov 126  }
  0xa7   : > { %614 = vrot.lane.b32.xlu1 %v609_v14, %s2977_s27  ;;  %s2983_s27 = smov 32  }
  0xaa   : > { %680 = vrot.lane.b32.xlu0 %v672_v12, %s3930_s28 }
  0xab   : > { %703 = vrot.lane.b32.xlu1 %v701_v15, %s3925_s29 }
  0xae   : > { %706 = vrot.lane.b32.xlu0 %v701_v15, %s3926_s5 }
  0xaf   : > { %377 = vrot.lane.b32.xlu1 %v369_v13, %s2978_s6 }
  0xb2   : > { %401 = vrot.lane.b32.xlu0 %v399_v16, %s2969_s26  ;;  %s3920_s26 = smov 16  }
  0xb3   : > { %404 = vrot.lane.b32.xlu1 %v399_v16, %s3981_s30 }
  0xb6   : > { %617 = vrot.lane.b32.xlu0 %v609_v14, %s2978_s6  ;;  %s3922_s6 = smov 125  }
  0xb7   : > { %709 = vrot.lane.b32.xlu1 %v701_v15, %s2965_s21 }
  0xba   : > { %732 = vrot.lane.b32.xlu0 %v730_v17, %s4008_s20 }
  0xbb   : > { %735 = vrot.lane.b32.xlu1 %v730_v17, %s3928_s18 }
  0xbe   : > { %407 = vrot.lane.b32.xlu0 %v399_v16, %s3932_s23 }
  0xbf   : > { %738 = vrot.lane.b32.xlu1 %v730_v17, %s3930_s28 }
  0xc8   : > { %v432_v18 = vpop.permute.xlu0 %431 }
  0xc9   : > { %v223_v19 = vpop.permute.xlu1 %222 }
  0xcc   : > { %v435_v20 = vpop.permute.xlu0 %434 }
  0xcd   : > { %v226_v21 = vpop.permute.xlu1 %225  ;;  %v440_v22 = vsel %vm231_vm0, %v432_v18, %v435_v20 }
  0xce   : > { %v232_v26 = vsel %vm231_vm0, %v223_v19, %v226_v21 }
  0xd0   : > { %v438_v23 = vpop.permute.xlu0 %437 }
  0xd1   : > { %v467_v24 = vpop.permute.xlu1 %466  ;;  %v441_v25 = vsel %vm233_vm1, %v440_v22, %v438_v23 }
  0xd2   : > { %457 = vrot.lane.b32.xlu0 %v441_v25, %s2979_s4  ;;  %v449_v45 = vrot.slane %v441_v25, 4 }
  0xd4   : > { %v470_v27 = vpop.permute.xlu0 %469 }
  0xd5   : > { %v229_v28 = vpop.permute.xlu1 %228  ;;  %v475_v32 = vsel %vm231_vm0, %v467_v24, %v470_v27 }
  0xd6   : > { %v234_v29 = vsel %vm233_vm1, %v232_v26, %v229_v28 }
  0xd7   : > { %244 = vrot.lane.b32.xlu1 %v234_v29, %s3923_s25  ;;  %236 = vst.msk [vmem:[#allocation2] sm:$0xf] %vm235_vm2, %v234_v29  ;;  %v238_v50 = vrot.slane %v234_v29, 4 }
  0xd8   : > { %v252_v30 = vpop.permute.xlu0 %251 }
  0xd9   : > { %v255_v31 = vpop.permute.xlu1 %254 }
  0xda   : > { %v260_v36 = vsel %vm231_vm0, %v252_v30, %v255_v31 }
  0xdc   : > { %v473_v33 = vpop.permute.xlu0 %472 }
  0xdd   : > { %v496_v34 = vpop.permute.xlu1 %495  ;;  %v476_v35 = vsel %vm233_vm1, %v475_v32, %v473_v33 }
  0xde   : > { %488 = vrot.lane.b32.xlu0 %v476_v35, %s4016_s22  ;;  %v482_v54 = vrot.slane %v476_v35, 4 }
  0xe0   : > { %v499_v37 = vpop.permute.xlu0 %498 }
  0xe1   : > { %v258_v38 = vpop.permute.xlu1 %257  ;;  %v504_v42 = vsel %vm231_vm0, %v496_v34, %v499_v37 }
  0xe2   : > { %v261_v39 = vsel %vm233_vm1, %v260_v36, %v258_v38  ;;  %443 = vrot.lane.b32.xlu0 %v441_v25, %s3923_s25  ;;  %s3927_s25 = smov 18  }
  0xe3   : > { %274 = vrot.lane.b32.xlu1 %v261_v39, %s3920_s26  ;;  %v268_v61 = vrot.slane %v261_v39, 4 }
  0xe4   : > { %v282_v40 = vpop.permute.xlu0 %281 }
  0xe5   : > { %v285_v41 = vpop.permute.xlu1 %284 }
  0xe6   : > { %v290_v47 = vsel %vm231_vm0, %v282_v40, %v285_v41 }
  0xe7   : > { %478 = vrot.lane.b32.xlu1 %v476_v35, %s3920_s26  ;;  %s2985_s26 = smov 34  }
  0xe8   : > { %v502_v43 = vpop.permute.xlu0 %501 }
  0xe9   : > { %v525_v44 = vpop.permute.xlu1 %524  ;;  %v505_v46 = vsel %vm233_vm1, %v504_v42, %v502_v43 }
  0xea   : > { %517 = vrot.lane.b32.xlu0 %v505_v46, %s2983_s27  ;;  %v511_v5 = vrot.slane %v505_v46, 4 }
  0xeb   : > { %450 = vrot.lane.b32.xlu1 %v449_v45, %s3922_s6  ;;  %s4018_s6 = smov 50  }
  0xec   : > { %v528_v48 = vpop.permute.xlu0 %527 }
  0xed   : > { %v288_v49 = vpop.permute.xlu1 %287  ;;  %v533_v55 = vsel %vm231_vm0, %v525_v44, %v528_v48 }
  0xee   : > { %v291_v51 = vsel %vm233_vm1, %v290_v47, %v288_v49 }
  0xef   : > { %239 = vrot.lane.b32.xlu1 %v238_v50, %s4013_s8  ;;  %304 = vrot.lane.b32.xlu0 %v291_v51, %s2985_s26  ;;  %v298_v16 = vrot.slane %v291_v51, 4 }
  0xf0   : > { %v312_v52 = vpop.permute.xlu0 %311 }
  0xf1   : > { %v315_v53 = vpop.permute.xlu1 %314 }
  0xf2   : > { %v320_v63 = vsel %vm231_vm0, %v312_v52, %v315_v53 }
  0xf3   : > { %483 = vrot.lane.b32.xlu0 %v482_v54, %s3925_s29  ;;  %s3942_s29 = smov 52  }
  0xf4   : > { %v531_v56 = vpop.permute.xlu0 %530 }
  0xf5   : > { %v554_v57 = vpop.permute.xlu1 %553  ;;  %v534_v58 = vsel %vm233_vm1, %v533_v55, %v531_v56 }
  0xf6   : > { %546 = vrot.lane.b32.xlu1 %v534_v58, %s4018_s6  ;;  %v540_v24 = vrot.slane %v534_v58, 4 }
  0xf7   : > { %263 = vrot.lane.b32.xlu0 %v261_v39, %s3927_s25  ;;  %s3935_s25 = smov 36  }
  0xf8   : > { %v557_v59 = vpop.permute.xlu0 %556 }
  0xf9   : > { %v641_v60 = vpop.permute.xlu1 %640  ;;  %v562_v6 = vsel %vm231_vm0, %v554_v57, %v557_v59 }
  0xfa   : > { %269 = vrot.lane.b32.xlu1 %v268_v61, %s3926_s5  ;;  %s3929_s5 = smov 68  }
  0xfc   : > { %v644_v0 = vpop.permute.xlu0 %643 }
  0xfd   : > { %v318_v1 = vpop.permute.xlu1 %317  ;;  %v649_v10 = vsel %vm231_vm0, %v641_v60, %v644_v0 }
  0xfe   : > { %v321_v2 = vsel %vm233_vm1, %v320_v63, %v318_v1  ;;  %507 = vrot.lane.b32.xlu1 %v505_v46, %s2985_s26 }
  0xff   : > { %334 = vrot.lane.b32.xlu0 %v321_v2, %s3942_s29  ;;  %v328_v35 = vrot.slane %v321_v2, 4 }
 0x100   : > { %v342_v3 = vpop.permute.xlu0 %341 }
 0x101   : > { %v345_v4 = vpop.permute.xlu1 %344 }
 0x102   : > { %v350_v17 = vsel %vm231_vm0, %v342_v3, %v345_v4 }
 0x103   : > { %512 = vrot.lane.b32.xlu0 %v511_v5, %s3928_s18  ;;  %s3931_s18 = smov 122  }
 0x104   : > { %v560_v7 = vpop.permute.xlu0 %559 }
 0x105   : > { %v583_v8 = vpop.permute.xlu1 %582  ;;  %v563_v9 = vsel %vm233_vm1, %v562_v6, %v560_v7 }
 0x106   : > { %575 = vrot.lane.b32.xlu1 %v563_v9, %s3929_s5  ;;  %s3939_s5 = smov 70   ;;  %v569_v39 = vrot.slane %v563_v9, 4 }
 0x108   : > { %v586_v11 = vpop.permute.xlu0 %585 }
 0x109   : > { %v647_v12 = vpop.permute.xlu1 %646  ;;  %v591_v21 = vsel %vm231_vm0, %v583_v8, %v586_v11 }
 0x10a   : > { %v3293_v13 = vsel %vm233_vm1, %v649_v10, %v647_v12  ;;  %293 = vrot.lane.b32.xlu1 %v291_v51, %s3935_s25  ;;  %s3938_s25 = smov 69  }
 0x10b   : > { %665 = vrot.lane.b32.xlu0 %v3293_v13, %s3931_s18  ;;  %s3933_s18 = smov 54   ;;  %v657_v46 = vrot.slane %v3293_v13, 4 }
 0x10c   : > { %v675_v14 = vpop.permute.xlu0 %674 }
 0x10d   : > { %v678_v15 = vpop.permute.xlu1 %677 }
 0x10e   : > { %v683_v28 = vsel %vm231_vm0, %v675_v14, %v678_v15 }
 0x10f   : > { %299 = vrot.lane.b32.xlu0 %v298_v16, %s3930_s28  ;;  %s3934_s28 = smov 86  }
 0x110   : > { %v348_v18 = vpop.permute.xlu0 %347 }
 0x111   : > { %v372_v19 = vpop.permute.xlu1 %371  ;;  %v351_v20 = vsel %vm233_vm1, %v350_v17, %v348_v18 }
 0x112   : > { %364 = vrot.lane.b32.xlu1 %v351_v20, %s3939_s5  ;;  %v358_v48 = vrot.slane %v351_v20, 4 }
 0x113   : > { %536 = vrot.lane.b32.xlu0 %v534_v58, %s3942_s29  ;;  %s4014_s29 = smov 106  }
 0x114   : > { %v375_v22 = vpop.permute.xlu0 %374 }
 0x115   : > { %v589_v23 = vpop.permute.xlu1 %588  ;;  %v380_v32 = vsel %vm231_vm0, %v372_v19, %v375_v22 }
 0x116   : > { %v3305_v25 = vsel %vm233_vm1, %v591_v21, %v589_v23  ;;  %541 = vrot.lane.b32.xlu1 %v540_v24, %s3932_s23  ;;  %s3936_s23 = smov 12  }
 0x117   : > { %604 = vrot.lane.b32.xlu0 %v3305_v25, %s3934_s28  ;;  %s3948_s28 = smov 88   ;;  %v598_v53 = vrot.slane %v3305_v25, 4 }
 0x118   : > { %v612_v26 = vpop.permute.xlu0 %611 }
 0x119   : > { %v615_v27 = vpop.permute.xlu1 %614 }
 0x11a   : > { %v620_v40 = vsel %vm231_vm0, %v612_v26, %v615_v27 }
 0x11b   : > { %323 = vrot.lane.b32.xlu0 %v321_v2, %s3933_s18  ;;  %s3937_s18 = smov 53  }
 0x11c   : > { %v681_v29 = vpop.permute.xlu0 %680 }
 0x11d   : > { %v704_v30 = vpop.permute.xlu1 %703  ;;  %v684_v31 = vsel %vm233_vm1, %v683_v28, %v681_v29 }
 0x11e   : > { %696 = vrot.lane.b32.xlu1 %v684_v31, %s3936_s23  ;;  %s3941_s23 = smov 104   ;;  %v690_v56 = vrot.slane %v684_v31, 4 }
 0x120   : > { %v707_v33 = vpop.permute.xlu0 %706 }
 0x121   : > { %v378_v34 = vpop.permute.xlu1 %377  ;;  %v712_v44 = vsel %vm231_vm0, %v704_v30, %v707_v33 }
 0x122   : > { %v381_v36 = vsel %vm233_vm1, %v380_v32, %v378_v34  ;;  %329 = vrot.lane.b32.xlu1 %v328_v35, %s3937_s18  ;;  %s3944_s18 = smov 123  }
 0x123   : > { %394 = vrot.lane.b32.xlu0 %v381_v36, %s3948_s28  ;;  %v388_v58 = vrot.slane %v381_v36, 4 }
 0x124   : > { %v402_v37 = vpop.permute.xlu0 %401 }
 0x125   : > { %v405_v38 = vpop.permute.xlu1 %404 }
 0x126   : > { %565 = vrot.lane.b32.xlu1 %v563_v9, %s3939_s5  ;;  %s3946_s5 = smov 72   ;;  %v410_v50 = vsel %vm231_vm0, %v402_v37, %v405_v38 }
 0x127   : > { %570 = vrot.lane.b32.xlu0 %v569_v39, %s3938_s25  ;;  %s3947_s25 = smov 30  }
 0x128   : > { %v618_v41 = vpop.permute.xlu0 %617 }
 0x129   : > { %v621_v42 = vsel %vm233_vm1, %v620_v40, %v618_v41  ;;  %v710_v43 = vpop.permute.xlu1 %709 }
 0x12a   : > { %633 = vrot.lane.b32.xlu1 %v621_v42, %s3941_s23  ;;  %v713_v47 = vsel %vm233_vm1, %v712_v44, %v710_v43  ;;  %s3945_s23 = smov 71   ;;  %v627_v59 = vrot.slane %v621_v42, 4 }
 0x12b   : > { %652 = vrot.lane.b32.xlu0 %v3293_v13, %s2979_s4  ;;  %v719_v61 = vrot.slane %v713_v47, 4 }
 0x12c   : > { %v733_v45 = vpop.permute.xlu0 %732 }
 0x12d   : > { %v736_v51 = vpop.permute.xlu1 %735 }
 0x12e   : > { %658 = vrot.lane.b32.xlu1 %v657_v46, %s3944_s18  ;;  %v741_v54 = vsel %vm231_vm0, %v733_v45, %v736_v51  ;;  %s3951_s18 = smov 87  }
 0x12f   : > { %725 = vrot.lane.b32.xlu0 %v713_v47, %s3947_s25  ;;  %s4012_s25 = smov 90  }
 0x130   : > { %v408_v49 = vpop.permute.xlu0 %407 }
 0x131   : > { %v411_v52 = vsel %vm233_vm1, %v410_v50, %v408_v49  ;;  %v739_v55 = vpop.permute.xlu1 %738 }
 0x132   : > { %353 = vrot.lane.b32.xlu1 %v351_v20, %s3946_s5  ;;  %v742_v57 = vsel %vm233_vm1, %v741_v54, %v739_v55  ;;  %s4011_s5 = smov 48   ;;  %v418_v0 = vrot.slane %v411_v52, 4 }
 0x133   : > { %359 = vrot.lane.b32.xlu0 %v358_v48, %s3945_s23  ;;  %s3950_s23 = smov 13   ;;  %v748_v1 = vrot.slane %v742_v57, 4 }
 0x136   : > { %424 = vrot.lane.b32.xlu1 %v411_v52, %s4014_s29 }
 0x137   : > { %594 = vrot.lane.b32.xlu0 %v3305_v25, %s3948_s28  ;;  %s3952_s28 = smov 89  }
 0x13a   : > { %599 = vrot.lane.b32.xlu1 %v598_v53, %s3951_s18  ;;  %s4010_s18 = smov 108  }
 0x13b   : > { %686 = vrot.lane.b32.xlu0 %v684_v31, %s4016_s22  ;;  %s4046_s22 = smov 97  }
 0x13e   : > { %691 = vrot.lane.b32.xlu1 %v690_v56, %s3950_s23  ;;  %s4009_s23 = smov 105  }
 0x13f   : > { %754 = vrot.lane.b32.xlu0 %v742_v57, %s4011_s5  ;;  %s3020_s5 = smov 5  }
 0x142   : > { %383 = vrot.lane.b32.xlu1 %v381_v36, %s4012_s25  ;;  %s4044_s25 = smov 115  }
 0x143   : > { %389 = vrot.lane.b32.xlu0 %v388_v58, %s3952_s28  ;;  %s3983_s28 = smov 107  }
 0x144   : > { %v3348_v60 = vpop.permute.xlu0 %457 }
 0x145   : > { %463 = vst.msk [vmem:[#allocation2 + $0x20] sm:$0xf] %vm462_vm5, %v3348_v60 }
 0x146   : > { %623 = vrot.lane.b32.xlu1 %v621_v42, %s4014_s29  ;;  %s3021_s29 = smov 93  }
 0x147   : > { %628 = vrot.lane.b32.xlu0 %v627_v59, %s4009_s23  ;;  %s4042_s23 = smov 1  }
 0x149   : > { %v245_v63 = vpop.permute.xlu1 %244 }
 0x14a   : > { %248 = vst.msk [vmem:[#allocation2 + $0x18] sm:$0xf] %vm247_vm6, %v245_v63  ;;  %715 = vrot.lane.b32.xlu1 %v713_v47, %s2983_s27 }
 0x14b   : > { %720 = vrot.lane.b32.xlu0 %v719_v61, %s4008_s20  ;;  %v767_v61 = vld [vmem:[#allocation7 + $0x4] sm:$0xf]  ;;  %s3018_s20 = smov 109  }
 0x14e   : > { %413 = vrot.lane.b32.xlu1 %v411_v52, %s4010_s18  ;;  %s3019_s18 = smov 23  }
 0x14f   : > { %419 = vrot.lane.b32.xlu0 %v418_v0, %s3983_s28  ;;  %s4004_s28 = smov 92  }
 0x150   : > { %v489_v2 = vpop.permute.xlu0 %488 }
 0x151   : > { %492 = vst.msk [vmem:[#allocation2 + $0x20] sm:$0xf] %vm3980_vm7, %v489_v2  ;;  %v759_v2 = vld [vmem:[#allocation7] sm:$0xf] }
 0x152   : > { %744 = vrot.lane.b32.xlu1 %v742_v57, %s4018_s6  ;;  %s3024_s6 = smov 75  }
 0x153   : > { %749 = vrot.lane.b32.xlu0 %v748_v1, %s3981_s30  ;;  %s4006_s30 = smov 110  }
 0x154   : > { %v3362_v3 = vpop.permute.xlu0 %443 }
 0x155   : > { %v275_v4 = vpop.permute.xlu1 %274  ;;  %448 = vst.msk [vmem:[#allocation2 + $0x8] sm:$0xf] %vm247_vm6, %v3362_v3 }
 0x156   : > { %278 = vst.msk [vmem:[#allocation2 + $0x18] sm:$0xf] %vm3965_vm8, %v275_v4 }
 0x159   : > { %v479_v5 = vpop.permute.xlu1 %478 }
 0x15a   : > { %481 = vst.msk [vmem:[#allocation2 + $0x8] sm:$0xf] %vm3965_vm8, %v479_v5  ;;  %vm3971_vm8 = vcmask 712236  }
 0x15c   : > { %v518_v6 = vpop.permute.xlu0 %517 }
 0x15d   : > { %v3368_v7 = vpop.permute.xlu1 %450  ;;  %521 = vst.msk [vmem:[#allocation2 + $0x20] sm:$0xf] %vm4003_vm9, %v518_v6 }
 0x15e   : > { %456 = vst.msk [vmem:[#allocation2 + $0x8] sm:$0xf0] %vm3955_vm10, %v3368_v7  ;;  %vm3961_vm10 = vcmask 93184  }
 0x161   : > { %v305_v8 = vpop.permute.xlu0 %304  ;;  %v240_v9 = vpop.permute.xlu1 %239 }
 0x162   : > { %308 = vst.msk [vmem:[#allocation2 + $0x18] sm:$0xf] %vm3958_vm11, %v305_v8 }
 0x163   : > { %243 = vst.msk [vmem:[#allocation2] sm:$0xf0] %vm3954_vm12, %v240_v9  ;;  %vm3960_vm12 = vcmask 699936  }
 0x165   : > { %v484_v10 = vpop.permute.xlu0 %483 }
 0x166   : > { %487 = vst.msk [vmem:[#allocation2 + $0x8] sm:$0xf0] %vm3953_vm13, %v484_v10  ;;  %vm3959_vm13 = vcmask 417036  }
 0x168   : > { %v547_v12 = vpop.permute.xlu1 %546 }
 0x169   : > { %v264_v11 = vpop.permute.xlu0 %263  ;;  %550 = vst.msk [vmem:[#allocation2 + $0x20] sm:$0xf] %vm4001_vm15, %v547_v12 }
 0x16a   : > { %267 = vst.msk [vmem:[#allocation2] sm:$0xf] %vm3956_vm14, %v264_v11  ;;  %vm3963_vm14 = vcmask 437536  }
 0x16c   : > { %v270_v13 = vpop.permute.xlu1 %269 }
 0x16d   : > { %273 = vst.msk [vmem:[#allocation2] sm:$0xf0] %vm3957_vm3, %v270_v13  ;;  %vm3962_vm3 = vcmask 433436  }
 0x170   : > { %v508_v15 = vpop.permute.xlu1 %507 }
 0x171   : > { %v335_v14 = vpop.permute.xlu0 %334  ;;  %510 = vst.msk [vmem:[#allocation2 + $0x8] sm:$0xf] %vm3958_vm11, %v508_v15  ;;  %vm3972_vm11 = vcmask 716336   ;;  %v1097_v15 = vld [vmem:[#allocation7 + $0x8] sm:$0xf] }
 0x172   : > { %338 = vst.msk [vmem:[#allocation2 + $0x18] sm:$0xf] %vm3964_vm4, %v335_v14 }
 0x175   : > { %v513_v16 = vpop.permute.xlu0 %512 }
 0x176   : > { %516 = vst.msk [vmem:[#allocation2 + $0x8] sm:$0xf0] %vm3959_vm13, %v513_v16  ;;  %vm3967_vm13 = vcmask 847536  }
 0x178   : > { %v576_v17 = vpop.permute.xlu1 %575 }
 0x179   : > { %579 = vst.msk [vmem:[#allocation2 + $0x20] sm:$0xf] %vm3960_vm12, %v576_v17  ;;  %vm3966_vm12 = vcmask 564636  }
 0x17c   : > { %v294_v19 = vpop.permute.xlu1 %293 }
 0x17d   : > { %v666_v18 = vpop.permute.xlu0 %665  ;;  %297 = vst.msk [vmem:[#allocation2] sm:$0xf] %vm3963_vm14, %v294_v19  ;;  %vm3979_vm14 = vcmask 863936   ;;  %v1271_v19 = vlaneseq }
 0x17e   : > { %671 = vst.msk [vmem:[#allocation2 + $0x28] sm:$0xf] %vm3961_vm10, %v666_v18  ;;  %vm3969_vm10 = vcmask 585136  }
 0x181   : > { %v300_v20 = vpop.permute.xlu0 %299 }
 0x182   : > { %303 = vst.msk [vmem:[#allocation2] sm:$0xf0] %vm3962_vm3, %v300_v20  ;;  %vm3968_vm3 = vcmask 240736   ;;  %v1272_v20 = vand.u32 127, %v1271_v19 }
 0x184   : > { %v365_v22 = vpop.permute.xlu1 %364 }
 0x185   : > { %v537_v21 = vpop.permute.xlu0 %536  ;;  %368 = vst.msk [vmem:[#allocation2 + $0x18] sm:$0xf] %vm3972_vm11, %v365_v22  ;;  %v1273_v22 = vadd.s32 128, %v1272_v20 }
 0x186   : > { %539 = vst.msk [vmem:[#allocation2 + $0x8] sm:$0xf] %vm3964_vm4, %v537_v21  ;;  %vm3970_vm4 = vcmask 581036   ;;  %v1274_v21 = vadd.s32 256, %v1272_v20 }
 0x188   : > { %v542_v24 = vpop.permute.xlu1 %541 }
 0x189   : > { %v605_v23 = vpop.permute.xlu0 %604  ;;  %545 = vst.msk [vmem:[#allocation2 + $0x8] sm:$0xf0] %vm3966_vm12, %v542_v24  ;;  %vm3973_vm12 = vcmask 995136  }
 0x18a   : > { %608 = vst.msk [vmem:[#allocation2 + $0x20] sm:$0xf] %vm3967_vm13, %v605_v23  ;;  %vm3977_vm13 = vcmask 1044432   ;;  %v3484_v23 = vmul.u32.u64.low 3817748708, %v1272_v20  ;;  %v3485_v24 = vmul.u32.u64.high 3817748708, %v1272_v20, %v3484_v23 }
 0x18d   : > { %v324_v25 = vpop.permute.xlu0 %323 }
 0x18e   : > { %327 = vst.msk [vmem:[#allocation2] sm:$0xf] %vm3969_vm10, %v324_v25  ;;  %vm3974_vm10 = vcmask 105476  }
 0x190   : > { %v697_v26 = vpop.permute.xlu1 %696 }
 0x191   : > { %700 = vst.msk [vmem:[#allocation2 + $0x28] sm:$0xf] %vm3968_vm3, %v697_v26  ;;  %vm3976_vm3 = vcmask 388336   ;;  %v3487_v25 = vmul.u32.u64.low 3817748708, %v1274_v21  ;;  %v3488_v26 = vmul.u32.u64.high 3817748708, %v1274_v21, %v3487_v25 }
 0x194   : > { %v330_v28 = vpop.permute.xlu1 %329 }
 0x195   : > { %v395_v27 = vpop.permute.xlu0 %394  ;;  %333 = vst.msk [vmem:[#allocation2] sm:$0xf0] %vm3970_vm4, %v330_v28  ;;  %vm3975_vm4 = vcmask 728636  }
 0x196   : > { %398 = vst.msk [vmem:[#allocation2 + $0x18] sm:$0xf] %vm3979_vm14, %v395_v27  ;;  %v3490_v27 = vmul.u32.u64.low 3817748708, %v1273_v22  ;;  %v3491_v28 = vmul.u32.u64.high 3817748708, %v1273_v22, %v3490_v27 }
 0x198   : > { %v566_v30 = vpop.permute.xlu1 %565 }
 0x199   : > { %v571_v29 = vpop.permute.xlu0 %570  ;;  %568 = vst.msk [vmem:[#allocation2 + $0x8] sm:$0xf] %vm3972_vm11, %v566_v30  ;;  %vm427_vm11 = vcmask 1011536   ;;  %v1281_v30 = vshrl.u32 %v3485_v24, 4 }
 0x19a   : > { %574 = vst.msk [vmem:[#allocation2 + $0x8] sm:$0xf0] %vm3971_vm8, %v571_v29  ;;  %vm3978_vm8 = vcmask 732736  }
 0x19c   : > { %v634_v32 = vpop.permute.xlu1 %633 }
 0x19d   : > { %v653_v31 = vpop.permute.xlu0 %652  ;;  %637 = vst.msk [vmem:[#allocation2 + $0x20] sm:$0xf] %vm3973_vm12, %v634_v32  ;;  %vm4002_vm12 = vcmask 1044448   ;;  %v1303_v32 = vshrl.u32 %v3488_v26, 4 }
 0x19e   : > { %656 = vst.msk [vmem:[#allocation2 + $0x10] sm:$0xf] %vm462_vm5, %v653_v31 }
 0x19f   : > { %669 = vst.msk [vmem:[#allocation2 + $0x20] sm:$0xf] %vm3977_vm13, %v666_v18  ;;  %vm3986_vm13 = vcmask 876236  }
 0x1a0   : > { %v659_v34 = vpop.permute.xlu1 %658 }
 0x1a1   : > { %v726_v33 = vpop.permute.xlu0 %725  ;;  %664 = vst.msk [vmem:[#allocation2 + $0x10] sm:$0xf0] %vm3974_vm10, %v659_v34  ;;  %vm3985_vm10 = vcmask 859836  }
 0x1a2   : > { %729 = vst.msk [vmem:[#allocation2 + $0x28] sm:$0xf] %vm3976_vm3, %v726_v33  ;;  %vm3982_vm3 = vcmask 253036   ;;  %v1292_v33 = vshrl.u32 %v3491_v28, 4 }
 0x1a4   : > { %v354_v36 = vpop.permute.xlu1 %353 }
 0x1a5   : > { %v360_v35 = vpop.permute.xlu0 %359  ;;  %357 = vst.msk [vmem:[#allocation2] sm:$0xf] %vm3978_vm8, %v354_v36  ;;  %vm4000_vm8 = vcmask 880336   ;;  %v1304_v36 = vmul.u32 18, %v1303_v32 }
 0x1a6   : > { %363 = vst.msk [vmem:[#allocation2] sm:$0xf0] %vm3975_vm4, %v360_v35  ;;  %vm3987_vm4 = vcmask 535936   ;;  %v764_v57 = vld [vmem:[#allocation2 + $0x20] sm:$0xf]  ;;  %v1282_v35 = vmul.u32 18, %v1281_v30 }
 0x1a8   : > { %v425_v38 = vpop.permute.xlu1 %424 }
 0x1a9   : > { %v595_v37 = vpop.permute.xlu0 %594  ;;  %428 = vst.msk [vmem:[#allocation2 + $0x18] sm:$0xf] %vm427_vm11, %v425_v38  ;;  %v1293_v38 = vmul.u32 18, %v1292_v33 }
 0x1aa   : > { %597 = vst.msk [vmem:[#allocation2 + $0x8] sm:$0xf] %vm3979_vm14, %v595_v37  ;;  %vm3984_vm14 = vcmask 1007436  }
 0x1ab   : > { %461 = vst.msk [vmem:[#allocation2 + $0x18] sm:$0xf] %vm4002_vm12, %v3348_v60 }
 0x1ac   : > { %v600_v40 = vpop.permute.xlu1 %599 }
 0x1ad   : > { %v687_v39 = vpop.permute.xlu0 %686  ;;  %603 = vst.msk [vmem:[#allocation2 + $0x8] sm:$0xf0] %vm3985_vm10, %v600_v40  ;;  %vm3999_vm10 = vcmask 1027936   ;;  %v1305_v40 = vsub.s32 %v1274_v21, %v1304_v36 }
 0x1ae   : > { %689 = vst.msk [vmem:[#allocation2 + $0x10] sm:$0xf] %vm3980_vm7, %v687_v39  ;;  %vm3988_vm7 = vcmask 1048540   ;;  %v1283_v39 = vsub.s32 %v1272_v20, %v1282_v35 }
 0x1b0   : > { %v692_v42 = vpop.permute.xlu1 %691 }
 0x1b1   : > { %v755_v41 = vpop.permute.xlu0 %754  ;;  %695 = vst.msk [vmem:[#allocation2 + $0x10] sm:$0xf0] %vm3982_vm3, %v692_v42  ;;  %vm3989_vm3 = vcmask 400636   ;;  %v1294_v42 = vsub.s32 %v1273_v22, %v1293_v38 }
 0x1b2   : > { %758 = vst.msk [vmem:[#allocation2 + $0x28] sm:$0xf] %vm3987_vm4, %v755_v41  ;;  %vm3993_vm4 = vcmask 1044464   ;;  %v763_v58 = vld [vmem:[#allocation2 + $0x18] sm:$0xf] }
 0x1b4   : > { %v384_v44 = vpop.permute.xlu1 %383 }
 0x1b5   : > { %v390_v43 = vpop.permute.xlu0 %389  ;;  %387 = vst.msk [vmem:[#allocation2] sm:$0xf] %vm4000_vm8, %v384_v44  ;;  %v1317_v44 = vadd.s32 18, %v1283_v39  ;;  %vm1312_vm8 = vcmp.lt.s32.totalorder %v1294_v42, 0 }
 0x1b6   : > { %393 = vst.msk [vmem:[#allocation2] sm:$0xf0] %vm3986_vm13, %v390_v43  ;;  %vm3991_vm13 = vcmask 1048556  }
 0x1b8   : > { %v624_v46 = vpop.permute.xlu1 %623 }
 0x1b9   : > { %v629_v45 = vpop.permute.xlu0 %628  ;;  %v765_v47 = vld [vmem:[#allocation2 + $0x28] sm:$0xf]  ;;  %626 = vst.msk [vmem:[#allocation2 + $0x8] sm:$0xf] %vm427_vm11, %v624_v46 }
 0x1ba   : > { %632 = vst.msk [vmem:[#allocation2 + $0x8] sm:$0xf0] %vm3984_vm14, %v629_v45  ;;  %784 = vrot.lane.b32.xlu0 %v765_v47, %s4006_s30  ;;  %vm3992_vm14 = vcmask 1023836  }
 0x1bb   : > { %662 = vst.msk [vmem:[#allocation2 + $0x8] sm:$0xf0] %vm3988_vm7, %v659_v34  ;;  %vm3996_vm7 = vmmov 0  }
 0x1bc   : > { %655 = vst.msk [vmem:[#allocation2 + $0x8] sm:$0xf] %vm4002_vm12, %v653_v31  ;;  %v716_v49 = vpop.permute.xlu1 %715  ;;  %2599 = vmatprep.mubr.msk.f32.mxu1 %vm3996_vm7, %v2988_v62 }
 0x1bd   : > { %v721_v48 = vpop.permute.xlu0 %720  ;;  %718 = vst.msk [vmem:[#allocation2 + $0x10] sm:$0xf] %vm4003_vm9, %v716_v49 }
 0x1be   : > { %724 = vst.msk [vmem:[#allocation2 + $0x10] sm:$0xf0] %vm3989_vm3, %v721_v48  ;;  %1108 = vrot.lane.b32.xlu0 %v765_v47, %s4004_s28  ;;  %vm3990_vm3 = vcmask 548236   ;;  %v1318_v48 = vadd.s32 18, %v1294_v42 }
 0x1c0   : > { %v414_v51 = vpop.permute.xlu1 %413 }
 0x1c1   : > { %v420_v50 = vpop.permute.xlu0 %419  ;;  %417 = vst.msk [vmem:[#allocation2] sm:$0xf] %vm3999_vm10, %v414_v51  ;;  %vm1309_vm10 = vcmp.ne.s32.totalorder %v1294_v42, 0 }
 0x1c2   : > { %423 = vst.msk [vmem:[#allocation2] sm:$0xf0] %vm3992_vm14, %v420_v50  ;;  %vm3995_vm14 = vcmask 900096   ;;  %vm3500_vm9 = vmand %vm1312_vm8, %vm1309_vm10 }
 0x1c3   : > { %v3423_v52 = vld [vmem:[#allocation2 + $0x8] sm:$0xff]  ;;  %454 = vst.msk [vmem:[#allocation2] sm:$0xf0] %vm3991_vm13, %v3368_v7  ;;  %vm3998_vm13 = vcmask 97280  }
 0x1c4   : > { %447 = vst.msk [vmem:[#allocation2] sm:$0xf] %vm3993_vm4, %v3362_v3  ;;  %776 = vrot.lane.b32.xlu0 %v3423_v52, %s4006_s30  ;;  %v745_v54 = vpop.permute.xlu1 %744  ;;  %vm3994_vm4 = vcmask 752640  }
 0x1c5   : > { %v750_v53 = vpop.permute.xlu0 %749  ;;  %747 = vst.msk [vmem:[#allocation2 + $0x10] sm:$0xf] %vm4001_vm15, %v745_v54 }
 0x1c6   : > { %753 = vst.msk [vmem:[#allocation2 + $0x10] sm:$0xf0] %vm3990_vm3, %v750_v53  ;;  %vm798_vm3 = vcmask 1043456  }
 0x1cb   : > { %v760_v55 = vld [vmem:[#allocation2] sm:$0xff] }
 0x1cc   : > { %774 = vrot.lane.b32.xlu0 %v760_v55, %s4006_s30 }
 0x1cd   : > { %v762_v56 = vld [vmem:[#allocation2 + $0x10] sm:$0xff] }
 0x1ce   : > { %778 = vrot.lane.b32.xlu1 %v762_v56, %s4006_s30 }
 0x1d0   : > { %1100 = vrot.lane.b32.xlu0 %v3423_v52, %s4004_s28 }
 0x1d2   : > { %782 = vrot.lane.b32.xlu1 %v764_v57, %s4006_s30 }
 0x1d4   : > { %1098 = vrot.lane.b32.xlu0 %v760_v55, %s4004_s28 }
 0x1d6   : > { %780 = vrot.lane.b32.xlu1 %v763_v58, %s4006_s30  ;;  %s4041_s30 = smov 111  }
 0x1da   : > { %1106 = vrot.lane.b32.xlu1 %v764_v57, %s4004_s28 }
 0x1de   : > { %1104 = vrot.lane.b32.xlu1 %v763_v58, %s4004_s28 }
 0x1e2   : > { %1102 = vrot.lane.b32.xlu1 %v762_v56, %s4004_s28  ;;  %s3017_s28 = smov 21  }
 0x22c   : > { %v785_v59 = vpop.permute.xlu0 %784 }
 0x22d   : > { %2596 = vmatpush3.msk.msra.mxu1 %vm798_vm3, %v785_v59 }
 0x22e   : > { %2597 = vmatprep.subr.mxu1 %v2988_v62 }
 0x230   : > { %v1109_v60 = vpop.permute.xlu0 %1108 }
 0x236   : > { %v777_v0 = vpop.permute.xlu0 %776 }
 0x23e   : > { %v775_v4 = vpop.permute.xlu0 %774 }
 0x23f   : > { %v787_v8 = vsel %vm3995_vm14, %v775_v4, %v777_v0 }
 0x240   : > { %v779_v63 = vpop.permute.xlu1 %778 }
 0x241   : > { %2598 = vmatpush3.msra.mxu1 %v779_v63  ;;  %v788_v7 = vsel %vm3995_vm14, %v777_v0, %v779_v63 }
 0x242   : > { %2602 = vmatprep.subr.mxu1 %v2988_v62  ;;  %2600 = vmatmul.mubr.msk.f32.vlgmr.msra.gmra.mxu1 %vm3998_vm13, %v767_v61  ;;  %v1101_v10 = vpop.permute.xlu0 %1100 }
 0x243   : > { %2603 = vmatpush3.msk.msra.mxu1 %vm798_vm3, %v765_v47  ;;  %2606 = vmatprep.mubr.msk.f32.mxu1 %vm3996_vm7, %v2988_v62  ;;  %v1319_v47 = vadd.s32 18, %v1305_v40 }
 0x244   : > { %2604 = vmatprep.subr.mxu1 %v2988_v62  ;;  %v783_v1 = vpop.permute.xlu1 %782 }
 0x245   : > { %2605 = vmatpush3.msra.mxu1 %v762_v56  ;;  %v790_v3 = vsel %vm3995_vm14, %v783_v1, %v785_v59  ;;  %v1321_v56 = vsel %vm3500_vm9, %v1318_v48, %v1294_v42  ;;  %vm1338_vm9 = vcmask 257024  }
 0x246   : > { %2543 = vmatprep.subr.msk.mxu0 %vm798_vm3, %v790_v3  ;;  %2609 = vmatprep.subr.mxu1 %v2988_v62  ;;  %v1099_v14 = vpop.permute.xlu0 %1098  ;;  %vm3516_vm10 = vcmp.lt.s32.totalorder %v1321_v56, 16 }
 0x247   : > { %2607 = vmatmul.mubr.msk.f32.vlgmr.msra.gmra.mxu1 %vm3998_vm13, %v759_v2  ;;  %v1111_v18 = vsel %vm3994_vm4, %v1099_v14, %v1101_v10 }
 0x248   : > { %2610 = vmatpush3.msk.msra.mxu1 %vm798_vm3, %v1109_v60  ;;  %v781_v5 = vpop.permute.xlu1 %780  ;;  %2613 = vmatprep.mubr.msk.f32.mxu1 %vm3996_vm7, %v2988_v62 }
 0x249   : > { %v789_v6 = vsel %vm3995_vm14, %v781_v5, %v783_v1  ;;  %2611 = vmatprep.subr.mxu1 %v2988_v62  ;;  %vm1311_vm14 = vcmp.lt.s32.totalorder %v1283_v39, 0 }
 0x24a   : > { %2544 = vmatpush1.msk.msra.mxu0 %vm798_vm3, %v789_v6 }
 0x24b   : > { %835 = vmatprep.subr.mxu0 %v788_v7 }
 0x24c   : > { %836 = vmatpush1.msra.mxu0 %v787_v8  ;;  %v1107_v9 = vpop.permute.xlu1 %1106 }
 0x24d   : > { %2545 = vmatmul.mubr.msk.f32.vlgmr.msra.gmra.mxu0 %vm3998_vm13, %v767_v61  ;;  %2548 = vmatprep.subr.msk.mxu0 %vm798_vm3, %v764_v57  ;;  %v1114_v12 = vsel %vm3994_vm4, %v1107_v9, %v1109_v60 }
 0x24e   : > { %2549 = vmatpush1.msk.msra.mxu0 %vm798_vm3, %v763_v58  ;;  %1019 = vmatprep.mubr.f32.mxu0 %v2988_v62 }
 0x24f   : > { %985 = vmatprep.subr.mxu0 %v3423_v52 }
 0x250   : > { %986 = vmatpush1.msra.mxu0 %v760_v55  ;;  %v1105_v11 = vpop.permute.xlu1 %1104 }
 0x251   : > { %v1113_v13 = vsel %vm3994_vm4, %v1105_v11, %v1107_v9  ;;  %2550 = vmatmul.mubr.msk.f32.vlgmr.msra.gmra.mxu0 %vm3998_vm13, %v759_v2  ;;  %2553 = vmatprep.subr.msk.mxu0 %vm798_vm3, %v1114_v12 }
 0x252   : > { %2554 = vmatpush1.msk.msra.mxu0 %vm798_vm3, %v1113_v13  ;;  %1191 = vmatprep.mubr.f32.mxu0 %v2988_v62 }
 0x254   : > { %v1103_v16 = vpop.permute.xlu1 %1102 }
 0x255   : > { %2612 = vmatpush3.msra.mxu1 %v1103_v16  ;;  %v1112_v17 = vsel %vm3994_vm4, %v1101_v10, %v1103_v16  ;;  %vm1308_vm4 = vcmp.ne.s32.totalorder %v1283_v39, 0 }
 0x256   : > { %1157 = vmatprep.subr.mxu0 %v1112_v17  ;;  %2614 = vmatmul.mubr.msk.f32.vlgmr.msra.gmra.mxu1 %vm3998_vm13, %v1097_v15  ;;  %vm1314_vm15 = vmand %vm1311_vm14, %vm1308_vm4  ;;  %vm4090_vm14 = vcmask 437536   ;;  %vm4092_vm4 = vcmask 716336  }
 0x257   : > { %1158 = vmatpush1.msra.mxu0 %v1111_v18  ;;  %2616 = vmatprep.subr.mxu1 %v2988_v62  ;;  %v1320_v51 = vsel %vm1314_vm15, %v1317_v44, %v1283_v39  ;;  %vm4091_vm15 = vcmask 93184  }
 0x258   : > { %2555 = vmatmul.mubr.msk.f32.vlgmr.msra.gmra.mxu0 %vm3998_vm13, %v1097_v15  ;;  %2620 = vmatprep.mubr.msk.f32.mxu1 %vm3996_vm7, %v2988_v62  ;;  %vm1310_vm7 = vcmp.ne.s32.totalorder %v1305_v40, 0  ;;  %vm1313_vm13 = vcmp.lt.s32.totalorder %v1305_v40, 0 }
 0x259   : > { %1987 = vmatprep.mubr.f32.mxu0 %v2988_v62  ;;  %vm3496_vm12 = vmand %vm1313_vm13, %vm1310_vm7  ;;  %vm3508_vm7 = vcmp.lt.s32.totalorder %v1320_v51, 16  ;;  %vm4089_vm13 = vcmask 568736  }
 0x25a   : > { %v1322_v55 = vsel %vm3496_vm12, %v1319_v47, %v1305_v40  ;;  %vm1799_vm12 = vcmask 39936  }
 0x25b   : > { %vm3512_vm8 = vcmp.lt.s32.totalorder %v1322_v55, 16 }
 0x302   : > { %v942_v29 = vpop.f32.mrf.mxu1 }
 0x304   : > { %v2601_v31 = vpop.f32.mrf.mxu1 }
 0x307   : > { %v1092_v34 = vpop.f32.mrf.mxu1 }
 0x308   : > { %v1093_v50 = vadd.f32 %v1092_v34, %v942_v29 }
 0x309   : > { %v2608_v37 = vpop.f32.mrf.mxu1 }
 0x30d   : > { %v871_v41 = vpop.f32.mrf.mxu0 }
 0x30f   : > { %v873_v43 = vpop.f32.mrf.mxu0 }
 0x311   : > { %v1021_v45 = vpop.f32.mrf.mxu0 }
 0x312   : > { %v1022_v54 = vadd.f32 %v1021_v45, %v871_v41 }
 0x313   : > { %v1023_v52 = vpop.f32.mrf.mxu0 }
 0x314   : > { %v1024_v60 = vadd.f32 %v1023_v52, %v873_v43 }
 0x316   : > { %v1264_v53 = vpop.f32.mrf.mxu1 }
 0x317   : > { %v1270_v61 = vadd.f32 %v1264_v53, %v1093_v50 }
 0x318   : > { %v1193_v57 = vpop.f32.mrf.mxu0  ;;  %v2615_v59 = vpop.f32.mrf.mxu1 }
 0x319   : > { %v1268_v63 = vadd.f32 %v1193_v57, %v1022_v54  ;;  %v1334_v5 = vsel %vm3512_vm8, %v1270_v61, 0.0 }
 0x31a   : > { %v1195_v1 = vpop.f32.mrf.mxu0  ;;  %v1339_v10 = vsel %vm1338_vm9, %v1334_v5, 0.0 }
 0x31b   : > { %v1332_v3 = vsel %vm3508_vm7, %v1268_v63, 0.0  ;;  %v1269_v4 = vadd.f32 %v1195_v1, %v1024_v60 }
 0x31c   : > { %v1335_v7 = vsel %vm798_vm3, %v1332_v3, 0.0 }
 0x31d   : > { %v1333_v6 = vsel %vm3516_vm10, %v1269_v4, 0.0 }
 0x31e   : > { %v1336_v8 = vsel %vm798_vm3, %v1333_v6, 0.0 }
 0x31f   : > { %v1337_v9 = vadd.f32 %v1336_v8, %v1335_v7 }
 0x321   : > { %v1340_v11 = vadd.f32 %v1339_v10, %v1337_v9 }
 0x323   : > { %1341 = vadd.xlane.f32.xlu1 %v1340_v11 }
 0x3ac   : > { %v1342_v12 = vpop.xlane.xlu1 %1341 }
 0x3ad   : > { %v1343_v13 = vmul.f32 0.00390625, %v1342_v12 }
 0x3af   : > { %v1344_v14 = vsub.f32 %v1268_v63, %v1343_v13  ;;  %v1345_v15 = vsub.f32 %v1269_v4, %v1343_v13  ;;  %v1346_v16 = vsub.f32 %v1270_v61, %v1343_v13 }
 0x3b1   : > { %v1347_v17 = vmul.f32 %v1344_v14, %v1344_v14  ;;  %v1348_v18 = vmul.f32 %v1345_v15, %v1345_v15  ;;  %v1349_v19 = vmul.f32 %v1346_v16, %v1346_v16 }
 0x3b3   : > { %v1350_v20 = vsel %vm3508_vm7, %v1347_v17, 0.0  ;;  %v1351_v21 = vsel %vm3516_vm10, %v1348_v18, 0.0  ;;  %v1352_v22 = vsel %vm3512_vm8, %v1349_v19, 0.0 }
 0x3b4   : > { %v1353_v23 = vsel %vm798_vm3, %v1350_v20, 0.0  ;;  %v1354_v24 = vsel %vm798_vm3, %v1351_v21, 0.0  ;;  %v1356_v26 = vsel %vm1338_vm9, %v1352_v22, 0.0 }
 0x3b5   : > { %v1355_v25 = vadd.f32 %v1354_v24, %v1353_v23 }
 0x3b7   : > { %v1357_v27 = vadd.f32 %v1356_v26, %v1355_v25 }
 0x3b9   : > { %1358 = vadd.xlane.f32.xlu0 %v1357_v27 }
 0x442   : > { %v1359_v28 = vpop.xlane.xlu0 %1358 }
 0x443   : > { %v1360_v29 = vmul.f32 0.00390625, %v1359_v28 }
 0x445   : > { %v1361_v30 = vadd.f32 1e-05, %v1360_v29 }
 0x447   : > { %2796 = vrsqrt.f32 %v1361_v30 }
 0x454   : > { %v2797_v31 = vpop.eup %2796 }
 0x455   : > { %v1363_v32 = vmul.f32 %v2797_v31, %v1344_v14  ;;  %v1364_v33 = vmul.f32 %v2797_v31, %v1345_v15  ;;  %v1365_v34 = vmul.f32 %v2797_v31, %v1346_v16 }
 0x457   : > { %v1366_v35 = vmax.f32 %v1363_v32, 0.0  ;;  %v1367_v36 = vmax.f32 %v1364_v33, 0.0  ;;  %v1368_v37 = vmax.f32 %v1365_v34, 0.0 }
 0x459   : > { %1369 = vst [vmem:[#allocation2] sm:$0xf] %v1366_v35  ;;  %1370 = vst [vmem:[#allocation2 + $0x8] sm:$0xf] %v1367_v36 }
 0x45a   : > { %1371 = vst.msk [vmem:[#allocation2 + $0x10] sm:$0xf] %vm1338_vm9, %v1368_v37 }
 0x460   : > { %v1560_v38 = vld [vmem:[#allocation2] sm:$0xf]  ;;  %v1591_v40 = vld [vmem:[#allocation2 + $0x8] sm:$0xf] }
 0x461   : > { %1565 = vrot.lane.b32.xlu1 %v1560_v38, %s3017_s28  ;;  %1562 = vrot.lane.b32.xlu0 %v1560_v38, %s2965_s21  ;;  %v1590_v39 = vld [vmem:[#allocation2] sm:$0xf]  ;;  %s4043_s21 = smov 113   ;;  %v1623_v43 = vld [vmem:[#allocation2 + $0x8] sm:$0xf] }
 0x462   : > { %v1374_v41 = vld [vmem:[#allocation2] sm:$0xf]  ;;  %v1650_v45 = vld [vmem:[#allocation2 + $0x8] sm:$0xf]  ;;  %v1789_v49 = vld [vmem:[#allocation2 + $0x10] sm:$0xf] }
 0x463   : > { %v1398_v42 = vld [vmem:[#allocation2] sm:$0xf]  ;;  %v1677_v47 = vld [vmem:[#allocation2 + $0x8] sm:$0xf]  ;;  %v1821_v55 = vld [vmem:[#allocation2 + $0x10] sm:$0xf] }
 0x464   : > { %v1425_v44 = vld [vmem:[#allocation2] sm:$0xf]  ;;  %v1758_v48 = vld [vmem:[#allocation2 + $0x8] sm:$0xf]  ;;  %v1849_v57 = vld [vmem:[#allocation2 + $0x10] sm:$0xf] }
 0x465   : > { %1597 = vrot.lane.b32.xlu1 %v1590_v39, %s2966_s17  ;;  %1599 = vrot.lane.b32.xlu0 %v1591_v40, %s2966_s17  ;;  %v1452_v46 = vld [vmem:[#allocation2] sm:$0xf]  ;;  %v1788_v50 = vld [vmem:[#allocation2 + $0x8] sm:$0xf] }
 0x466   : > { %v1479_v51 = vld [vmem:[#allocation2] sm:$0xf]  ;;  %v1704_v52 = vld [vmem:[#allocation2 + $0x8] sm:$0xf] }
 0x467   : > { %v1506_v53 = vld [vmem:[#allocation2] sm:$0xf]  ;;  %v1731_v54 = vld [vmem:[#allocation2 + $0x8] sm:$0xf] }
 0x468   : > { %v1848_v56 = vld [vmem:[#allocation2 + $0x8] sm:$0xf]  ;;  %v1533_v59 = vld [vmem:[#allocation2] sm:$0xf] }
 0x469   : > { %1379 = vrot.lane.b32.xlu0 %v1374_v41, %s4041_s30  ;;  %1376 = vrot.lane.b32.xlu1 %v1374_v41, %s3018_s20 }
 0x46d   : > { %1593 = vrot.lane.b32.xlu0 %v1590_v39, %s4042_s23  ;;  %1568 = vrot.lane.b32.xlu1 %v1560_v38, %s3019_s18 }
 0x471   : > { %1400 = vrot.lane.b32.xlu0 %v1398_v42, %s4013_s8  ;;  %1382 = vrot.lane.b32.xlu1 %v1374_v41, %s4043_s21  ;;  %s4045_s8 = smov 95  }
 0x475   : > { %1604 = vrot.lane.b32.xlu0 %v1591_v40, %s3020_s5  ;;  %1403 = vrot.lane.b32.xlu1 %v1398_v42, %s4042_s23  ;;  %s3022_s23 = smov 91  }
 0x479   : > { %1628 = vrot.lane.b32.xlu0 %v1623_v43, %s4043_s21  ;;  %1625 = vrot.lane.b32.xlu1 %v1623_v43, %s4041_s30 }
 0x47d   : > { %1427 = vrot.lane.b32.xlu0 %v1425_v44, %s3018_s20  ;;  %1406 = vrot.lane.b32.xlu1 %v1398_v42, %s2966_s17  ;;  %s3023_s20 = smov 77  }
 0x481   : > { %1631 = vrot.lane.b32.xlu0 %v1623_v43, %s4044_s25  ;;  %1430 = vrot.lane.b32.xlu1 %v1425_v44, %s4041_s30  ;;  %s3025_s30 = smov 73  }
 0x485   : > { %1655 = vrot.lane.b32.xlu0 %v1650_v45, %s4045_s8  ;;  %1652 = vrot.lane.b32.xlu1 %v1650_v45, %s3021_s29 }
 0x489   : > { %1454 = vrot.lane.b32.xlu0 %v1452_v46, %s3022_s23  ;;  %1433 = vrot.lane.b32.xlu1 %v1425_v44, %s4043_s21  ;;  %s3030_s23 = smov 61  }
 0x48d   : > { %1658 = vrot.lane.b32.xlu0 %v1650_v45, %s4046_s22  ;;  %1457 = vrot.lane.b32.xlu1 %v1452_v46, %s3021_s29  ;;  %s3026_s29 = smov 59   ;;  %s3029_s22 = smov 55  }
 0x491   : > { %1682 = vrot.lane.b32.xlu0 %v1677_v47, %s3023_s20  ;;  %1679 = vrot.lane.b32.xlu1 %v1677_v47, %s3024_s6 }
 0x495   : > { %1763 = vrot.lane.b32.xlu0 %v1758_v48, %s3019_s18  ;;  %1760 = vrot.lane.b32.xlu1 %v1758_v48, %s3017_s28  ;;  %s3027_s18 = smov 57   ;;  %s3028_s28 = smov 25  }
 0x499   : > { %1797 = vrot.lane.b32.xlu0 %v1789_v49, %s3020_s5  ;;  %1795 = vrot.lane.b32.xlu1 %v1788_v50, %s3020_s5 }
 0x49d   : > { %1481 = vrot.lane.b32.xlu0 %v1479_v51, %s3025_s30  ;;  %1460 = vrot.lane.b32.xlu1 %v1452_v46, %s4045_s8  ;;  %s3031_s8 = smov 41   ;;  %s3035_s30 = smov 117  }
 0x4a1   : > { %1685 = vrot.lane.b32.xlu0 %v1677_v47, %s2972_s9  ;;  %1484 = vrot.lane.b32.xlu1 %v1479_v51, %s3024_s6  ;;  %s3032_s9 = smov 39   ;;  %s3033_s6 = smov 7  }
 0x4a5   : > { %1709 = vrot.lane.b32.xlu0 %v1704_v52, %s3026_s29  ;;  %1706 = vrot.lane.b32.xlu1 %v1704_v52, %s3027_s18 }
 0x4a9   : > { %1791 = vrot.lane.b32.xlu0 %v1788_v50, %s2966_s17  ;;  %1766 = vrot.lane.b32.xlu1 %v1758_v48, %s3028_s28  ;;  %s4053_s28 = smov 36  }
 0x4ad   : > { %1508 = vrot.lane.b32.xlu0 %v1506_v53, %s3029_s22  ;;  %1487 = vrot.lane.b32.xlu1 %v1479_v51, %s3023_s20  ;;  %s3034_s20 = smov 37   ;;  %s4054_s22 = smov 122  }
 0x4b1   : > { %1712 = vrot.lane.b32.xlu0 %v1704_v52, %s3030_s23  ;;  %1511 = vrot.lane.b32.xlu1 %v1506_v53, %s3027_s18  ;;  %s3036_s18 = smov 43   ;;  %s4055_s23 = smov 70  }
 0x4b5   : > { %1736 = vrot.lane.b32.xlu0 %v1731_v54, %s3031_s8  ;;  %1733 = vrot.lane.b32.xlu1 %v1731_v54, %s3032_s9 }
 0x4b9   : > { %1823 = vrot.lane.b32.xlu0 %v1821_v55, %s4043_s21  ;;  %1802 = vrot.lane.b32.xlu1 %v1789_v49, %s3033_s6  ;;  %s4050_s21 = smov 18  }
 0x4bd   : > { %1855 = vrot.lane.b32.xlu0 %v1848_v56, %s3020_s5  ;;  %1826 = vrot.lane.b32.xlu1 %v1821_v55, %s4044_s25  ;;  %s4049_s25 = smov 50  }
 0x4c1   : > { %1514 = vrot.lane.b32.xlu0 %v1506_v53, %s3026_s29  ;;  %1857 = vrot.lane.b32.xlu1 %v1849_v57, %s3020_s5  ;;  %s4047_s5 = smov 126   ;;  %s4051_s29 = smov 52  }
 0x4c5   : > { %1538 = vrot.lane.b32.xlu0 %v1533_v59, %s3032_s9  ;;  %1535 = vrot.lane.b32.xlu1 %v1533_v59, %s3034_s20  ;;  %s4057_s9 = smov 54   ;;  %s4059_s20 = smov 30  }
 0x4c9   : > { %1829 = vrot.lane.b32.xlu0 %v1821_v55, %s3035_s30  ;;  %1739 = vrot.lane.b32.xlu1 %v1731_v54, %s3036_s18  ;;  %s4060_s30 = smov 104   ;;  %s4062_s18 = smov 14  }
 0x4cd   : > { %1541 = vrot.lane.b32.xlu0 %v1533_v59, %s3031_s8  ;;  %1851 = vrot.lane.b32.xlu1 %v1848_v56, %s2966_s17  ;;  %s4048_s17 = smov 16   ;;  %s4056_s8 = smov 86  }
 0x4d1   : > { %1861 = vrot.lane.b32.xlu1 %v1849_v57, %s3033_s6  ;;  %s4058_s6 = smov 88  }
 0x4d3   : > { %v1566_v60 = vpop.permute.xlu1 %1565  ;;  %v1563_v61 = vpop.permute.xlu0 %1562 }
 0x4d4   : > { %v1571_v5 = vsel %vm231_vm0, %v1563_v61, %v1566_v60 }
 0x4d7   : > { %v3570_v63 = vpop.permute.xlu1 %1597  ;;  %v3572_v1 = vpop.permute.xlu0 %1599 }
 0x4db   : > { %v1380_v3 = vpop.permute.xlu0 %1379  ;;  %v1377_v4 = vpop.permute.xlu1 %1376 }
 0x4dc   : > { %v1385_v9 = vsel %vm231_vm0, %v1377_v4, %v1380_v3 }
 0x4df   : > { %v3575_v6 = vpop.permute.xlu0 %1593  ;;  %v1569_v7 = vpop.permute.xlu1 %1568 }
 0x4e0   : > { %v3578_v8 = vsel %vm233_vm1, %v1571_v5, %v1569_v7 }
 0x4e1   : > { %1585 = vrot.lane.b32.xlu0 %v3578_v8, %s2979_s4 }
 0x4e3   : > { %v1401_v10 = vpop.permute.xlu0 %1400  ;;  %v1383_v11 = vpop.permute.xlu1 %1382 }
 0x4e4   : > { %v3584_v12 = vsel %vm233_vm1, %v1385_v9, %v1383_v11 }
 0x4e5   : > { %1387 = vst.msk [vmem:[#allocation3] sm:$0xf] %vm235_vm2, %v3584_v12  ;;  %1574 = vrot.lane.b32.xlu0 %v3578_v8, %s4047_s5  ;;  %1394 = vrot.lane.b32.xlu1 %v3584_v12, %s4047_s5  ;;  %vm1601_vm2 = vcmask 23552   ;;  %s4063_s5 = smov 106  }
 0x4e7   : > { %v3592_v13 = vpop.permute.xlu0 %1604  ;;  %v1404_v14 = vpop.permute.xlu1 %1403 }
 0x4e8   : > { %v1409_v17 = vsel %vm231_vm0, %v1401_v10, %v1404_v14 }
 0x4eb   : > { %v1629_v15 = vpop.permute.xlu0 %1628  ;;  %v1626_v16 = vpop.permute.xlu1 %1625 }
 0x4ec   : > { %v1634_v21 = vsel %vm231_vm0, %v1626_v16, %v1629_v15 }
 0x4ef   : > { %v1428_v18 = vpop.permute.xlu0 %1427  ;;  %v1407_v19 = vpop.permute.xlu1 %1406 }
 0x4f0   : > { %v3596_v20 = vsel %vm233_vm1, %v1409_v17, %v1407_v19 }
 0x4f1   : > { %1421 = vrot.lane.b32.xlu1 %v3596_v20, %s4048_s17 }
 0x4f3   : > { %v1632_v22 = vpop.permute.xlu0 %1631  ;;  %v1431_v23 = vpop.permute.xlu1 %1430 }
 0x4f4   : > { %v3602_v24 = vsel %vm233_vm1, %v1634_v21, %v1632_v22  ;;  %v1436_v27 = vsel %vm231_vm0, %v1428_v18, %v1431_v23 }
 0x4f5   : > { %1646 = vrot.lane.b32.xlu0 %v3602_v24, %s2983_s27 }
 0x4f7   : > { %v1656_v25 = vpop.permute.xlu0 %1655  ;;  %v1653_v26 = vpop.permute.xlu1 %1652 }
 0x4f8   : > { %v1661_v31 = vsel %vm231_vm0, %v1653_v26, %v1656_v25 }
 0x4fb   : > { %v1455_v28 = vpop.permute.xlu0 %1454  ;;  %v1434_v29 = vpop.permute.xlu1 %1433 }
 0x4fc   : > { %v3608_v30 = vsel %vm233_vm1, %v1436_v27, %v1434_v29 }
 0x4fd   : > { %1448 = vrot.lane.b32.xlu0 %v3608_v30, %s2985_s26 }
 0x4ff   : > { %v1659_v32 = vpop.permute.xlu0 %1658  ;;  %v1458_v33 = vpop.permute.xlu1 %1457 }
 0x500   : > { %v3614_v34 = vsel %vm233_vm1, %v1661_v31, %v1659_v32  ;;  %v1463_v41 = vsel %vm231_vm0, %v1455_v28, %v1458_v33  ;;  %v1602_v31 = vsel %vm1601_vm2, %v3570_v63, %v3572_v1  ;;  %vm4093_vm2 = vcmask 585136  }
 0x501   : > { %1673 = vrot.lane.b32.xlu1 %v3614_v34, %s4049_s25  ;;  %1412 = vrot.lane.b32.xlu0 %v3596_v20, %s4050_s21  ;;  %v1607_v32 = vsel %vm231_vm0, %v3575_v6, %v1602_v31  ;;  %s4064_s21 = smov 90  }
 0x503   : > { %v1683_v35 = vpop.permute.xlu0 %1682  ;;  %v1680_v36 = vpop.permute.xlu1 %1679 }
 0x504   : > { %v1688_v45 = vsel %vm231_vm0, %v1680_v36, %v1683_v35  ;;  %v1608_v36 = vsel %vm233_vm1, %v1607_v32, %v3592_v13 }
 0x505   : > { %1637 = vrot.lane.b32.xlu1 %v3602_v24, %s2985_s26  ;;  %s4052_s26 = smov 68  }
 0x507   : > { %v1764_v37 = vpop.permute.xlu0 %1763  ;;  %v1761_v38 = vpop.permute.xlu1 %1760 }
 0x508   : > { %v1769_v51 = vsel %vm231_vm0, %v1761_v38, %v1764_v37 }
 0x50b   : > { %v3622_v39 = vpop.permute.xlu0 %1797  ;;  %v3624_v40 = vpop.permute.xlu1 %1795 }
 0x50c   : > { %v1800_v38 = vsel %vm1799_vm12, %v3624_v40, %v3622_v39  ;;  %v1641_v39 = vrot.slane %v3602_v24, 4  ;;  %v1443_v40 = vrot.slane %v3608_v30, 4 }
 0x50f   : > { %v1482_v42 = vpop.permute.xlu0 %1481  ;;  %v1461_v43 = vpop.permute.xlu1 %1460 }
 0x510   : > { %v3628_v44 = vsel %vm233_vm1, %v1463_v41, %v1461_v43 }
 0x511   : > { %1475 = vrot.lane.b32.xlu0 %v3628_v44, %s4051_s29 }
 0x513   : > { %v1686_v46 = vpop.permute.xlu0 %1685  ;;  %v1485_v47 = vpop.permute.xlu1 %1484 }
 0x514   : > { %v3634_v48 = vsel %vm233_vm1, %v1688_v45, %v1686_v46  ;;  %v1490_v55 = vsel %vm231_vm0, %v1482_v42, %v1485_v47  ;;  %v1579_v47 = vrot.slane %v3578_v8, 4  ;;  %v1614_v8 = vrot.slane %v1608_v36, 4 }
 0x515   : > { %1700 = vrot.lane.b32.xlu1 %v3634_v48, %s4052_s26  ;;  %s4066_s26 = smov 33   ;;  %v1695_v45 = vrot.slane %v3634_v48, 4 }
 0x517   : > { %v1710_v49 = vpop.permute.xlu0 %1709  ;;  %v1707_v50 = vpop.permute.xlu1 %1706 }
 0x518   : > { %v1715_v60 = vsel %vm231_vm0, %v1707_v50, %v1710_v49  ;;  %v1389_v49 = vrot.slane %v3584_v12, 4  ;;  %v1470_v12 = vrot.slane %v3628_v44, 4 }
 0x519   : > { %1439 = vrot.lane.b32.xlu1 %v3608_v30, %s4053_s28  ;;  %s4067_s28 = smov 108  }
 0x51b   : > { %v1792_v52 = vpop.permute.xlu0 %1791  ;;  %v1767_v53 = vpop.permute.xlu1 %1766 }
 0x51c   : > { %v3642_v54 = vsel %vm233_vm1, %v1769_v51, %v1767_v53  ;;  %v1805_v63 = vsel %vm231_vm0, %v1792_v52, %v1800_v38  ;;  %v1416_v52 = vrot.slane %v3596_v20, 4 }
 0x51d   : > { %1783 = vrot.lane.b32.xlu0 %v3642_v54, %s4054_s22  ;;  %s4068_s22 = smov 35   ;;  %v1777_v20 = vrot.slane %v3642_v54, 4 }
 0x51f   : > { %v1509_v56 = vpop.permute.xlu0 %1508  ;;  %v1488_v57 = vpop.permute.xlu1 %1487 }
 0x520   : > { %v3648_v59 = vsel %vm233_vm1, %v1490_v55, %v1488_v57  ;;  %v1668_v55 = vrot.slane %v3614_v34, 4 }
 0x521   : > { %1664 = vrot.lane.b32.xlu0 %v3614_v34, %s4051_s29  ;;  %1502 = vrot.lane.b32.xlu1 %v3648_v59, %s4055_s23  ;;  %s4065_s29 = smov 48   ;;  %v1497_v30 = vrot.slane %v3648_v59, 4 }
 0x523   : > { %v1713_v61 = vpop.permute.xlu0 %1712  ;;  %v1512_v3 = vpop.permute.xlu1 %1511 }
 0x524   : > { %v3656_v4 = vsel %vm233_vm1, %v1715_v60, %v1713_v61  ;;  %v1517_v15 = vsel %vm231_vm0, %v1509_v56, %v1512_v3 }
 0x525   : > { %1727 = vrot.lane.b32.xlu0 %v3656_v4, %s4056_s8  ;;  %1691 = vrot.lane.b32.xlu1 %v3634_v48, %s4055_s23  ;;  %s4070_s23 = smov 12   ;;  %s4071_s8 = smov 71   ;;  %v1722_v34 = vrot.slane %v3656_v4, 4 }
 0x527   : > { %v1737_v5 = vpop.permute.xlu0 %1736  ;;  %v1734_v7 = vpop.permute.xlu1 %1733 }
 0x528   : > { %v1742_v22 = vsel %vm231_vm0, %v1734_v7, %v1737_v5 }
 0x529   : > { %1466 = vrot.lane.b32.xlu0 %v3628_v44, %s4057_s9  ;;  %s4072_s9 = smov 125  }
 0x52b   : > { %v1824_v9 = vpop.permute.xlu0 %1823  ;;  %v1803_v10 = vpop.permute.xlu1 %1802 }
 0x52c   : > { %v1806_v1 = vsel %vm233_vm1, %v1805_v63, %v1803_v10 }
 0x52d   : > { %v1812_v44 = vrot.slane %v1806_v1, 4 }
 0x52f   : > { %v1856_v11 = vpop.permute.xlu0 %1855  ;;  %v1827_v14 = vpop.permute.xlu1 %1826 }
 0x530   : > { %v1832_v23 = vsel %vm231_vm0, %v1824_v9, %v1827_v14 }
 0x533   : > { %v1515_v16 = vpop.permute.xlu0 %1514  ;;  %v1858_v17 = vpop.permute.xlu1 %1857 }
 0x534   : > { %v1518_v18 = vsel %vm233_vm1, %v1517_v15, %v1515_v16  ;;  %v1859_v41 = vsel %vm1799_vm12, %v1856_v11, %v1858_v17  ;;  %vm4094_vm12 = vcmask 863936  }
 0x535   : > { %1529 = vrot.lane.b32.xlu0 %v1518_v18, %s4058_s6  ;;  %v1524_v48 = vrot.slane %v1518_v18, 4 }
 0x537   : > { %v1539_v19 = vpop.permute.xlu0 %1538  ;;  %v1536_v21 = vpop.permute.xlu1 %1535 }
 0x538   : > { %v1544_v33 = vsel %vm231_vm0, %v1536_v21, %v1539_v19 }
 0x539   : > { %1772 = vrot.lane.b32.xlu0 %v3642_v54, %s2979_s4  ;;  %s4061_s4 = smov 72  }
 0x53b   : > { %v1830_v25 = vpop.permute.xlu0 %1829  ;;  %v1740_v26 = vpop.permute.xlu1 %1739 }
 0x53c   : > { %v1833_v27 = vsel %vm233_vm1, %v1832_v23, %v1830_v25  ;;  %v1743_v28 = vsel %vm233_vm1, %v1742_v22, %v1740_v26 }
 0x53d   : > { %1844 = vrot.lane.b32.xlu0 %v1833_v27, %s4059_s20  ;;  %1754 = vrot.lane.b32.xlu1 %v1743_v28, %s4060_s30  ;;  %v1749_v50 = vrot.slane %v1743_v28, 4  ;;  %s4076_s20 = smov 105   ;;  %v1839_v53 = vrot.slane %v1833_v27, 4  ;;  %s4077_s30 = smov 17  }
 0x53f   : > { %v1542_v29 = vpop.permute.xlu0 %1541  ;;  %v1852_v35 = vpop.permute.xlu1 %1851 }
 0x540   : > { %v1545_v37 = vsel %vm233_vm1, %v1544_v33, %v1542_v29  ;;  %v1864_v13 = vsel %vm231_vm0, %v1852_v35, %v1859_v41  ;;  %vm4074_vm0 = vcmask 273536  }
 0x541   : > { %1718 = vrot.lane.b32.xlu0 %v3656_v4, %s4058_s6  ;;  %1493 = vrot.lane.b32.xlu1 %v3648_v59, %s4061_s4  ;;  %s4073_s6 = smov 89   ;;  %s4078_s4 = smov 31   ;;  %v1551_v57 = vrot.slane %v1545_v37, 4 }
 0x543   : > { %v1862_v6 = vpop.permute.xlu1 %1861 }
 0x544   : > { %v1865_v42 = vsel %vm233_vm1, %v1864_v13, %v1862_v6  ;;  %vm4081_vm1 = vcmask 421136  }
 0x545   : > { %1619 = vrot.lane.b32.xlu0 %v1608_v36, %s4062_s18  ;;  %1556 = vrot.lane.b32.xlu1 %v1545_v37, %s4063_s5  ;;  %v1871_v60 = vrot.slane %v1865_v42, 4 }
 0x549   : > { %1808 = vrot.lane.b32.xlu0 %v1806_v1, %s4062_s18  ;;  %1520 = vrot.lane.b32.xlu1 %v1518_v18, %s4064_s21  ;;  %s4079_s18 = smov 51   ;;  %s4082_s21 = smov 53  }
 0x54d   : > { %1745 = vrot.lane.b32.xlu1 %v1743_v28, %s4063_s5  ;;  %1876 = vrot.lane.b32.xlu0 %v1865_v42, %s4065_s29  ;;  %s4080_s5 = smov 15   ;;  %s4083_s29 = smov 107  }
 0x551   : > { %1835 = vrot.lane.b32.xlu1 %v1833_v27, %s2983_s27  ;;  %1642 = vrot.lane.b32.xlu0 %v1641_v39, %s4066_s26  ;;  %s4069_s27 = smov 69   ;;  %s4085_s26 = smov 123  }
 0x553   : > { %v3703_v43 = vpop.permute.xlu0 %1585 }
 0x554   : > { %1589 = vst.msk [vmem:[#allocation3 + $0x20] sm:$0xf] %vm462_vm5, %v3703_v43 }
 0x555   : > { %1547 = vrot.lane.b32.xlu1 %v1545_v37, %s4067_s28  ;;  %1444 = vrot.lane.b32.xlu0 %v1443_v40, %s4068_s22  ;;  %s4086_s28 = smov 49   ;;  %s4087_s22 = smov 87  }
 0x557   : > { %v3710_v46 = vpop.permute.xlu0 %1574  ;;  %v1395_v24 = vpop.permute.xlu1 %1394 }
 0x558   : > { %1578 = vst.msk [vmem:[#allocation3 + $0x8] sm:$0xf] %vm247_vm6, %v3710_v46  ;;  %1397 = vst.msk [vmem:[#allocation3 + $0x18] sm:$0xf] %vm247_vm6, %v1395_v24  ;;  %vm4084_vm6 = vcmask 289936  }
 0x559   : > { %1610 = vrot.lane.b32.xlu1 %v1608_v36, %s4048_s17  ;;  %1696 = vrot.lane.b32.xlu0 %v1695_v45, %s4069_s27  ;;  %s4075_s17 = smov 127   ;;  %s4088_s27 = smov 13  }
 0x55d   : > { %1817 = vrot.lane.b32.xlu1 %v1806_v1, %s4070_s23  ;;  %1498 = vrot.lane.b32.xlu0 %v1497_v30, %s4071_s8  ;;  %s4123_s23 = smov 92   ;;  %s2637_s8 = smul.u32 12, %s3176_s24 }
 0x561   : > { %1580 = vrot.lane.b32.xlu1 %v1579_v47, %s4072_s9  ;;  %1525 = vrot.lane.b32.xlu0 %v1524_v48, %s4073_s6  ;;  %s2644_s9 = smul.u32 192, %s3079_s16  ;;  %s215_s6 = scalar_lea.vmem [#allocation10], %s2637_s8 }
 0x562   : > { %s3037_s16 = smov [#allocation10]  }
 0x563   : > { %v1422_v51 = vpop.permute.xlu1 %1421 }
 0x564   : > { %1424 = vst.msk [vmem:[#allocation3 + $0x18] sm:$0xf] %vm4074_vm0, %v1422_v51  ;;  %vm4095_vm0 = vcmask 732736  }
 0x565   : > { %1390 = vrot.lane.b32.xlu1 %v1389_v49, %s4075_s17  ;;  %1750 = vrot.lane.b32.xlu0 %v1749_v50, %s4076_s20  ;;  %s2442_s17 = sshll.u32 %s215_s6, 4  ;;  %s2443_s17 = int_to_ptr.vmem [resolvable:$true] %s2442_s17 }
 0x567   : > { %v1647_v56 = vpop.permute.xlu0 %1646 }
 0x569   : > { %1417 = vrot.lane.b32.xlu1 %v1416_v52, %s4077_s30  ;;  %1840 = vrot.lane.b32.xlu0 %v1839_v53, %s4078_s4  ;;  %s2440_s4 = scalar_lea.hbm %s3904_s3, %s2644_s9 }
 0x56d   : > { %1669 = vrot.lane.b32.xlu1 %v1668_v55, %s4079_s18  ;;  %1615 = vrot.lane.b32.xlu0 %v1614_v8, %s4080_s5  ;;  %s2428_s18 = scalar_lea.sflag [#allocation6], %s3176_s24  ;;  %s2880_s5 = scalar_lea.vmem %s2443_s17, 192 }
 0x56e   : > { %p2881_p3 = scmp.ne.s32.totalorder %s2443_s17, %s2880_s5 }
 0x56f   : > { %v1449_v59 = vpop.permute.xlu0 %1448 }
 0x570   : > { %1451 = vst.msk [vmem:[#allocation3 + $0x18] sm:$0xf] %vm4081_vm1, %v1449_v59  ;;  %vm4096_vm1 = vcmask 257136   ;;  %v1888_v59 = vld [vmem:[#allocation9 + $0x4] sm:$0xf]  ;;  %p2882_p1 = pnand %p2881_p3, %p4156_p11 }
 0x571   : > { %1471 = vrot.lane.b32.xlu1 %v1470_v12, %s4082_s21  ;;  %1552 = vrot.lane.b32.xlu0 %v1551_v57, %s4083_s29  ;;  %s2884_s21 = sshll.u32 %s3037_s16, 4  ;;  %s2885_s21 = int_to_ptr.vmem [resolvable:$false] %s2884_s21 }
 0x572   : > { %p2883_p2 = pneg %p2882_p1  ;;  %s2886_s29 = scalar_lea.vmem %s2885_s21, 384 }
 0x573   : > { %v1413_v61 = vpop.permute.xlu0 %1412  ;;  %v1674_v3 = vpop.permute.xlu1 %1673  ;;  %p2887_p6 = scmp.lt.s32.totalorder %s2443_s17, %s2885_s21  ;;  %p2888_p12 = scmp.lt.s32.totalorder %s2886_s29, %s2880_s5 }
 0x574   : > { %1415 = vst.msk [vmem:[#allocation3] sm:$0xf] %vm4084_vm6, %v1413_v61  ;;  %vm4097_vm6 = vcmask 404736  }
 0x575   : > { %1778 = vrot.lane.b32.xlu1 %v1777_v20, %s4085_s26  ;;  %1872 = vrot.lane.b32.xlu0 %v1871_v60, %s4086_s28  ;;  %p2889_p7 = por %p2888_p12, %p2887_p6 }
 0x577   : > { %v1638_v5 = vpop.permute.xlu1 %1637  ;;  %p2890_p9 = pnand %p2889_p7, %p2883_p2 }
 0x579   : > { %1723 = vrot.lane.b32.xlu1 %v1722_v34, %s4087_s22  ;;  %v1880_v34 = vld [vmem:[#allocation9] sm:$0xf] }
 0x57d   : > { %1813 = vrot.lane.b32.xlu1 %v1812_v44, %s4088_s27 }
 0x581   : > { %1867 = vrot.lane.b32.xlu1 %v1865_v42, %s4049_s25  ;;  %s4120_s25 = smov 110  }
 0x583   : > { %v1476_v54 = vpop.permute.xlu0 %1475 }
 0x584   : > { %1478 = vst.msk [vmem:[#allocation3 + $0x18] sm:$0xf] %vm4089_vm13, %v1476_v54  ;;  %vm4098_vm13 = vcmask 1044448  }
 0x587   : > { %v1701_v7 = vpop.permute.xlu1 %1700 }
 0x58b   : > { %v1440_v9 = vpop.permute.xlu1 %1439 }
 0x58c   : > { %1442 = vst.msk [vmem:[#allocation3] sm:$0xf] %vm4090_vm14, %v1440_v9  ;;  %vm4099_vm14 = vcmask 552336  }
 0x58f   : > { %v1784_v10 = vpop.permute.xlu0 %1783 }
 0x590   : > { %1787 = vst.msk [vmem:[#allocation3 + $0x28] sm:$0xf] %vm4091_vm15, %v1784_v10  ;;  %vm4101_vm15 = vcmask 847536  }
 0x593   : > { %v1665_v4 = vpop.permute.xlu0 %1664  ;;  %v1503_v11 = vpop.permute.xlu1 %1502 }
 0x594   : > { %1505 = vst.msk [vmem:[#allocation3 + $0x18] sm:$0xf] %vm4092_vm4, %v1503_v11  ;;  %vm4102_vm4 = vmmov %vm4096_vm1 }
 0x597   : > { %v1728_v14 = vpop.permute.xlu0 %1727  ;;  %v1692_v17 = vpop.permute.xlu1 %1691 }
 0x59b   : > { %v1467_v15 = vpop.permute.xlu0 %1466 }
 0x59c   : > { %1469 = vst.msk [vmem:[#allocation3] sm:$0xf] %vm4093_vm2, %v1467_v15  ;;  %vm4103_vm2 = vcmask 880336  }
 0x5a7   : > { %v1530_v16 = vpop.permute.xlu0 %1529 }
 0x5a8   : > { %1532 = vst.msk [vmem:[#allocation3 + $0x18] sm:$0xf] %vm4094_vm12, %v1530_v16  ;;  %vm4104_vm12 = vcmask 995136  }
 0x5ab   : > { %v1773_v18 = vpop.permute.xlu0 %1772 }
 0x5ac   : > { %1776 = vst.msk [vmem:[#allocation3 + $0x10] sm:$0xf] %vm462_vm5, %v1773_v18  ;;  %vm4100_vm5 = vcmask 699936  }
 0x5af   : > { %v1845_v19 = vpop.permute.xlu0 %1844  ;;  %v1755_v21 = vpop.permute.xlu1 %1754 }
 0x5b3   : > { %v1719_v22 = vpop.permute.xlu0 %1718  ;;  %v1494_v23 = vpop.permute.xlu1 %1493 }
 0x5b4   : > { %1496 = vst.msk [vmem:[#allocation3] sm:$0xf] %vm4095_vm0, %v1494_v23  ;;  %vm4105_vm0 = vcmask 1044432  }
 0x5b7   : > { %v1620_v25 = vpop.permute.xlu0 %1619  ;;  %v1557_v26 = vpop.permute.xlu1 %1556 }
 0x5b8   : > { %1622 = vst.msk [vmem:[#allocation3 + $0x20] sm:$0xf] %vm4096_vm1, %v1620_v25  ;;  %vm4106_vm1 = vmmov %vm4097_vm6 }
 0x5b9   : > { %1559 = vst.msk [vmem:[#allocation3 + $0x18] sm:$0xf] %vm427_vm11, %v1557_v26 }
 0x5ba   : > { %1649 = vst.msk [vmem:[#allocation3 + $0x20] sm:$0xf] %vm4097_vm6, %v1647_v56  ;;  %vm4107_vm6 = vcmask 1027936  }
 0x5bb   : > { %1588 = vst.msk [vmem:[#allocation3 + $0x18] sm:$0xf] %vm4098_vm13, %v3703_v43  ;;  %v1809_v27 = vpop.permute.xlu0 %1808  ;;  %v1521_v28 = vpop.permute.xlu1 %1520  ;;  %vm4108_vm13 = vcmask 1044464  }
 0x5bc   : > { %1676 = vst.msk [vmem:[#allocation3 + $0x20] sm:$0xf] %vm4099_vm14, %v1674_v3  ;;  %vm4109_vm14 = vcmask 273536  }
 0x5bd   : > { %1703 = vst.msk [vmem:[#allocation3 + $0x20] sm:$0xf] %vm4100_vm5, %v1701_v7  ;;  %vm4110_vm5 = vcmask 421136  }
 0x5be   : > { %1730 = vst.msk [vmem:[#allocation3 + $0x20] sm:$0xf] %vm4101_vm15, %v1728_v14  ;;  %vm4111_vm15 = vcmask 568736  }
 0x5bf   : > { %1811 = vst.msk [vmem:[#allocation3 + $0x10] sm:$0xf] %vm4102_vm4, %v1809_v27  ;;  %v1877_v29 = vpop.permute.xlu0 %1876  ;;  %v1746_v31 = vpop.permute.xlu1 %1745  ;;  %vm4112_vm4 = vcmask 716336  }
 0x5c0   : > { %1523 = vst.msk [vmem:[#allocation3] sm:$0xf] %vm4103_vm2, %v1521_v28  ;;  %vm4113_vm2 = vcmask 863936  }
 0x5c1   : > { %1757 = vst.msk [vmem:[#allocation3 + $0x20] sm:$0xf] %vm4104_vm12, %v1755_v21  ;;  %vm4114_vm12 = vcmask 240736  }
 0x5c2   : > { %1786 = vst.msk [vmem:[#allocation3 + $0x20] sm:$0xf] %vm4105_vm0, %v1784_v10  ;;  %vm4115_vm0 = vcmask 388336   ;;  %v1884_v56 = vld [vmem:[#allocation3 + $0x18] sm:$0xf] }
 0x5c3   : > { %v1643_v32 = vpop.permute.xlu0 %1642  ;;  %v1836_v33 = vpop.permute.xlu1 %1835 }
 0x5c4   : > { %1838 = vst.msk [vmem:[#allocation3 + $0x10] sm:$0xf] %vm4106_vm1, %v1836_v33  ;;  %vm4116_vm1 = vcmask 1044448  }
 0x5c7   : > { %v1445_v35 = vpop.permute.xlu0 %1444  ;;  %v1548_v36 = vpop.permute.xlu1 %1547 }
 0x5c8   : > { %1550 = vst.msk [vmem:[#allocation3] sm:$0xf] %vm4107_vm6, %v1548_v36  ;;  %vm4117_vm6 = vcmask 535936  }
 0x5c9   : > { %1577 = vst.msk [vmem:[#allocation3] sm:$0xf] %vm4108_vm13, %v3710_v46  ;;  %vm4118_vm13 = vcmask 121860   ;;  %v1885_v55 = vld [vmem:[#allocation3 + $0x20] sm:$0xf] }
 0x5cb   : > { %v1697_v37 = vpop.permute.xlu0 %1696  ;;  %v1611_v38 = vpop.permute.xlu1 %1610 }
 0x5cc   : > { %1613 = vst.msk [vmem:[#allocation3 + $0x8] sm:$0xf] %vm4109_vm14, %v1611_v38  ;;  %vm4119_vm14 = vcmask 138244  }
 0x5cd   : > { %1640 = vst.msk [vmem:[#allocation3 + $0x8] sm:$0xf] %vm4110_vm5, %v1638_v5  ;;  %vm4122_vm5 = vcmask 433436  }
 0x5ce   : > { %1667 = vst.msk [vmem:[#allocation3 + $0x8] sm:$0xf] %vm4111_vm15, %v1665_v4  ;;  %vm4124_vm15 = vcmask 269436  }
 0x5cf   : > { %1694 = vst.msk [vmem:[#allocation3 + $0x8] sm:$0xf] %vm4112_vm4, %v1692_v17  ;;  %v1499_v63 = vpop.permute.xlu0 %1498  ;;  %v1818_v1 = vpop.permute.xlu1 %1817  ;;  %vm4125_vm4 = vcmask 417036   ;;  %v2215_v17 = vld [vmem:[#allocation9 + $0x8] sm:$0xf] }
 0x5d0   : > { %1721 = vst.msk [vmem:[#allocation3 + $0x8] sm:$0xf] %vm4113_vm2, %v1719_v22  ;;  %vm4126_vm2 = vcmask 564636  }
 0x5d1   : > { %1820 = vst.msk [vmem:[#allocation3 + $0x28] sm:$0xf] %vm4114_vm12, %v1818_v1  ;;  %vm4127_vm12 = vcmask 712236  }
 0x5d2   : > { %1748 = vst.msk [vmem:[#allocation3 + $0x8] sm:$0xf] %vm427_vm11, %v1746_v31  ;;  %vm4121_vm11 = vcmask 285836  }
 0x5d3   : > { %1847 = vst.msk [vmem:[#allocation3 + $0x28] sm:$0xf] %vm4115_vm0, %v1845_v19  ;;  %v1526_v6 = vpop.permute.xlu0 %1525  ;;  %v1581_v41 = vpop.permute.xlu1 %1580  ;;  %vm4128_vm0 = vcmask 581036  }
 0x5d4   : > { %1775 = vst.msk [vmem:[#allocation3 + $0x8] sm:$0xf] %vm4116_vm1, %v1773_v18  ;;  %vm4129_vm1 = vcmask 728636  }
 0x5d5   : > { %1879 = vst.msk [vmem:[#allocation3 + $0x28] sm:$0xf] %vm4117_vm6, %v1877_v29  ;;  %vm4130_vm6 = vcmask 876236  }
 0x5d6   : > { %1584 = vst.msk [vmem:[#allocation3 + $0x8] sm:$0xf0] %vm4118_vm13, %v1581_v41  ;;  %vm4131_vm13 = vcmask 1023836  }
 0x5d7   : > { %v1751_v13 = vpop.permute.xlu0 %1750  ;;  %v1391_v42 = vpop.permute.xlu1 %1390 }
 0x5d8   : > { %1393 = vst.msk [vmem:[#allocation3] sm:$0xf0] %vm4119_vm14, %v1391_v42  ;;  %vm4132_vm14 = vcmask 1048556  }
 0x5db   : > { %v1841_v40 = vpop.permute.xlu0 %1840  ;;  %v1418_v43 = vpop.permute.xlu1 %1417 }
 0x5dc   : > { %v1886_v39 = vld [vmem:[#allocation3 + $0x28] sm:$0xf]  ;;  %1420 = vst.msk [vmem:[#allocation3] sm:$0xf0] %vm4121_vm11, %v1418_v43  ;;  %vm4133_vm11 = vcmask 105476  }
 0x5dd   : > { %1905 = vrot.lane.b32.xlu0 %v1886_v39, %s4120_s25  ;;  %1447 = vst.msk [vmem:[#allocation3] sm:$0xf0] %vm4122_vm5, %v1445_v35  ;;  %vm4134_vm5 = vcmask 859836  }
 0x5df   : > { %v1616_v45 = vpop.permute.xlu0 %1615  ;;  %v1670_v46 = vpop.permute.xlu1 %1669 }
 0x5e0   : > { %1618 = vst.msk [vmem:[#allocation3 + $0x8] sm:$0xf0] %vm4124_vm15, %v1616_v45  ;;  %vm4135_vm15 = vcmask 1007436  }
 0x5e1   : > { %2226 = vrot.lane.b32.xlu0 %v1886_v39, %s4123_s23  ;;  %1645 = vst.msk [vmem:[#allocation3 + $0x8] sm:$0xf0] %vm4125_vm4, %v1643_v32  ;;  %vm4136_vm4 = vcmask 1048540  }
 0x5e2   : > { %1672 = vst.msk [vmem:[#allocation3 + $0x8] sm:$0xf0] %vm4126_vm2, %v1670_v46  ;;  %vm4137_vm2 = vcmask 253036  }
 0x5e3   : > { %1699 = vst.msk [vmem:[#allocation3 + $0x8] sm:$0xf0] %vm4127_vm12, %v1697_v37  ;;  %v1472_v24 = vpop.permute.xlu1 %1471  ;;  %v1553_v30 = vpop.permute.xlu0 %1552  ;;  %vm4138_vm12 = vcmask 400636  }
 0x5e4   : > { %1474 = vst.msk [vmem:[#allocation3] sm:$0xf0] %vm4128_vm0, %v1472_v24  ;;  %vm4139_vm0 = vcmask 548236  }
 0x5e5   : > { %1501 = vst.msk [vmem:[#allocation3] sm:$0xf0] %vm4129_vm1, %v1499_v63  ;;  %vm4140_vm1 = vcmask 552336  }
 0x5e6   : > { %1528 = vst.msk [vmem:[#allocation3] sm:$0xf0] %vm4130_vm6, %v1526_v6  ;;  %vm4141_vm6 = vcmask 97280  }
 0x5e7   : > { %1555 = vst.msk [vmem:[#allocation3] sm:$0xf0] %vm4131_vm13, %v1553_v30  ;;  %v1779_v47 = vpop.permute.xlu1 %1778  ;;  %v1873_v50 = vpop.permute.xlu0 %1872  ;;  %vm4142_vm13 = vmmov 0  }
 0x5e8   : > { %1583 = vst.msk [vmem:[#allocation3] sm:$0xf0] %vm4132_vm14, %v1581_v41  ;;  %vm4143_vm14 = vcmask 900096  }
 0x5e9   : > { %1782 = vst.msk [vmem:[#allocation3 + $0x10] sm:$0xf0] %vm4133_vm11, %v1779_v47  ;;  %vm4144_vm11 = vmmov %vm4141_vm6 }
 0x5eb   : > { %v1724_v48 = vpop.permute.xlu1 %1723 }
 0x5ec   : > { %1726 = vst.msk [vmem:[#allocation3 + $0x8] sm:$0xf0] %vm4134_vm5, %v1724_v48  ;;  %vm4145_vm5 = vmmov %vm4143_vm14 }
 0x5ed   : > { %1753 = vst.msk [vmem:[#allocation3 + $0x8] sm:$0xf0] %vm4135_vm15, %v1751_v13  ;;  %vm4146_vm15 = vmmov %vm4145_vm5 }
 0x5ee   : > { %1781 = vst.msk [vmem:[#allocation3 + $0x8] sm:$0xf0] %vm4136_vm4, %v1779_v47  ;;  %vm4147_vm4 = vmmov %vm4145_vm5 }
 0x5ef   : > { %v1814_v49 = vpop.permute.xlu1 %1813  ;;  %v1881_v53 = vld [vmem:[#allocation3] sm:$0xff] }
 0x5f0   : > { %1816 = vst.msk [vmem:[#allocation3 + $0x10] sm:$0xf0] %vm4137_vm2, %v1814_v49  ;;  %vm4148_vm2 = vmmov %vm4141_vm6 }
 0x5f1   : > { %1843 = vst.msk [vmem:[#allocation3 + $0x10] sm:$0xf0] %vm4138_vm12, %v1841_v40  ;;  %vm4149_vm12 = vcmask 752640  }
 0x5f2   : > { %1875 = vst.msk [vmem:[#allocation3 + $0x10] sm:$0xf0] %vm4139_vm0, %v1873_v50  ;;  %vm4150_vm0 = vmmov %vm4149_vm12 }
 0x5f3   : > { %v1868_v51 = vpop.permute.xlu1 %1867 }
 0x5f4   : > { %1870 = vst.msk [vmem:[#allocation3 + $0x10] sm:$0xf] %vm4140_vm1, %v1868_v51  ;;  %vm4151_vm1 = vmmov %vm4148_vm2 }
 0x5f5   : > { %v1882_v52 = vld [vmem:[#allocation3 + $0x8] sm:$0xff] }
 0x5f6   : > { %1897 = vrot.lane.b32.xlu0 %v1882_v52, %s4120_s25 }
 0x5fa   : > { %1895 = vrot.lane.b32.xlu0 %v1881_v53, %s4120_s25 }
 0x5fb   : > { %v1883_v8 = vld [vmem:[#allocation3 + $0x10] sm:$0xff] }
 0x5fc   : > { %1899 = vrot.lane.b32.xlu1 %v1883_v8, %s4120_s25 }
 0x5fe   : > { %2218 = vrot.lane.b32.xlu0 %v1882_v52, %s4123_s23 }
 0x600   : > { %1903 = vrot.lane.b32.xlu1 %v1885_v55, %s4120_s25 }
 0x602   : > { %2216 = vrot.lane.b32.xlu0 %v1881_v53, %s4123_s23 }
 0x604   : > { %1901 = vrot.lane.b32.xlu1 %v1884_v56, %s4120_s25 }
 0x608   : > { %2224 = vrot.lane.b32.xlu1 %v1885_v55, %s4123_s23 }
 0x60c   : > { %2222 = vrot.lane.b32.xlu1 %v1884_v56, %s4123_s23 }
 0x610   : > { %2220 = vrot.lane.b32.xlu1 %v1883_v8, %s4123_s23 }
 0x64f   : > { %v1906_v12 = vpop.permute.xlu0 %1905 }
 0x650   : > { %2617 = vmatpush3.msk.msra.mxu1 %vm798_vm3, %v1906_v12 }
 0x651   : > { %2618 = vmatprep.subr.mxu1 %v2988_v62 }
 0x653   : > { %v2227_v57 = vpop.permute.xlu0 %2226 }
 0x668   : > { %v1898_v60 = vpop.permute.xlu0 %1897 }
 0x66c   : > { %v1896_v3 = vpop.permute.xlu0 %1895 }
 0x66d   : > { %v1907_v9 = vsel %vm4147_vm4, %v1896_v3, %v1898_v60 }
 0x66e   : > { %v1900_v20 = vpop.permute.xlu1 %1899 }
 0x66f   : > { %2619 = vmatpush3.msra.mxu1 %v1900_v20  ;;  %v1908_v7 = vsel %vm4146_vm15, %v1898_v60, %v1900_v20 }
 0x670   : > { %2623 = vmatprep.subr.mxu1 %v2988_v62  ;;  %2621 = vmatmul.mubr.msk.f32.vlgmr.msra.gmra.mxu1 %vm4141_vm6, %v1888_v59  ;;  %v2219_v4 = vpop.permute.xlu0 %2218  ;;  %vm4152_vm6 = vmmov %vm4150_vm0 }
 0x671   : > { %2624 = vmatpush3.msk.msra.mxu1 %vm798_vm3, %v1886_v39  ;;  %2627 = vmatprep.mubr.msk.f32.mxu1 %vm4142_vm13, %v2988_v62 }
 0x672   : > { %2625 = vmatprep.subr.mxu1 %v2988_v62  ;;  %v1904_v61 = vpop.permute.xlu1 %1903 }
 0x673   : > { %v1910_v44 = vsel %vm4143_vm14, %v1904_v61, %v1906_v12  ;;  %2626 = vmatpush3.msra.mxu1 %v1883_v8  ;;  %vm4154_vm14 = vmmov %vm4151_vm1 }
 0x674   : > { %2558 = vmatprep.subr.msk.mxu0 %vm798_vm3, %v1910_v44  ;;  %2630 = vmatprep.subr.mxu1 %v2988_v62  ;;  %v2217_v16 = vpop.permute.xlu0 %2216 }
 0x675   : > { %2628 = vmatmul.mubr.msk.f32.vlgmr.msra.gmra.mxu1 %vm4144_vm11, %v1880_v34  ;;  %vm4155_vm11 = vmmov %vm4151_vm1 }
 0x676   : > { %2631 = vmatpush3.msk.msra.mxu1 %vm798_vm3, %v2227_v57  ;;  %v1902_v5 = vpop.permute.xlu1 %1901  ;;  %2634 = vmatprep.mubr.msk.f32.mxu1 %vm4142_vm13, %v2988_v62  ;;  %vm4153_vm13 = vmmov %vm4150_vm0 }
 0x677   : > { %v1909_v54 = vsel %vm4145_vm5, %v1902_v5, %v1904_v61  ;;  %2632 = vmatprep.subr.mxu1 %v2988_v62  ;;  %v2228_v21 = vsel %vm4153_vm13, %v2217_v16, %v2219_v4 }
 0x678   : > { %2559 = vmatpush1.msk.msra.mxu0 %vm798_vm3, %v1909_v54 }
 0x679   : > { %1953 = vmatprep.subr.mxu0 %v1908_v7 }
 0x67a   : > { %1954 = vmatpush1.msra.mxu0 %v1907_v9  ;;  %v2225_v10 = vpop.permute.xlu1 %2224 }
 0x67b   : > { %2560 = vmatmul.mubr.msk.f32.vlgmr.msra.gmra.mxu0 %vm4148_vm2, %v1888_v59  ;;  %2563 = vmatprep.subr.msk.mxu0 %vm798_vm3, %v1885_v55  ;;  %v2231_v11 = vsel %vm4149_vm12, %v2225_v10, %v2227_v57 }
 0x67c   : > { %2564 = vmatpush1.msk.msra.mxu0 %vm798_vm3, %v1884_v56  ;;  %2137 = vmatprep.mubr.f32.mxu0 %v2988_v62 }
 0x67d   : > { %2103 = vmatprep.subr.mxu0 %v1882_v52 }
 0x67e   : > { %2104 = vmatpush1.msra.mxu0 %v1881_v53  ;;  %v2223_v14 = vpop.permute.xlu1 %2222 }
 0x67f   : > { %v2230_v15 = vsel %vm4150_vm0, %v2223_v14, %v2225_v10  ;;  %2565 = vmatmul.mubr.msk.f32.vlgmr.msra.gmra.mxu0 %vm4151_vm1, %v1880_v34  ;;  %2568 = vmatprep.subr.msk.mxu0 %vm798_vm3, %v2231_v11 }
 0x680   : > { %2569 = vmatpush1.msk.msra.mxu0 %vm798_vm3, %v2230_v15  ;;  %2308 = vmatprep.mubr.f32.mxu0 %v2988_v62 }
 0x682   : > { %v2221_v18 = vpop.permute.xlu1 %2220 }
 0x683   : > { %2633 = vmatpush3.msra.mxu1 %v2221_v18  ;;  %v2229_v19 = vsel %vm4152_vm6, %v2219_v4, %v2221_v18 }
 0x684   : > { %2274 = vmatprep.subr.mxu0 %v2229_v19  ;;  %2635 = vmatmul.mubr.msk.f32.vlgmr.msra.gmra.mxu1 %vm4154_vm14, %v2215_v17 }
 0x685   : > { %2275 = vmatpush1.msra.mxu0 %v2228_v21 }
 0x686   : > { %2570 = vmatmul.mubr.msk.f32.vlgmr.msra.gmra.mxu0 %vm4155_vm11, %v2215_v17 }
 0x730   : > { %v2060_v22 = vpop.f32.mrf.mxu1 }
 0x732   : > { %v2622_v23 = vpop.f32.mrf.mxu1 }
 0x735   : > { %v2210_v25 = vpop.f32.mrf.mxu1 }
 0x736   : > { %v2211_v29 = vadd.f32 %v2210_v25, %v2060_v22 }
 0x737   : > { %v2629_v26 = vpop.f32.mrf.mxu1 }
 0x73b   : > { %v1989_v27 = vpop.f32.mrf.mxu0 }
 0x73d   : > { %v1991_v62 = vpop.f32.mrf.mxu0 }
 0x73f   : > { %v2139_v28 = vpop.f32.mrf.mxu0 }
 0x740   : > { %v2140_v33 = vadd.f32 %v2139_v28, %v1989_v27 }
 0x741   : > { %v2141_v31 = vpop.f32.mrf.mxu0 }
 0x742   : > { %v2142_v37 = vadd.f32 %v2141_v31, %v1991_v62 }
 0x744   : > { %v2381_v32 = vpop.f32.mrf.mxu1 }
 0x745   : > { %v2387_v38 = vadd.f32 %v2381_v32, %v2211_v29 }
 0x746   : > { %v2310_v35 = vpop.f32.mrf.mxu0  ;;  %v2636_v36 = vpop.f32.mrf.mxu1 }
 0x747   : > { %v2385_v63 = vadd.f32 %v2310_v35, %v2140_v33  ;;  %v2390_v13 = vsel %vm3512_vm8, %v2387_v38, 0.0 }
 0x748   : > { %v2312_v1 = vpop.f32.mrf.mxu0  ;;  %v2394_v45 = vsel %vm1338_vm9, %v2390_v13, 0.0 }
 0x749   : > { %v2388_v6 = vsel %vm3508_vm7, %v2385_v63, 0.0  ;;  %v2386_v41 = vadd.f32 %v2312_v1, %v2142_v37 }
 0x74a   : > { %v2391_v39 = vsel %vm798_vm3, %v2388_v6, 0.0 }
 0x74b   : > { %v2389_v42 = vsel %vm3516_vm10, %v2386_v41, 0.0 }
 0x74c   : > { %v2392_v40 = vsel %vm798_vm3, %v2389_v42, 0.0 }
 0x74d   : > { %v2393_v43 = vadd.f32 %v2392_v40, %v2391_v39 }
 0x74f   : > { %v2395_v46 = vadd.f32 %v2394_v45, %v2393_v43 }
 0x751   : > { %2396 = vadd.xlane.f32.xlu1 %v2395_v46 }
 0x7da   : > { %v2397_v24 = vpop.xlane.xlu1 %2396 }
 0x7db   : > { %v2398_v30 = vmul.f32 0.00390625, %v2397_v24 }
 0x7dd   : > { %v2399_v47 = vsub.f32 %v2385_v63, %v2398_v30  ;;  %v2400_v48 = vsub.f32 %v2386_v41, %v2398_v30  ;;  %v2401_v49 = vsub.f32 %v2387_v38, %v2398_v30 }
 0x7df   : > { %v2402_v50 = vmul.f32 %v2399_v47, %v2399_v47  ;;  %v2403_v51 = vmul.f32 %v2400_v48, %v2400_v48  ;;  %v2404_v52 = vmul.f32 %v2401_v49, %v2401_v49 }
 0x7e1   : > { %v2405_v53 = vsel %vm3508_vm7, %v2402_v50, 0.0  ;;  %v2406_v8 = vsel %vm3516_vm10, %v2403_v51, 0.0  ;;  %v2407_v55 = vsel %vm3512_vm8, %v2404_v52, 0.0 }
 0x7e2   : > { %v2408_v56 = vsel %vm798_vm3, %v2405_v53, 0.0  ;;  %v2409_v12 = vsel %vm798_vm3, %v2406_v8, 0.0  ;;  %v2411_v59 = vsel %vm1338_vm9, %v2407_v55, 0.0 }
 0x7e3   : > { %v2410_v57 = vadd.f32 %v2409_v12, %v2408_v56 }
 0x7e5   : > { %v2412_v20 = vadd.f32 %v2411_v59, %v2410_v57 }
 0x7e7   : > { %2413 = vadd.xlane.f32.xlu0 %v2412_v20 }
 0x870   : > { %v2414_v60 = vpop.xlane.xlu0 %2413 }
 0x871   : > { %v2415_v61 = vmul.f32 0.00390625, %v2414_v60 }
 0x873   : > { %v2416_v58 = vadd.f32 1e-05, %v2415_v61 }
 0x875   : > { %2798 = vrsqrt.f32 %v2416_v58 }
 0x882   : > { %v2799_v2 = vpop.eup %2798 }
 0x883   : > { %v2418_v0 = vmul.f32 %v2799_v2, %v2399_v47  ;;  %v2419_v34 = vmul.f32 %v2799_v2, %v2400_v48  ;;  %v2420_v44 = vmul.f32 %v2799_v2, %v2401_v49 }
 0x885   : > { %v2423_v3 = vcombine.low %v2418_v0, %v2419_v34  ;;  %2426 = vst.msk [vmem:[%s215_s6 + $0x8] sm:$0xf] %vm1338_vm9, %v2420_v44 }
 0x887   : > { %2425 = vst [vmem:[%s215_s6] sm:$0xff] %v2423_v3 }
 0x888   : > { %2893 = shalt.err (!%p2890_p9)
}
 0x889   : > { %s2894_s26 = scalar_lea.hbm %s2440_s4, 192  ;;  %s2898_s22 = scalar_lea.hbm %s3904_s3, 384 }
 0x88a   : > { %p2895_p13 = scmp.ne.s32.totalorder %s2440_s4, %s2894_s26  ;;  %p2899_p0 = scmp.lt.s32.totalorder %s2440_s4, %s3904_s3 }
 0x88b   : > { %p2900_p4 = scmp.lt.s32.totalorder %s2898_s22, %s2894_s26 }
 0x88c   : > { %p2896_p5 = pnand %p2895_p13, %p4156_p11 }
 0x88d   : > { %p2901_p8 = por %p2900_p4, %p2899_p0 }
 0x88e   : > { %p2897_p10 = pneg %p2896_p5 }
 0x890   : > { %p2902_p3 = pnand %p2901_p8, %p2897_p10 }
 0x892   : > { %2905 = shalt.err (!%p2902_p3)
}
 0x893   : > { %2655 = dma.vmem_to_hbm [thread:$0]  (%p4156_p11), %s2443_s17, 192, %s2440_s4, %s2428_s18  }
 0x894 PF: > { %s2454_s23 = sand.u32 1, %s2936_s12   ;;  %p4157_p1 = scmp.ne.s32.totalorder %s4021_s19, 0 }
 0x895   : > { %p4158_p2 = scmp.ge.s32.totalorder %s2948_s15, 2  ;;  %s2455_s8 = scalar_lea.sflag [#allocation6], %s2454_s23 }
 0x897   : > { %p2669_p6 = pnand %p4158_p2, %p4157_p1 }
 0x899   : > { %p2670_p12 = pneg %p2669_p6 }
 0x89b   : > { %2931 = dma.done.wait (%p2670_p12), %s2455_s8, 192  }
 0x89c   : > { %2933 = vsyncadd (%p2670_p12), %s2455_s8, 4294967104  ;;  %p17_p7 = scmp.ge.s32.totalorder %s3130_s7, 4   ;;  %s4159_s12 = smov %s2940_s13 }
 0x89d   : > { %s4160_s13 = smov %s2944_s14  ;;  %s4161_s14 = smov %s3146_s11 }
 0x89e   : > { %s4162_s15 = smov %s3130_s7  ;;  %19 = sbr.rel (!%p17_p7) target bundleno = 6 (0x6), region = 89 }
 0x8a3   :  { %2460 = vsyncpa [#allocation5], 1 }
 0x8a4   :  { %2462 = vsyncpa [#allocation5 + $0x1], 1 }
 0x8a5   :  { %2463 = vsyncpa [#allocation8], 1 }
 0x8a6   :  { %2464 = vsyncpa [#allocation6], 1 }
 0x8a7   :  { %2466 = vsyncpa [#allocation6 + $0x1], 1 }

</bundles_post_ra>
